<compile_context>
chip_gen: v7x
topology: tpu7x:2x2x1
jax: 0.10.0
libtpu: 0.0.40
codegen_flags: <defaults>
</compile_context>

<pallas_src>
import functools

import jax
import jax.numpy as jnp
from jax.experimental import pallas as pl
from jax.experimental.pallas import tpu as pltpu


# ---------------------------------------------------------------------------
# In-kernel helpers.
# ---------------------------------------------------------------------------
def _sigmoid(x):
    # exp and reciprocal both land on the EUP slot (no VALU divide on the
    # serial per-step critical path).
    return pl.reciprocal(1.0 + jnp.exp(-x), approx=False)


def _lstm_cell(gates, c, H):
    """gates: (B, 4H) in PyTorch order i,f,g,o; c: (B, H). Returns (h_new, c_new)."""
    i = _sigmoid(gates[:, 0 * H:1 * H])
    f = _sigmoid(gates[:, 1 * H:2 * H])
    g = jnp.tanh(gates[:, 2 * H:3 * H])
    o = _sigmoid(gates[:, 3 * H:4 * H])
    c_new = f * c + i * g
    h_new = o * jnp.tanh(c_new)
    return h_new, c_new


def _bilstm_layer(x2d, S, B, H, wih_ref, whh_ref, b_ref, y_ref=None):
    """One bidirectional LSTM layer, fully unrolled over time.

    x2d:     (S*B, E_in) value; row s*B + b is (time s, batch b).
    wih_ref: (E_in, 8H)  columns = [fwd gates i,f,g,o | bwd gates i,f,g,o].
    whh_ref: (2H, 8H)    block-diagonal [W_hh_fwd.T, 0 ; 0, W_hh_bwd.T].
    b_ref:   (1, 8H)     b_ih + b_hh for both directions.
    y_ref:   optional (S*B, 2H) VMEM scratch; receives the time-ordered output.

    Returns sum over time of [h_fwd(t) | h_bwd(t)]  -> (B, 2H), used for mean pool.
    """
    G = 4 * H
    # Hoisted input projection: ONE (S*B, E_in) x (E_in, 8H) matmul for every time
    # step of both directions (32 MXU rows instead of 4, one push instead of 16).
    gx = jnp.dot(x2d, wih_ref[...], preferred_element_type=jnp.float32) + b_ref[...]
    whh = whh_ref[...]

    h_f = jnp.zeros((B, H), jnp.float32)
    h_b = jnp.zeros((B, H), jnp.float32)
    c_f = jnp.zeros((B, H), jnp.float32)
    c_b = jnp.zeros((B, H), jnp.float32)
    acc = jnp.zeros((B, 2 * H), jnp.float32)

    for s in range(S):  # short fixed trip count -> unrolled at trace time
        h_cat = jnp.concatenate([h_f, h_b], axis=1)                      # (B, 2H)
        # Single 8H-wide MXU push covers the recurrent matmul of BOTH directions.
        gh = jnp.dot(h_cat, whh, preferred_element_type=jnp.float32)     # (B, 8H)
        g_f = gx[s * B:(s + 1) * B, 0:G] + gh[:, 0:G]                    # fwd @ time s
        g_b = gx[(S - 1 - s) * B:(S - s) * B, G:2 * G] + gh[:, G:2 * G]  # bwd @ time S-1-s
        h_f, c_f = _lstm_cell(g_f, c_f, H)
        h_b, c_b = _lstm_cell(g_b, c_b, H)
        if y_ref is not None:
            # Write the two directions into halves of one buffer (no XLA concat,
            # no extra HBM pass between layers).
            y_ref[s * B:(s + 1) * B, 0:H] = h_f
            y_ref[(S - 1 - s) * B:(S - s) * B, H:2 * H] = h_b
        acc = acc + jnp.concatenate([h_f, h_b], axis=1)  # order-invariant time sum
    return acc


def _fused_kernel(S, B, H,
                  x_ref, wih0_ref, whh0_ref, b0_ref,
                  wih1_ref, whh1_ref, b1_ref,
                  wp_ref, bp_ref, wo_ref, bo_ref,
                  out_ref, y0_sc):
    # Layer 0: materialize the time-ordered (S*B, 2H) output in VMEM scratch.
    _bilstm_layer(x_ref[...], S, B, H, wih0_ref, whh0_ref, b0_ref, y_ref=y0_sc)
    # Layer 1: only the time-sum is needed downstream (mean pool).
    acc = _bilstm_layer(y0_sc[...], S, B, H, wih1_ref, whh1_ref, b1_ref, y_ref=None)
    feats = acc * (1.0 / S)                                              # (B, 2H)
    # Head: dropout is identity at inference; relu(linear_1) -> linear_2.
    proj = jnp.dot(feats, wp_ref[...], preferred_element_type=jnp.float32) + bp_ref[...]
    proj = jnp.maximum(proj, 0.0)
    out = jnp.dot(proj, wo_ref[...], preferred_element_type=jnp.float32) + bo_ref[...]
    out_ref[...] = out.astype(out_ref.dtype)


# ---------------------------------------------------------------------------
# Weight packing (done once, outside the kernel).
# ---------------------------------------------------------------------------
def _pack_direction_pair(fwd_p, bwd_p):
    w_ih_f, w_hh_f, b_ih_f, b_hh_f = fwd_p
    w_ih_b, w_hh_b, b_ih_b, b_hh_b = bwd_p
    H = w_hh_f.shape[1]
    wih = jnp.concatenate([w_ih_f.T, w_ih_b.T], axis=1)                  # (E_in, 8H)
    z = jnp.zeros((H, 4 * H), jnp.float32)
    whh = jnp.concatenate(
        [jnp.concatenate([w_hh_f.T, z], axis=1),
         jnp.concatenate([z, w_hh_b.T], axis=1)], axis=0)                # (2H, 8H)
    bias = jnp.concatenate([b_ih_f + b_hh_f, b_ih_b + b_hh_b]).reshape(1, 8 * H)
    return wih, whh, bias


def pack_params(params):
    H = params["w_proj"].shape[0]
    wih0, whh0, b0 = _pack_direction_pair(params["l0_fwd"], params["l0_bwd"])
    wih1, whh1, b1 = _pack_direction_pair(params["l1_fwd"], params["l1_bwd"])
    return {
        "embedding": params["embedding"], "H": H,
        "wih0": wih0, "whh0": whh0, "b0": b0,
        "wih1": wih1, "whh1": whh1, "b1": b1,
        "wp_t": params["w_proj"].T, "bp": params["b_proj"].reshape(1, -1),
        "wo_t": params["w_out"].T, "bo": params["b_out"].reshape(1, -1),
    }


# ---------------------------------------------------------------------------
# Forward pass: embedding gather (XLA glue) + ONE fused Pallas kernel.
# ---------------------------------------------------------------------------
def bilstm_forward(fused, tokens):
    S, B = tokens.shape
    emb = jnp.take(fused["embedding"], tokens, axis=0)          # (S, B, E) gather
    # TODO(synk): nn.Dropout layers are identity at inference; not modeled.
    E = emb.shape[-1]
    H = fused["H"]
    O = fused["wo_t"].shape[1]
    x2d = emb.reshape(S * B, E)

    def full_spec(shape):
        return pl.BlockSpec(shape, lambda i: (0,) * len(shape))

    operands = (x2d, fused["wih0"], fused["whh0"], fused["b0"],
                fused["wih1"], fused["whh1"], fused["b1"],
                fused["wp_t"], fused["bp"], fused["wo_t"], fused["bo"])
    return pl.pallas_call(
        functools.partial(_fused_kernel, S, B, H),
        out_shape=jax.ShapeDtypeStruct((B, O), jnp.float32),
        grid=(1,),
        in_specs=[full_spec(op.shape) for op in operands],
        out_specs=full_spec((B, O)),
        scratch_shapes=[pltpu.VMEM((S * B, 2 * H), jnp.float32)],  # layer-0 output
        compiler_params=pltpu.CompilerParams(dimension_semantics=("arbitrary",)),
    )(*operands)


# ---------------------------------------------------------------------------
# Pure-JAX reference for verification.
# ---------------------------------------------------------------------------
def _ref_lstm_direction(x, w_ih, w_hh, b_ih, b_hh, reverse):
    S, B, _ = x.shape
    H = w_hh.shape[1]

    def step(carry, xt):
        h, c = carry
        gates = xt @ w_ih.T + h @ w_hh.T + b_ih + b_hh
        i = jax.nn.sigmoid(gates[:, :H])
        f = jax.nn.sigmoid(gates[:, H:2 * H])
        g = jnp.tanh(gates[:, 2 * H:3 * H])
        o = jax.nn.sigmoid(gates[:, 3 * H:])
        c = f * c + i * g
        h = o * jnp.tanh(c)
        return (h, c), h

    xs = x[::-1] if reverse else x
    (_, _), hs = jax.lax.scan(step, (jnp.zeros((B, H)), jnp.zeros((B, H))), xs)
    return hs[::-1] if reverse else hs


def _ref_forward(params, tokens):
    x = jnp.take(params["embedding"], tokens, axis=0)
    for layer in range(2):
        fwd = _ref_lstm_direction(x, *params[f"l{layer}_fwd"], reverse=False)
        bwd = _ref_lstm_direction(x, *params[f"l{layer}_bwd"], reverse=True)
        x = jnp.concatenate([fwd, bwd], axis=-1)
    feats = jnp.mean(jnp.transpose(x, (1, 0, 2)), axis=1)
    proj = jax.nn.relu(feats @ params["w_proj"].T + params["b_proj"])
    return proj @ params["w_out"].T + params["b_out"]


# ---------------------------------------------------------------------------
# Deterministic parameter init (same shapes as the PyTorch module's layers).
# ---------------------------------------------------------------------------
def init_params(key, vocab, embed_dim, hidden, output_size):
    scale = 1.0 / jnp.sqrt(hidden)
    keys = iter(jax.random.split(key, 32))

    def u(shape):
        return jax.random.uniform(next(keys), shape, jnp.float32, -scale, scale)

    params = {"embedding": jax.random.normal(next(keys), (vocab, embed_dim), jnp.float32) * 0.1}
    for layer in range(2):
        e_in = embed_dim if layer == 0 else 2 * hidden
        for d in ("fwd", "bwd"):
            params[f"l{layer}_{d}"] = (
                u((4 * hidden, e_in)),    # w_ih
                u((4 * hidden, hidden)),  # w_hh
                u((4 * hidden,)),         # b_ih
                u((4 * hidden,)),         # b_hh
            )
    params["w_proj"] = u((hidden, 2 * hidden))
    params["b_proj"] = u((hidden,))
    params["w_out"] = u((output_size, hidden))
    params["b_out"] = u((output_size,))
    return params


if __name__ == "__main__":
    S, B, E, H, V, O = 8, 4, 128, 32, 50, 8  # seq, batch, embed_dim, hidden, vocab, outputs

    key = jax.random.PRNGKey(0)
    pkey, tkey = jax.random.split(key)
    params = init_params(pkey, V, E, H, O)
    tokens = jax.random.randint(tkey, (S, B), 0, V, dtype=jnp.int32)

    fused = pack_params(params)
    out = jax.jit(functools.partial(bilstm_forward, fused))(tokens)
    out = jax.block_until_ready(out)
    assert out.shape == (B, O), out.shape

    ref = jax.block_until_ready(_ref_forward(params, tokens))
    assert jnp.allclose(out, ref, atol=5e-3, rtol=5e-3), float(jnp.max(jnp.abs(out - ref)))

    print("KERNEL_OK")
</pallas_src>

<mosaic_0001>
module attributes {stable_mosaic.version = 11 : i64} {
  func.func @_fused_kernel(%arg0: i32, %arg1: memref<32x128xf32, #tpu.memory_space<vmem>>, %arg2: memref<128x256xf32, #tpu.memory_space<vmem>>, %arg3: memref<64x256xf32, #tpu.memory_space<vmem>>, %arg4: memref<1x256xf32, #tpu.memory_space<vmem>>, %arg5: memref<64x256xf32, #tpu.memory_space<vmem>>, %arg6: memref<64x256xf32, #tpu.memory_space<vmem>>, %arg7: memref<1x256xf32, #tpu.memory_space<vmem>>, %arg8: memref<64x32xf32, #tpu.memory_space<vmem>>, %arg9: memref<1x32xf32, #tpu.memory_space<vmem>>, %arg10: memref<32x8xf32, #tpu.memory_space<vmem>>, %arg11: memref<1x8xf32, #tpu.memory_space<vmem>>, %arg12: memref<4x8xf32, #tpu.memory_space<vmem>>, %arg13: memref<32x64xf32, #tpu.memory_space<vmem>>) attributes {dimension_semantics = [#tpu.dimension_semantics<arbitrary>], iteration_bounds = array<i64: 1>, scalar_prefetch = 0 : i64, scratch_operands = 1 : i64, tpu.core_type = #tpu.core_type<tc>, window_params = [{pipeline_mode = #tpu.pipeline_mode<synchronous>, transform_indices = @transform_0, window_bounds = array<i64: 32, 128>}, {pipeline_mode = #tpu.pipeline_mode<synchronous>, transform_indices = @transform_1, window_bounds = array<i64: 128, 256>}, {pipeline_mode = #tpu.pipeline_mode<synchronous>, transform_indices = @transform_2, window_bounds = array<i64: 64, 256>}, {pipeline_mode = #tpu.pipeline_mode<synchronous>, transform_indices = @transform_3, window_bounds = array<i64: 1, 256>}, {pipeline_mode = #tpu.pipeline_mode<synchronous>, transform_indices = @transform_4, window_bounds = array<i64: 64, 256>}, {pipeline_mode = #tpu.pipeline_mode<synchronous>, transform_indices = @transform_5, window_bounds = array<i64: 64, 256>}, {pipeline_mode = #tpu.pipeline_mode<synchronous>, transform_indices = @transform_6, window_bounds = array<i64: 1, 256>}, {pipeline_mode = #tpu.pipeline_mode<synchronous>, transform_indices = @transform_7, window_bounds = array<i64: 64, 32>}, {pipeline_mode = #tpu.pipeline_mode<synchronous>, transform_indices = @transform_8, window_bounds = array<i64: 1, 32>}, {pipeline_mode = #tpu.pipeline_mode<synchronous>, transform_indices = @transform_9, window_bounds = array<i64: 32, 8>}, {pipeline_mode = #tpu.pipeline_mode<synchronous>, transform_indices = @transform_10, window_bounds = array<i64: 1, 8>}, {pipeline_mode = #tpu.pipeline_mode<synchronous>, transform_indices = @transform_11, window_bounds = array<i64: 4, 8>}]} {
    %c0 = arith.constant 0 : index
    %c0_0 = arith.constant 0 : index
    %0 = vector.load %arg1[%c0, %c0_0] : memref<32x128xf32, #tpu.memory_space<vmem>>, vector<32x128xf32>
    %c0_1 = arith.constant 0 : index
    %c0_2 = arith.constant 0 : index
    %1 = vector.load %arg2[%c0_1, %c0_2] : memref<128x256xf32, #tpu.memory_space<vmem>>, vector<128x256xf32>
    %cst = arith.constant dense<0.000000e+00> : vector<32x256xf32>
    %2 = tpu.matmul %0, %1, %cst {dimension_numbers = #tpu.dot_dimension_numbers<[1], [0], [0], [1], [0, 0, 1, 1], [], []>} : vector<32x128xf32>, vector<128x256xf32>, vector<32x256xf32> -> vector<32x256xf32>
    %c0_3 = arith.constant 0 : index
    %c0_4 = arith.constant 0 : index
    %3 = vector.load %arg4[%c0_3, %c0_4] : memref<1x256xf32, #tpu.memory_space<vmem>>, vector<1x256xf32>
    %4 = vector.broadcast %3 : vector<1x256xf32> to vector<32x256xf32>
    %5 = arith.addf %2, %4 : vector<32x256xf32>
    %c0_5 = arith.constant 0 : index
    %c0_6 = arith.constant 0 : index
    %6 = vector.load %arg3[%c0_5, %c0_6] : memref<64x256xf32, #tpu.memory_space<vmem>>, vector<64x256xf32>
    %cst_7 = arith.constant 0.000000e+00 : f32
    %7 = vector.broadcast %cst_7 : f32 to vector<4x32xf32>
    %cst_8 = arith.constant 0.000000e+00 : f32
    %8 = vector.broadcast %cst_8 : f32 to vector<4x32xf32>
    %cst_9 = arith.constant 0.000000e+00 : f32
    %9 = vector.broadcast %cst_9 : f32 to vector<4x32xf32>
    %cst_10 = arith.constant 0.000000e+00 : f32
    %10 = vector.broadcast %cst_10 : f32 to vector<4x32xf32>
    %11 = tpu.concatenate %7, %8 in 1 : vector<4x32xf32>, vector<4x32xf32> -> vector<4x64xf32>
    %cst_11 = arith.constant dense<0.000000e+00> : vector<4x256xf32>
    %12 = tpu.matmul %11, %6, %cst_11 {dimension_numbers = #tpu.dot_dimension_numbers<[1], [0], [0], [1], [0, 0, 1, 1], [], []>} : vector<4x64xf32>, vector<64x256xf32>, vector<4x256xf32> -> vector<4x256xf32>
    %13 = vector.extract_strided_slice %5 {offsets = [0, 0], sizes = [4, 128], strides = [1, 1]} : vector<32x256xf32> to vector<4x128xf32>
    %14 = vector.extract_strided_slice %12 {offsets = [0, 0], sizes = [4, 128], strides = [1, 1]} : vector<4x256xf32> to vector<4x128xf32>
    %15 = arith.addf %13, %14 : vector<4x128xf32>
    %16 = vector.extract_strided_slice %5 {offsets = [28, 128], sizes = [4, 128], strides = [1, 1]} : vector<32x256xf32> to vector<4x128xf32>
    %17 = vector.extract_strided_slice %12 {offsets = [0, 128], sizes = [4, 128], strides = [1, 1]} : vector<4x256xf32> to vector<4x128xf32>
    %18 = arith.addf %16, %17 : vector<4x128xf32>
    %19 = vector.extract_strided_slice %15 {offsets = [0, 0], sizes = [4, 32], strides = [1, 1]} : vector<4x128xf32> to vector<4x32xf32>
    %cst_12 = arith.constant 0.000000e+00 : f32
    %20 = vector.broadcast %cst_12 : f32 to vector<4x32xf32>
    %21 = arith.subf %20, %19 : vector<4x32xf32>
    %22 = math.exp %21 : vector<4x32xf32>
    %cst_13 = arith.constant 1.000000e+00 : f32
    %23 = vector.broadcast %cst_13 : f32 to vector<4x32xf32>
    %24 = arith.addf %23, %22 : vector<4x32xf32>
    %25 = tpu.reciprocal %24 : vector<4x32xf32> -> vector<4x32xf32>
    %26 = vector.extract_strided_slice %15 {offsets = [0, 32], sizes = [4, 32], strides = [1, 1]} : vector<4x128xf32> to vector<4x32xf32>
    %cst_14 = arith.constant 0.000000e+00 : f32
    %27 = vector.broadcast %cst_14 : f32 to vector<4x32xf32>
    %28 = arith.subf %27, %26 : vector<4x32xf32>
    %29 = math.exp %28 : vector<4x32xf32>
    %cst_15 = arith.constant 1.000000e+00 : f32
    %30 = vector.broadcast %cst_15 : f32 to vector<4x32xf32>
    %31 = arith.addf %30, %29 : vector<4x32xf32>
    %32 = tpu.reciprocal %31 : vector<4x32xf32> -> vector<4x32xf32>
    %33 = vector.extract_strided_slice %15 {offsets = [0, 64], sizes = [4, 32], strides = [1, 1]} : vector<4x128xf32> to vector<4x32xf32>
    %34 = math.tanh %33 : vector<4x32xf32>
    %35 = vector.extract_strided_slice %15 {offsets = [0, 96], sizes = [4, 32], strides = [1, 1]} : vector<4x128xf32> to vector<4x32xf32>
    %cst_16 = arith.constant 0.000000e+00 : f32
    %36 = vector.broadcast %cst_16 : f32 to vector<4x32xf32>
    %37 = arith.subf %36, %35 : vector<4x32xf32>
    %38 = math.exp %37 : vector<4x32xf32>
    %cst_17 = arith.constant 1.000000e+00 : f32
    %39 = vector.broadcast %cst_17 : f32 to vector<4x32xf32>
    %40 = arith.addf %39, %38 : vector<4x32xf32>
    %41 = tpu.reciprocal %40 : vector<4x32xf32> -> vector<4x32xf32>
    %42 = arith.mulf %32, %9 : vector<4x32xf32>
    %43 = arith.mulf %25, %34 : vector<4x32xf32>
    %44 = arith.addf %42, %43 : vector<4x32xf32>
    %45 = math.tanh %44 : vector<4x32xf32>
    %46 = arith.mulf %41, %45 : vector<4x32xf32>
    %47 = vector.extract_strided_slice %18 {offsets = [0, 0], sizes = [4, 32], strides = [1, 1]} : vector<4x128xf32> to vector<4x32xf32>
    %cst_18 = arith.constant 0.000000e+00 : f32
    %48 = vector.broadcast %cst_18 : f32 to vector<4x32xf32>
    %49 = arith.subf %48, %47 : vector<4x32xf32>
    %50 = math.exp %49 : vector<4x32xf32>
    %cst_19 = arith.constant 1.000000e+00 : f32
    %51 = vector.broadcast %cst_19 : f32 to vector<4x32xf32>
    %52 = arith.addf %51, %50 : vector<4x32xf32>
    %53 = tpu.reciprocal %52 : vector<4x32xf32> -> vector<4x32xf32>
    %54 = vector.extract_strided_slice %18 {offsets = [0, 32], sizes = [4, 32], strides = [1, 1]} : vector<4x128xf32> to vector<4x32xf32>
    %cst_20 = arith.constant 0.000000e+00 : f32
    %55 = vector.broadcast %cst_20 : f32 to vector<4x32xf32>
    %56 = arith.subf %55, %54 : vector<4x32xf32>
    %57 = math.exp %56 : vector<4x32xf32>
    %cst_21 = arith.constant 1.000000e+00 : f32
    %58 = vector.broadcast %cst_21 : f32 to vector<4x32xf32>
    %59 = arith.addf %58, %57 : vector<4x32xf32>
    %60 = tpu.reciprocal %59 : vector<4x32xf32> -> vector<4x32xf32>
    %61 = vector.extract_strided_slice %18 {offsets = [0, 64], sizes = [4, 32], strides = [1, 1]} : vector<4x128xf32> to vector<4x32xf32>
    %62 = math.tanh %61 : vector<4x32xf32>
    %63 = vector.extract_strided_slice %18 {offsets = [0, 96], sizes = [4, 32], strides = [1, 1]} : vector<4x128xf32> to vector<4x32xf32>
    %cst_22 = arith.constant 0.000000e+00 : f32
    %64 = vector.broadcast %cst_22 : f32 to vector<4x32xf32>
    %65 = arith.subf %64, %63 : vector<4x32xf32>
    %66 = math.exp %65 : vector<4x32xf32>
    %cst_23 = arith.constant 1.000000e+00 : f32
    %67 = vector.broadcast %cst_23 : f32 to vector<4x32xf32>
    %68 = arith.addf %67, %66 : vector<4x32xf32>
    %69 = tpu.reciprocal %68 : vector<4x32xf32> -> vector<4x32xf32>
    %70 = arith.mulf %60, %10 : vector<4x32xf32>
    %71 = arith.mulf %53, %62 : vector<4x32xf32>
    %72 = arith.addf %70, %71 : vector<4x32xf32>
    %73 = math.tanh %72 : vector<4x32xf32>
    %74 = arith.mulf %69, %73 : vector<4x32xf32>
    %c0_24 = arith.constant 0 : index
    %c0_25 = arith.constant 0 : index
    %75 = vector.load %arg13[%c0_24, %c0_25] : memref<32x64xf32, #tpu.memory_space<vmem>>, vector<4x32xf32>
    tpu.vector_store %arg13[%c0_24, %c0_25], %46 {strides = array<i32>} : memref<32x64xf32, #tpu.memory_space<vmem>>, vector<4x32xf32>,
    %c28 = arith.constant 28 : index
    %c32 = arith.constant 32 : index
    %76 = vector.load %arg13[%c28, %c32] : memref<32x64xf32, #tpu.memory_space<vmem>>, vector<4x32xf32>
    tpu.vector_store %arg13[%c28, %c32], %74 {strides = array<i32>} : memref<32x64xf32, #tpu.memory_space<vmem>>, vector<4x32xf32>,
    %77 = tpu.concatenate %46, %74 in 1 : vector<4x32xf32>, vector<4x32xf32> -> vector<4x64xf32>
    %cst_26 = arith.constant dense<0.000000e+00> : vector<4x256xf32>
    %78 = tpu.matmul %77, %6, %cst_26 {dimension_numbers = #tpu.dot_dimension_numbers<[1], [0], [0], [1], [0, 0, 1, 1], [], []>} : vector<4x64xf32>, vector<64x256xf32>, vector<4x256xf32> -> vector<4x256xf32>
    %79 = vector.extract_strided_slice %5 {offsets = [4, 0], sizes = [4, 128], strides = [1, 1]} : vector<32x256xf32> to vector<4x128xf32>
    %80 = vector.extract_strided_slice %78 {offsets = [0, 0], sizes = [4, 128], strides = [1, 1]} : vector<4x256xf32> to vector<4x128xf32>
    %81 = arith.addf %79, %80 : vector<4x128xf32>
    %82 = vector.extract_strided_slice %5 {offsets = [24, 128], sizes = [4, 128], strides = [1, 1]} : vector<32x256xf32> to vector<4x128xf32>
    %83 = vector.extract_strided_slice %78 {offsets = [0, 128], sizes = [4, 128], strides = [1, 1]} : vector<4x256xf32> to vector<4x128xf32>
    %84 = arith.addf %82, %83 : vector<4x128xf32>
    %85 = vector.extract_strided_slice %81 {offsets = [0, 0], sizes = [4, 32], strides = [1, 1]} : vector<4x128xf32> to vector<4x32xf32>
    %cst_27 = arith.constant 0.000000e+00 : f32
    %86 = vector.broadcast %cst_27 : f32 to vector<4x32xf32>
    %87 = arith.subf %86, %85 : vector<4x32xf32>
    %88 = math.exp %87 : vector<4x32xf32>
    %cst_28 = arith.constant 1.000000e+00 : f32
    %89 = vector.broadcast %cst_28 : f32 to vector<4x32xf32>
    %90 = arith.addf %89, %88 : vector<4x32xf32>
    %91 = tpu.reciprocal %90 : vector<4x32xf32> -> vector<4x32xf32>
    %92 = vector.extract_strided_slice %81 {offsets = [0, 32], sizes = [4, 32], strides = [1, 1]} : vector<4x128xf32> to vector<4x32xf32>
    %cst_29 = arith.constant 0.000000e+00 : f32
    %93 = vector.broadcast %cst_29 : f32 to vector<4x32xf32>
    %94 = arith.subf %93, %92 : vector<4x32xf32>
    %95 = math.exp %94 : vector<4x32xf32>
    %cst_30 = arith.constant 1.000000e+00 : f32
    %96 = vector.broadcast %cst_30 : f32 to vector<4x32xf32>
    %97 = arith.addf %96, %95 : vector<4x32xf32>
    %98 = tpu.reciprocal %97 : vector<4x32xf32> -> vector<4x32xf32>
    %99 = vector.extract_strided_slice %81 {offsets = [0, 64], sizes = [4, 32], strides = [1, 1]} : vector<4x128xf32> to vector<4x32xf32>
    %100 = math.tanh %99 : vector<4x32xf32>
    %101 = vector.extract_strided_slice %81 {offsets = [0, 96], sizes = [4, 32], strides = [1, 1]} : vector<4x128xf32> to vector<4x32xf32>
    %cst_31 = arith.constant 0.000000e+00 : f32
    %102 = vector.broadcast %cst_31 : f32 to vector<4x32xf32>
    %103 = arith.subf %102, %101 : vector<4x32xf32>
    %104 = math.exp %103 : vector<4x32xf32>
    %cst_32 = arith.constant 1.000000e+00 : f32
    %105 = vector.broadcast %cst_32 : f32 to vector<4x32xf32>
    %106 = arith.addf %105, %104 : vector<4x32xf32>
    %107 = tpu.reciprocal %106 : vector<4x32xf32> -> vector<4x32xf32>
    %108 = arith.mulf %98, %44 : vector<4x32xf32>
    %109 = arith.mulf %91, %100 : vector<4x32xf32>
    %110 = arith.addf %108, %109 : vector<4x32xf32>
    %111 = math.tanh %110 : vector<4x32xf32>
    %112 = arith.mulf %107, %111 : vector<4x32xf32>
    %113 = vector.extract_strided_slice %84 {offsets = [0, 0], sizes = [4, 32], strides = [1, 1]} : vector<4x128xf32> to vector<4x32xf32>
    %cst_33 = arith.constant 0.000000e+00 : f32
    %114 = vector.broadcast %cst_33 : f32 to vector<4x32xf32>
    %115 = arith.subf %114, %113 : vector<4x32xf32>
    %116 = math.exp %115 : vector<4x32xf32>
    %cst_34 = arith.constant 1.000000e+00 : f32
    %117 = vector.broadcast %cst_34 : f32 to vector<4x32xf32>
    %118 = arith.addf %117, %116 : vector<4x32xf32>
    %119 = tpu.reciprocal %118 : vector<4x32xf32> -> vector<4x32xf32>
    %120 = vector.extract_strided_slice %84 {offsets = [0, 32], sizes = [4, 32], strides = [1, 1]} : vector<4x128xf32> to vector<4x32xf32>
    %cst_35 = arith.constant 0.000000e+00 : f32
    %121 = vector.broadcast %cst_35 : f32 to vector<4x32xf32>
    %122 = arith.subf %121, %120 : vector<4x32xf32>
    %123 = math.exp %122 : vector<4x32xf32>
    %cst_36 = arith.constant 1.000000e+00 : f32
    %124 = vector.broadcast %cst_36 : f32 to vector<4x32xf32>
    %125 = arith.addf %124, %123 : vector<4x32xf32>
    %126 = tpu.reciprocal %125 : vector<4x32xf32> -> vector<4x32xf32>
    %127 = vector.extract_strided_slice %84 {offsets = [0, 64], sizes = [4, 32], strides = [1, 1]} : vector<4x128xf32> to vector<4x32xf32>
    %128 = math.tanh %127 : vector<4x32xf32>
    %129 = vector.extract_strided_slice %84 {offsets = [0, 96], sizes = [4, 32], strides = [1, 1]} : vector<4x128xf32> to vector<4x32xf32>
    %cst_37 = arith.constant 0.000000e+00 : f32
    %130 = vector.broadcast %cst_37 : f32 to vector<4x32xf32>
    %131 = arith.subf %130, %129 : vector<4x32xf32>
    %132 = math.exp %131 : vector<4x32xf32>
    %cst_38 = arith.constant 1.000000e+00 : f32
    %133 = vector.broadcast %cst_38 : f32 to vector<4x32xf32>
    %134 = arith.addf %133, %132 : vector<4x32xf32>
    %135 = tpu.reciprocal %134 : vector<4x32xf32> -> vector<4x32xf32>
    %136 = arith.mulf %126, %72 : vector<4x32xf32>
    %137 = arith.mulf %119, %128 : vector<4x32xf32>
    %138 = arith.addf %136, %137 : vector<4x32xf32>
    %139 = math.tanh %138 : vector<4x32xf32>
    %140 = arith.mulf %135, %139 : vector<4x32xf32>
    %c4 = arith.constant 4 : index
    %c0_39 = arith.constant 0 : index
    %141 = vector.load %arg13[%c4, %c0_39] : memref<32x64xf32, #tpu.memory_space<vmem>>, vector<4x32xf32>
    tpu.vector_store %arg13[%c4, %c0_39], %112 {strides = array<i32>} : memref<32x64xf32, #tpu.memory_space<vmem>>, vector<4x32xf32>,
    %c24 = arith.constant 24 : index
    %c32_40 = arith.constant 32 : index
    %142 = vector.load %arg13[%c24, %c32_40] : memref<32x64xf32, #tpu.memory_space<vmem>>, vector<4x32xf32>
    tpu.vector_store %arg13[%c24, %c32_40], %140 {strides = array<i32>} : memref<32x64xf32, #tpu.memory_space<vmem>>, vector<4x32xf32>,
    %143 = tpu.concatenate %112, %140 in 1 : vector<4x32xf32>, vector<4x32xf32> -> vector<4x64xf32>
    %cst_41 = arith.constant dense<0.000000e+00> : vector<4x256xf32>
    %144 = tpu.matmul %143, %6, %cst_41 {dimension_numbers = #tpu.dot_dimension_numbers<[1], [0], [0], [1], [0, 0, 1, 1], [], []>} : vector<4x64xf32>, vector<64x256xf32>, vector<4x256xf32> -> vector<4x256xf32>
    %145 = vector.extract_strided_slice %5 {offsets = [8, 0], sizes = [4, 128], strides = [1, 1]} : vector<32x256xf32> to vector<4x128xf32>
    %146 = vector.extract_strided_slice %144 {offsets = [0, 0], sizes = [4, 128], strides = [1, 1]} : vector<4x256xf32> to vector<4x128xf32>
    %147 = arith.addf %145, %146 : vector<4x128xf32>
    %148 = vector.extract_strided_slice %5 {offsets = [20, 128], sizes = [4, 128], strides = [1, 1]} : vector<32x256xf32> to vector<4x128xf32>
    %149 = vector.extract_strided_slice %144 {offsets = [0, 128], sizes = [4, 128], strides = [1, 1]} : vector<4x256xf32> to vector<4x128xf32>
    %150 = arith.addf %148, %149 : vector<4x128xf32>
    %151 = vector.extract_strided_slice %147 {offsets = [0, 0], sizes = [4, 32], strides = [1, 1]} : vector<4x128xf32> to vector<4x32xf32>
    %cst_42 = arith.constant 0.000000e+00 : f32
    %152 = vector.broadcast %cst_42 : f32 to vector<4x32xf32>
    %153 = arith.subf %152, %151 : vector<4x32xf32>
    %154 = math.exp %153 : vector<4x32xf32>
    %cst_43 = arith.constant 1.000000e+00 : f32
    %155 = vector.broadcast %cst_43 : f32 to vector<4x32xf32>
    %156 = arith.addf %155, %154 : vector<4x32xf32>
    %157 = tpu.reciprocal %156 : vector<4x32xf32> -> vector<4x32xf32>
    %158 = vector.extract_strided_slice %147 {offsets = [0, 32], sizes = [4, 32], strides = [1, 1]} : vector<4x128xf32> to vector<4x32xf32>
    %cst_44 = arith.constant 0.000000e+00 : f32
    %159 = vector.broadcast %cst_44 : f32 to vector<4x32xf32>
    %160 = arith.subf %159, %158 : vector<4x32xf32>
    %161 = math.exp %160 : vector<4x32xf32>
    %cst_45 = arith.constant 1.000000e+00 : f32
    %162 = vector.broadcast %cst_45 : f32 to vector<4x32xf32>
    %163 = arith.addf %162, %161 : vector<4x32xf32>
    %164 = tpu.reciprocal %163 : vector<4x32xf32> -> vector<4x32xf32>
    %165 = vector.extract_strided_slice %147 {offsets = [0, 64], sizes = [4, 32], strides = [1, 1]} : vector<4x128xf32> to vector<4x32xf32>
    %166 = math.tanh %165 : vector<4x32xf32>
    %167 = vector.extract_strided_slice %147 {offsets = [0, 96], sizes = [4, 32], strides = [1, 1]} : vector<4x128xf32> to vector<4x32xf32>
    %cst_46 = arith.constant 0.000000e+00 : f32
    %168 = vector.broadcast %cst_46 : f32 to vector<4x32xf32>
    %169 = arith.subf %168, %167 : vector<4x32xf32>
    %170 = math.exp %169 : vector<4x32xf32>
    %cst_47 = arith.constant 1.000000e+00 : f32
    %171 = vector.broadcast %cst_47 : f32 to vector<4x32xf32>
    %172 = arith.addf %171, %170 : vector<4x32xf32>
    %173 = tpu.reciprocal %172 : vector<4x32xf32> -> vector<4x32xf32>
    %174 = arith.mulf %164, %110 : vector<4x32xf32>
    %175 = arith.mulf %157, %166 : vector<4x32xf32>
    %176 = arith.addf %174, %175 : vector<4x32xf32>
    %177 = math.tanh %176 : vector<4x32xf32>
    %178 = arith.mulf %173, %177 : vector<4x32xf32>
    %179 = vector.extract_strided_slice %150 {offsets = [0, 0], sizes = [4, 32], strides = [1, 1]} : vector<4x128xf32> to vector<4x32xf32>
    %cst_48 = arith.constant 0.000000e+00 : f32
    %180 = vector.broadcast %cst_48 : f32 to vector<4x32xf32>
    %181 = arith.subf %180, %179 : vector<4x32xf32>
    %182 = math.exp %181 : vector<4x32xf32>
    %cst_49 = arith.constant 1.000000e+00 : f32
    %183 = vector.broadcast %cst_49 : f32 to vector<4x32xf32>
    %184 = arith.addf %183, %182 : vector<4x32xf32>
    %185 = tpu.reciprocal %184 : vector<4x32xf32> -> vector<4x32xf32>
    %186 = vector.extract_strided_slice %150 {offsets = [0, 32], sizes = [4, 32], strides = [1, 1]} : vector<4x128xf32> to vector<4x32xf32>
    %cst_50 = arith.constant 0.000000e+00 : f32
    %187 = vector.broadcast %cst_50 : f32 to vector<4x32xf32>
    %188 = arith.subf %187, %186 : vector<4x32xf32>
    %189 = math.exp %188 : vector<4x32xf32>
    %cst_51 = arith.constant 1.000000e+00 : f32
    %190 = vector.broadcast %cst_51 : f32 to vector<4x32xf32>
    %191 = arith.addf %190, %189 : vector<4x32xf32>
    %192 = tpu.reciprocal %191 : vector<4x32xf32> -> vector<4x32xf32>
    %193 = vector.extract_strided_slice %150 {offsets = [0, 64], sizes = [4, 32], strides = [1, 1]} : vector<4x128xf32> to vector<4x32xf32>
    %194 = math.tanh %193 : vector<4x32xf32>
    %195 = vector.extract_strided_slice %150 {offsets = [0, 96], sizes = [4, 32], strides = [1, 1]} : vector<4x128xf32> to vector<4x32xf32>
    %cst_52 = arith.constant 0.000000e+00 : f32
    %196 = vector.broadcast %cst_52 : f32 to vector<4x32xf32>
    %197 = arith.subf %196, %195 : vector<4x32xf32>
    %198 = math.exp %197 : vector<4x32xf32>
    %cst_53 = arith.constant 1.000000e+00 : f32
    %199 = vector.broadcast %cst_53 : f32 to vector<4x32xf32>
    %200 = arith.addf %199, %198 : vector<4x32xf32>
    %201 = tpu.reciprocal %200 : vector<4x32xf32> -> vector<4x32xf32>
    %202 = arith.mulf %192, %138 : vector<4x32xf32>
    %203 = arith.mulf %185, %194 : vector<4x32xf32>
    %204 = arith.addf %202, %203 : vector<4x32xf32>
    %205 = math.tanh %204 : vector<4x32xf32>
    %206 = arith.mulf %201, %205 : vector<4x32xf32>
    %c8 = arith.constant 8 : index
    %c0_54 = arith.constant 0 : index
    %207 = vector.load %arg13[%c8, %c0_54] : memref<32x64xf32, #tpu.memory_space<vmem>>, vector<4x32xf32>
    tpu.vector_store %arg13[%c8, %c0_54], %178 {strides = array<i32>} : memref<32x64xf32, #tpu.memory_space<vmem>>, vector<4x32xf32>,
    %c20 = arith.constant 20 : index
    %c32_55 = arith.constant 32 : index
    %208 = vector.load %arg13[%c20, %c32_55] : memref<32x64xf32, #tpu.memory_space<vmem>>, vector<4x32xf32>
    tpu.vector_store %arg13[%c20, %c32_55], %206 {strides = array<i32>} : memref<32x64xf32, #tpu.memory_space<vmem>>, vector<4x32xf32>,
    %209 = tpu.concatenate %178, %206 in 1 : vector<4x32xf32>, vector<4x32xf32> -> vector<4x64xf32>
    %cst_56 = arith.constant dense<0.000000e+00> : vector<4x256xf32>
    %210 = tpu.matmul %209, %6, %cst_56 {dimension_numbers = #tpu.dot_dimension_numbers<[1], [0], [0], [1], [0, 0, 1, 1], [], []>} : vector<4x64xf32>, vector<64x256xf32>, vector<4x256xf32> -> vector<4x256xf32>
    %211 = vector.extract_strided_slice %5 {offsets = [12, 0], sizes = [4, 128], strides = [1, 1]} : vector<32x256xf32> to vector<4x128xf32>
    %212 = vector.extract_strided_slice %210 {offsets = [0, 0], sizes = [4, 128], strides = [1, 1]} : vector<4x256xf32> to vector<4x128xf32>
    %213 = arith.addf %211, %212 : vector<4x128xf32>
    %214 = vector.extract_strided_slice %5 {offsets = [16, 128], sizes = [4, 128], strides = [1, 1]} : vector<32x256xf32> to vector<4x128xf32>
    %215 = vector.extract_strided_slice %210 {offsets = [0, 128], sizes = [4, 128], strides = [1, 1]} : vector<4x256xf32> to vector<4x128xf32>
    %216 = arith.addf %214, %215 : vector<4x128xf32>
    %217 = vector.extract_strided_slice %213 {offsets = [0, 0], sizes = [4, 32], strides = [1, 1]} : vector<4x128xf32> to vector<4x32xf32>
    %cst_57 = arith.constant 0.000000e+00 : f32
    %218 = vector.broadcast %cst_57 : f32 to vector<4x32xf32>
    %219 = arith.subf %218, %217 : vector<4x32xf32>
    %220 = math.exp %219 : vector<4x32xf32>
    %cst_58 = arith.constant 1.000000e+00 : f32
    %221 = vector.broadcast %cst_58 : f32 to vector<4x32xf32>
    %222 = arith.addf %221, %220 : vector<4x32xf32>
    %223 = tpu.reciprocal %222 : vector<4x32xf32> -> vector<4x32xf32>
    %224 = vector.extract_strided_slice %213 {offsets = [0, 32], sizes = [4, 32], strides = [1, 1]} : vector<4x128xf32> to vector<4x32xf32>
    %cst_59 = arith.constant 0.000000e+00 : f32
    %225 = vector.broadcast %cst_59 : f32 to vector<4x32xf32>
    %226 = arith.subf %225, %224 : vector<4x32xf32>
    %227 = math.exp %226 : vector<4x32xf32>
    %cst_60 = arith.constant 1.000000e+00 : f32
    %228 = vector.broadcast %cst_60 : f32 to vector<4x32xf32>
    %229 = arith.addf %228, %227 : vector<4x32xf32>
    %230 = tpu.reciprocal %229 : vector<4x32xf32> -> vector<4x32xf32>
    %231 = vector.extract_strided_slice %213 {offsets = [0, 64], sizes = [4, 32], strides = [1, 1]} : vector<4x128xf32> to vector<4x32xf32>
    %232 = math.tanh %231 : vector<4x32xf32>
    %233 = vector.extract_strided_slice %213 {offsets = [0, 96], sizes = [4, 32], strides = [1, 1]} : vector<4x128xf32> to vector<4x32xf32>
    %cst_61 = arith.constant 0.000000e+00 : f32
    %234 = vector.broadcast %cst_61 : f32 to vector<4x32xf32>
    %235 = arith.subf %234, %233 : vector<4x32xf32>
    %236 = math.exp %235 : vector<4x32xf32>
    %cst_62 = arith.constant 1.000000e+00 : f32
    %237 = vector.broadcast %cst_62 : f32 to vector<4x32xf32>
    %238 = arith.addf %237, %236 : vector<4x32xf32>
    %239 = tpu.reciprocal %238 : vector<4x32xf32> -> vector<4x32xf32>
    %240 = arith.mulf %230, %176 : vector<4x32xf32>
    %241 = arith.mulf %223, %232 : vector<4x32xf32>
    %242 = arith.addf %240, %241 : vector<4x32xf32>
    %243 = math.tanh %242 : vector<4x32xf32>
    %244 = arith.mulf %239, %243 : vector<4x32xf32>
    %245 = vector.extract_strided_slice %216 {offsets = [0, 0], sizes = [4, 32], strides = [1, 1]} : vector<4x128xf32> to vector<4x32xf32>
    %cst_63 = arith.constant 0.000000e+00 : f32
    %246 = vector.broadcast %cst_63 : f32 to vector<4x32xf32>
    %247 = arith.subf %246, %245 : vector<4x32xf32>
    %248 = math.exp %247 : vector<4x32xf32>
    %cst_64 = arith.constant 1.000000e+00 : f32
    %249 = vector.broadcast %cst_64 : f32 to vector<4x32xf32>
    %250 = arith.addf %249, %248 : vector<4x32xf32>
    %251 = tpu.reciprocal %250 : vector<4x32xf32> -> vector<4x32xf32>
    %252 = vector.extract_strided_slice %216 {offsets = [0, 32], sizes = [4, 32], strides = [1, 1]} : vector<4x128xf32> to vector<4x32xf32>
    %cst_65 = arith.constant 0.000000e+00 : f32
    %253 = vector.broadcast %cst_65 : f32 to vector<4x32xf32>
    %254 = arith.subf %253, %252 : vector<4x32xf32>
    %255 = math.exp %254 : vector<4x32xf32>
    %cst_66 = arith.constant 1.000000e+00 : f32
    %256 = vector.broadcast %cst_66 : f32 to vector<4x32xf32>
    %257 = arith.addf %256, %255 : vector<4x32xf32>
    %258 = tpu.reciprocal %257 : vector<4x32xf32> -> vector<4x32xf32>
    %259 = vector.extract_strided_slice %216 {offsets = [0, 64], sizes = [4, 32], strides = [1, 1]} : vector<4x128xf32> to vector<4x32xf32>
    %260 = math.tanh %259 : vector<4x32xf32>
    %261 = vector.extract_strided_slice %216 {offsets = [0, 96], sizes = [4, 32], strides = [1, 1]} : vector<4x128xf32> to vector<4x32xf32>
    %cst_67 = arith.constant 0.000000e+00 : f32
    %262 = vector.broadcast %cst_67 : f32 to vector<4x32xf32>
    %263 = arith.subf %262, %261 : vector<4x32xf32>
    %264 = math.exp %263 : vector<4x32xf32>
    %cst_68 = arith.constant 1.000000e+00 : f32
    %265 = vector.broadcast %cst_68 : f32 to vector<4x32xf32>
    %266 = arith.addf %265, %264 : vector<4x32xf32>
    %267 = tpu.reciprocal %266 : vector<4x32xf32> -> vector<4x32xf32>
    %268 = arith.mulf %258, %204 : vector<4x32xf32>
    %269 = arith.mulf %251, %260 : vector<4x32xf32>
    %270 = arith.addf %268, %269 : vector<4x32xf32>
    %271 = math.tanh %270 : vector<4x32xf32>
    %272 = arith.mulf %267, %271 : vector<4x32xf32>
    %c12 = arith.constant 12 : index
    %c0_69 = arith.constant 0 : index
    %273 = vector.load %arg13[%c12, %c0_69] : memref<32x64xf32, #tpu.memory_space<vmem>>, vector<4x32xf32>
    tpu.vector_store %arg13[%c12, %c0_69], %244 {strides = array<i32>} : memref<32x64xf32, #tpu.memory_space<vmem>>, vector<4x32xf32>,
    %c16 = arith.constant 16 : index
    %c32_70 = arith.constant 32 : index
    %274 = vector.load %arg13[%c16, %c32_70] : memref<32x64xf32, #tpu.memory_space<vmem>>, vector<4x32xf32>
    tpu.vector_store %arg13[%c16, %c32_70], %272 {strides = array<i32>} : memref<32x64xf32, #tpu.memory_space<vmem>>, vector<4x32xf32>,
    %275 = tpu.concatenate %244, %272 in 1 : vector<4x32xf32>, vector<4x32xf32> -> vector<4x64xf32>
    %cst_71 = arith.constant dense<0.000000e+00> : vector<4x256xf32>
    %276 = tpu.matmul %275, %6, %cst_71 {dimension_numbers = #tpu.dot_dimension_numbers<[1], [0], [0], [1], [0, 0, 1, 1], [], []>} : vector<4x64xf32>, vector<64x256xf32>, vector<4x256xf32> -> vector<4x256xf32>
    %277 = vector.extract_strided_slice %5 {offsets = [16, 0], sizes = [4, 128], strides = [1, 1]} : vector<32x256xf32> to vector<4x128xf32>
    %278 = vector.extract_strided_slice %276 {offsets = [0, 0], sizes = [4, 128], strides = [1, 1]} : vector<4x256xf32> to vector<4x128xf32>
    %279 = arith.addf %277, %278 : vector<4x128xf32>
    %280 = vector.extract_strided_slice %5 {offsets = [12, 128], sizes = [4, 128], strides = [1, 1]} : vector<32x256xf32> to vector<4x128xf32>
    %281 = vector.extract_strided_slice %276 {offsets = [0, 128], sizes = [4, 128], strides = [1, 1]} : vector<4x256xf32> to vector<4x128xf32>
    %282 = arith.addf %280, %281 : vector<4x128xf32>
    %283 = vector.extract_strided_slice %279 {offsets = [0, 0], sizes = [4, 32], strides = [1, 1]} : vector<4x128xf32> to vector<4x32xf32>
    %cst_72 = arith.constant 0.000000e+00 : f32
    %284 = vector.broadcast %cst_72 : f32 to vector<4x32xf32>
    %285 = arith.subf %284, %283 : vector<4x32xf32>
    %286 = math.exp %285 : vector<4x32xf32>
    %cst_73 = arith.constant 1.000000e+00 : f32
    %287 = vector.broadcast %cst_73 : f32 to vector<4x32xf32>
    %288 = arith.addf %287, %286 : vector<4x32xf32>
    %289 = tpu.reciprocal %288 : vector<4x32xf32> -> vector<4x32xf32>
    %290 = vector.extract_strided_slice %279 {offsets = [0, 32], sizes = [4, 32], strides = [1, 1]} : vector<4x128xf32> to vector<4x32xf32>
    %cst_74 = arith.constant 0.000000e+00 : f32
    %291 = vector.broadcast %cst_74 : f32 to vector<4x32xf32>
    %292 = arith.subf %291, %290 : vector<4x32xf32>
    %293 = math.exp %292 : vector<4x32xf32>
    %cst_75 = arith.constant 1.000000e+00 : f32
    %294 = vector.broadcast %cst_75 : f32 to vector<4x32xf32>
    %295 = arith.addf %294, %293 : vector<4x32xf32>
    %296 = tpu.reciprocal %295 : vector<4x32xf32> -> vector<4x32xf32>
    %297 = vector.extract_strided_slice %279 {offsets = [0, 64], sizes = [4, 32], strides = [1, 1]} : vector<4x128xf32> to vector<4x32xf32>
    %298 = math.tanh %297 : vector<4x32xf32>
    %299 = vector.extract_strided_slice %279 {offsets = [0, 96], sizes = [4, 32], strides = [1, 1]} : vector<4x128xf32> to vector<4x32xf32>
    %cst_76 = arith.constant 0.000000e+00 : f32
    %300 = vector.broadcast %cst_76 : f32 to vector<4x32xf32>
    %301 = arith.subf %300, %299 : vector<4x32xf32>
    %302 = math.exp %301 : vector<4x32xf32>
    %cst_77 = arith.constant 1.000000e+00 : f32
    %303 = vector.broadcast %cst_77 : f32 to vector<4x32xf32>
    %304 = arith.addf %303, %302 : vector<4x32xf32>
    %305 = tpu.reciprocal %304 : vector<4x32xf32> -> vector<4x32xf32>
    %306 = arith.mulf %296, %242 : vector<4x32xf32>
    %307 = arith.mulf %289, %298 : vector<4x32xf32>
    %308 = arith.addf %306, %307 : vector<4x32xf32>
    %309 = math.tanh %308 : vector<4x32xf32>
    %310 = arith.mulf %305, %309 : vector<4x32xf32>
    %311 = vector.extract_strided_slice %282 {offsets = [0, 0], sizes = [4, 32], strides = [1, 1]} : vector<4x128xf32> to vector<4x32xf32>
    %cst_78 = arith.constant 0.000000e+00 : f32
    %312 = vector.broadcast %cst_78 : f32 to vector<4x32xf32>
    %313 = arith.subf %312, %311 : vector<4x32xf32>
    %314 = math.exp %313 : vector<4x32xf32>
    %cst_79 = arith.constant 1.000000e+00 : f32
    %315 = vector.broadcast %cst_79 : f32 to vector<4x32xf32>
    %316 = arith.addf %315, %314 : vector<4x32xf32>
    %317 = tpu.reciprocal %316 : vector<4x32xf32> -> vector<4x32xf32>
    %318 = vector.extract_strided_slice %282 {offsets = [0, 32], sizes = [4, 32], strides = [1, 1]} : vector<4x128xf32> to vector<4x32xf32>
    %cst_80 = arith.constant 0.000000e+00 : f32
    %319 = vector.broadcast %cst_80 : f32 to vector<4x32xf32>
    %320 = arith.subf %319, %318 : vector<4x32xf32>
    %321 = math.exp %320 : vector<4x32xf32>
    %cst_81 = arith.constant 1.000000e+00 : f32
    %322 = vector.broadcast %cst_81 : f32 to vector<4x32xf32>
    %323 = arith.addf %322, %321 : vector<4x32xf32>
    %324 = tpu.reciprocal %323 : vector<4x32xf32> -> vector<4x32xf32>
    %325 = vector.extract_strided_slice %282 {offsets = [0, 64], sizes = [4, 32], strides = [1, 1]} : vector<4x128xf32> to vector<4x32xf32>
    %326 = math.tanh %325 : vector<4x32xf32>
    %327 = vector.extract_strided_slice %282 {offsets = [0, 96], sizes = [4, 32], strides = [1, 1]} : vector<4x128xf32> to vector<4x32xf32>
    %cst_82 = arith.constant 0.000000e+00 : f32
    %328 = vector.broadcast %cst_82 : f32 to vector<4x32xf32>
    %329 = arith.subf %328, %327 : vector<4x32xf32>
    %330 = math.exp %329 : vector<4x32xf32>
    %cst_83 = arith.constant 1.000000e+00 : f32
    %331 = vector.broadcast %cst_83 : f32 to vector<4x32xf32>
    %332 = arith.addf %331, %330 : vector<4x32xf32>
    %333 = tpu.reciprocal %332 : vector<4x32xf32> -> vector<4x32xf32>
    %334 = arith.mulf %324, %270 : vector<4x32xf32>
    %335 = arith.mulf %317, %326 : vector<4x32xf32>
    %336 = arith.addf %334, %335 : vector<4x32xf32>
    %337 = math.tanh %336 : vector<4x32xf32>
    %338 = arith.mulf %333, %337 : vector<4x32xf32>
    %c16_84 = arith.constant 16 : index
    %c0_85 = arith.constant 0 : index
    %339 = vector.load %arg13[%c16_84, %c0_85] : memref<32x64xf32, #tpu.memory_space<vmem>>, vector<4x32xf32>
    tpu.vector_store %arg13[%c16_84, %c0_85], %310 {strides = array<i32>} : memref<32x64xf32, #tpu.memory_space<vmem>>, vector<4x32xf32>,
    %c12_86 = arith.constant 12 : index
    %c32_87 = arith.constant 32 : index
    %340 = vector.load %arg13[%c12_86, %c32_87] : memref<32x64xf32, #tpu.memory_space<vmem>>, vector<4x32xf32>
    tpu.vector_store %arg13[%c12_86, %c32_87], %338 {strides = array<i32>} : memref<32x64xf32, #tpu.memory_space<vmem>>, vector<4x32xf32>,
    %341 = tpu.concatenate %310, %338 in 1 : vector<4x32xf32>, vector<4x32xf32> -> vector<4x64xf32>
    %cst_88 = arith.constant dense<0.000000e+00> : vector<4x256xf32>
    %342 = tpu.matmul %341, %6, %cst_88 {dimension_numbers = #tpu.dot_dimension_numbers<[1], [0], [0], [1], [0, 0, 1, 1], [], []>} : vector<4x64xf32>, vector<64x256xf32>, vector<4x256xf32> -> vector<4x256xf32>
    %343 = vector.extract_strided_slice %5 {offsets = [20, 0], sizes = [4, 128], strides = [1, 1]} : vector<32x256xf32> to vector<4x128xf32>
    %344 = vector.extract_strided_slice %342 {offsets = [0, 0], sizes = [4, 128], strides = [1, 1]} : vector<4x256xf32> to vector<4x128xf32>
    %345 = arith.addf %343, %344 : vector<4x128xf32>
    %346 = vector.extract_strided_slice %5 {offsets = [8, 128], sizes = [4, 128], strides = [1, 1]} : vector<32x256xf32> to vector<4x128xf32>
    %347 = vector.extract_strided_slice %342 {offsets = [0, 128], sizes = [4, 128], strides = [1, 1]} : vector<4x256xf32> to vector<4x128xf32>
    %348 = arith.addf %346, %347 : vector<4x128xf32>
    %349 = vector.extract_strided_slice %345 {offsets = [0, 0], sizes = [4, 32], strides = [1, 1]} : vector<4x128xf32> to vector<4x32xf32>
    %cst_89 = arith.constant 0.000000e+00 : f32
    %350 = vector.broadcast %cst_89 : f32 to vector<4x32xf32>
    %351 = arith.subf %350, %349 : vector<4x32xf32>
    %352 = math.exp %351 : vector<4x32xf32>
    %cst_90 = arith.constant 1.000000e+00 : f32
    %353 = vector.broadcast %cst_90 : f32 to vector<4x32xf32>
    %354 = arith.addf %353, %352 : vector<4x32xf32>
    %355 = tpu.reciprocal %354 : vector<4x32xf32> -> vector<4x32xf32>
    %356 = vector.extract_strided_slice %345 {offsets = [0, 32], sizes = [4, 32], strides = [1, 1]} : vector<4x128xf32> to vector<4x32xf32>
    %cst_91 = arith.constant 0.000000e+00 : f32
    %357 = vector.broadcast %cst_91 : f32 to vector<4x32xf32>
    %358 = arith.subf %357, %356 : vector<4x32xf32>
    %359 = math.exp %358 : vector<4x32xf32>
    %cst_92 = arith.constant 1.000000e+00 : f32
    %360 = vector.broadcast %cst_92 : f32 to vector<4x32xf32>
    %361 = arith.addf %360, %359 : vector<4x32xf32>
    %362 = tpu.reciprocal %361 : vector<4x32xf32> -> vector<4x32xf32>
    %363 = vector.extract_strided_slice %345 {offsets = [0, 64], sizes = [4, 32], strides = [1, 1]} : vector<4x128xf32> to vector<4x32xf32>
    %364 = math.tanh %363 : vector<4x32xf32>
    %365 = vector.extract_strided_slice %345 {offsets = [0, 96], sizes = [4, 32], strides = [1, 1]} : vector<4x128xf32> to vector<4x32xf32>
    %cst_93 = arith.constant 0.000000e+00 : f32
    %366 = vector.broadcast %cst_93 : f32 to vector<4x32xf32>
    %367 = arith.subf %366, %365 : vector<4x32xf32>
    %368 = math.exp %367 : vector<4x32xf32>
    %cst_94 = arith.constant 1.000000e+00 : f32
    %369 = vector.broadcast %cst_94 : f32 to vector<4x32xf32>
    %370 = arith.addf %369, %368 : vector<4x32xf32>
    %371 = tpu.reciprocal %370 : vector<4x32xf32> -> vector<4x32xf32>
    %372 = arith.mulf %362, %308 : vector<4x32xf32>
    %373 = arith.mulf %355, %364 : vector<4x32xf32>
    %374 = arith.addf %372, %373 : vector<4x32xf32>
    %375 = math.tanh %374 : vector<4x32xf32>
    %376 = arith.mulf %371, %375 : vector<4x32xf32>
    %377 = vector.extract_strided_slice %348 {offsets = [0, 0], sizes = [4, 32], strides = [1, 1]} : vector<4x128xf32> to vector<4x32xf32>
    %cst_95 = arith.constant 0.000000e+00 : f32
    %378 = vector.broadcast %cst_95 : f32 to vector<4x32xf32>
    %379 = arith.subf %378, %377 : vector<4x32xf32>
    %380 = math.exp %379 : vector<4x32xf32>
    %cst_96 = arith.constant 1.000000e+00 : f32
    %381 = vector.broadcast %cst_96 : f32 to vector<4x32xf32>
    %382 = arith.addf %381, %380 : vector<4x32xf32>
    %383 = tpu.reciprocal %382 : vector<4x32xf32> -> vector<4x32xf32>
    %384 = vector.extract_strided_slice %348 {offsets = [0, 32], sizes = [4, 32], strides = [1, 1]} : vector<4x128xf32> to vector<4x32xf32>
    %cst_97 = arith.constant 0.000000e+00 : f32
    %385 = vector.broadcast %cst_97 : f32 to vector<4x32xf32>
    %386 = arith.subf %385, %384 : vector<4x32xf32>
    %387 = math.exp %386 : vector<4x32xf32>
    %cst_98 = arith.constant 1.000000e+00 : f32
    %388 = vector.broadcast %cst_98 : f32 to vector<4x32xf32>
    %389 = arith.addf %388, %387 : vector<4x32xf32>
    %390 = tpu.reciprocal %389 : vector<4x32xf32> -> vector<4x32xf32>
    %391 = vector.extract_strided_slice %348 {offsets = [0, 64], sizes = [4, 32], strides = [1, 1]} : vector<4x128xf32> to vector<4x32xf32>
    %392 = math.tanh %391 : vector<4x32xf32>
    %393 = vector.extract_strided_slice %348 {offsets = [0, 96], sizes = [4, 32], strides = [1, 1]} : vector<4x128xf32> to vector<4x32xf32>
    %cst_99 = arith.constant 0.000000e+00 : f32
    %394 = vector.broadcast %cst_99 : f32 to vector<4x32xf32>
    %395 = arith.subf %394, %393 : vector<4x32xf32>
    %396 = math.exp %395 : vector<4x32xf32>
    %cst_100 = arith.constant 1.000000e+00 : f32
    %397 = vector.broadcast %cst_100 : f32 to vector<4x32xf32>
    %398 = arith.addf %397, %396 : vector<4x32xf32>
    %399 = tpu.reciprocal %398 : vector<4x32xf32> -> vector<4x32xf32>
    %400 = arith.mulf %390, %336 : vector<4x32xf32>
    %401 = arith.mulf %383, %392 : vector<4x32xf32>
    %402 = arith.addf %400, %401 : vector<4x32xf32>
    %403 = math.tanh %402 : vector<4x32xf32>
    %404 = arith.mulf %399, %403 : vector<4x32xf32>
    %c20_101 = arith.constant 20 : index
    %c0_102 = arith.constant 0 : index
    %405 = vector.load %arg13[%c20_101, %c0_102] : memref<32x64xf32, #tpu.memory_space<vmem>>, vector<4x32xf32>
    tpu.vector_store %arg13[%c20_101, %c0_102], %376 {strides = array<i32>} : memref<32x64xf32, #tpu.memory_space<vmem>>, vector<4x32xf32>,
    %c8_103 = arith.constant 8 : index
    %c32_104 = arith.constant 32 : index
    %406 = vector.load %arg13[%c8_103, %c32_104] : memref<32x64xf32, #tpu.memory_space<vmem>>, vector<4x32xf32>
    tpu.vector_store %arg13[%c8_103, %c32_104], %404 {strides = array<i32>} : memref<32x64xf32, #tpu.memory_space<vmem>>, vector<4x32xf32>,
    %407 = tpu.concatenate %376, %404 in 1 : vector<4x32xf32>, vector<4x32xf32> -> vector<4x64xf32>
    %cst_105 = arith.constant dense<0.000000e+00> : vector<4x256xf32>
    %408 = tpu.matmul %407, %6, %cst_105 {dimension_numbers = #tpu.dot_dimension_numbers<[1], [0], [0], [1], [0, 0, 1, 1], [], []>} : vector<4x64xf32>, vector<64x256xf32>, vector<4x256xf32> -> vector<4x256xf32>
    %409 = vector.extract_strided_slice %5 {offsets = [24, 0], sizes = [4, 128], strides = [1, 1]} : vector<32x256xf32> to vector<4x128xf32>
    %410 = vector.extract_strided_slice %408 {offsets = [0, 0], sizes = [4, 128], strides = [1, 1]} : vector<4x256xf32> to vector<4x128xf32>
    %411 = arith.addf %409, %410 : vector<4x128xf32>
    %412 = vector.extract_strided_slice %5 {offsets = [4, 128], sizes = [4, 128], strides = [1, 1]} : vector<32x256xf32> to vector<4x128xf32>
    %413 = vector.extract_strided_slice %408 {offsets = [0, 128], sizes = [4, 128], strides = [1, 1]} : vector<4x256xf32> to vector<4x128xf32>
    %414 = arith.addf %412, %413 : vector<4x128xf32>
    %415 = vector.extract_strided_slice %411 {offsets = [0, 0], sizes = [4, 32], strides = [1, 1]} : vector<4x128xf32> to vector<4x32xf32>
    %cst_106 = arith.constant 0.000000e+00 : f32
    %416 = vector.broadcast %cst_106 : f32 to vector<4x32xf32>
    %417 = arith.subf %416, %415 : vector<4x32xf32>
    %418 = math.exp %417 : vector<4x32xf32>
    %cst_107 = arith.constant 1.000000e+00 : f32
    %419 = vector.broadcast %cst_107 : f32 to vector<4x32xf32>
    %420 = arith.addf %419, %418 : vector<4x32xf32>
    %421 = tpu.reciprocal %420 : vector<4x32xf32> -> vector<4x32xf32>
    %422 = vector.extract_strided_slice %411 {offsets = [0, 32], sizes = [4, 32], strides = [1, 1]} : vector<4x128xf32> to vector<4x32xf32>
    %cst_108 = arith.constant 0.000000e+00 : f32
    %423 = vector.broadcast %cst_108 : f32 to vector<4x32xf32>
    %424 = arith.subf %423, %422 : vector<4x32xf32>
    %425 = math.exp %424 : vector<4x32xf32>
    %cst_109 = arith.constant 1.000000e+00 : f32
    %426 = vector.broadcast %cst_109 : f32 to vector<4x32xf32>
    %427 = arith.addf %426, %425 : vector<4x32xf32>
    %428 = tpu.reciprocal %427 : vector<4x32xf32> -> vector<4x32xf32>
    %429 = vector.extract_strided_slice %411 {offsets = [0, 64], sizes = [4, 32], strides = [1, 1]} : vector<4x128xf32> to vector<4x32xf32>
    %430 = math.tanh %429 : vector<4x32xf32>
    %431 = vector.extract_strided_slice %411 {offsets = [0, 96], sizes = [4, 32], strides = [1, 1]} : vector<4x128xf32> to vector<4x32xf32>
    %cst_110 = arith.constant 0.000000e+00 : f32
    %432 = vector.broadcast %cst_110 : f32 to vector<4x32xf32>
    %433 = arith.subf %432, %431 : vector<4x32xf32>
    %434 = math.exp %433 : vector<4x32xf32>
    %cst_111 = arith.constant 1.000000e+00 : f32
    %435 = vector.broadcast %cst_111 : f32 to vector<4x32xf32>
    %436 = arith.addf %435, %434 : vector<4x32xf32>
    %437 = tpu.reciprocal %436 : vector<4x32xf32> -> vector<4x32xf32>
    %438 = arith.mulf %428, %374 : vector<4x32xf32>
    %439 = arith.mulf %421, %430 : vector<4x32xf32>
    %440 = arith.addf %438, %439 : vector<4x32xf32>
    %441 = math.tanh %440 : vector<4x32xf32>
    %442 = arith.mulf %437, %441 : vector<4x32xf32>
    %443 = vector.extract_strided_slice %414 {offsets = [0, 0], sizes = [4, 32], strides = [1, 1]} : vector<4x128xf32> to vector<4x32xf32>
    %cst_112 = arith.constant 0.000000e+00 : f32
    %444 = vector.broadcast %cst_112 : f32 to vector<4x32xf32>
    %445 = arith.subf %444, %443 : vector<4x32xf32>
    %446 = math.exp %445 : vector<4x32xf32>
    %cst_113 = arith.constant 1.000000e+00 : f32
    %447 = vector.broadcast %cst_113 : f32 to vector<4x32xf32>
    %448 = arith.addf %447, %446 : vector<4x32xf32>
    %449 = tpu.reciprocal %448 : vector<4x32xf32> -> vector<4x32xf32>
    %450 = vector.extract_strided_slice %414 {offsets = [0, 32], sizes = [4, 32], strides = [1, 1]} : vector<4x128xf32> to vector<4x32xf32>
    %cst_114 = arith.constant 0.000000e+00 : f32
    %451 = vector.broadcast %cst_114 : f32 to vector<4x32xf32>
    %452 = arith.subf %451, %450 : vector<4x32xf32>
    %453 = math.exp %452 : vector<4x32xf32>
    %cst_115 = arith.constant 1.000000e+00 : f32
    %454 = vector.broadcast %cst_115 : f32 to vector<4x32xf32>
    %455 = arith.addf %454, %453 : vector<4x32xf32>
    %456 = tpu.reciprocal %455 : vector<4x32xf32> -> vector<4x32xf32>
    %457 = vector.extract_strided_slice %414 {offsets = [0, 64], sizes = [4, 32], strides = [1, 1]} : vector<4x128xf32> to vector<4x32xf32>
    %458 = math.tanh %457 : vector<4x32xf32>
    %459 = vector.extract_strided_slice %414 {offsets = [0, 96], sizes = [4, 32], strides = [1, 1]} : vector<4x128xf32> to vector<4x32xf32>
    %cst_116 = arith.constant 0.000000e+00 : f32
    %460 = vector.broadcast %cst_116 : f32 to vector<4x32xf32>
    %461 = arith.subf %460, %459 : vector<4x32xf32>
    %462 = math.exp %461 : vector<4x32xf32>
    %cst_117 = arith.constant 1.000000e+00 : f32
    %463 = vector.broadcast %cst_117 : f32 to vector<4x32xf32>
    %464 = arith.addf %463, %462 : vector<4x32xf32>
    %465 = tpu.reciprocal %464 : vector<4x32xf32> -> vector<4x32xf32>
    %466 = arith.mulf %456, %402 : vector<4x32xf32>
    %467 = arith.mulf %449, %458 : vector<4x32xf32>
    %468 = arith.addf %466, %467 : vector<4x32xf32>
    %469 = math.tanh %468 : vector<4x32xf32>
    %470 = arith.mulf %465, %469 : vector<4x32xf32>
    %c24_118 = arith.constant 24 : index
    %c0_119 = arith.constant 0 : index
    %471 = vector.load %arg13[%c24_118, %c0_119] : memref<32x64xf32, #tpu.memory_space<vmem>>, vector<4x32xf32>
    tpu.vector_store %arg13[%c24_118, %c0_119], %442 {strides = array<i32>} : memref<32x64xf32, #tpu.memory_space<vmem>>, vector<4x32xf32>,
    %c4_120 = arith.constant 4 : index
    %c32_121 = arith.constant 32 : index
    %472 = vector.load %arg13[%c4_120, %c32_121] : memref<32x64xf32, #tpu.memory_space<vmem>>, vector<4x32xf32>
    tpu.vector_store %arg13[%c4_120, %c32_121], %470 {strides = array<i32>} : memref<32x64xf32, #tpu.memory_space<vmem>>, vector<4x32xf32>,
    %473 = tpu.concatenate %442, %470 in 1 : vector<4x32xf32>, vector<4x32xf32> -> vector<4x64xf32>
    %cst_122 = arith.constant dense<0.000000e+00> : vector<4x256xf32>
    %474 = tpu.matmul %473, %6, %cst_122 {dimension_numbers = #tpu.dot_dimension_numbers<[1], [0], [0], [1], [0, 0, 1, 1], [], []>} : vector<4x64xf32>, vector<64x256xf32>, vector<4x256xf32> -> vector<4x256xf32>
    %475 = vector.extract_strided_slice %5 {offsets = [28, 0], sizes = [4, 128], strides = [1, 1]} : vector<32x256xf32> to vector<4x128xf32>
    %476 = vector.extract_strided_slice %474 {offsets = [0, 0], sizes = [4, 128], strides = [1, 1]} : vector<4x256xf32> to vector<4x128xf32>
    %477 = arith.addf %475, %476 : vector<4x128xf32>
    %478 = vector.extract_strided_slice %5 {offsets = [0, 128], sizes = [4, 128], strides = [1, 1]} : vector<32x256xf32> to vector<4x128xf32>
    %479 = vector.extract_strided_slice %474 {offsets = [0, 128], sizes = [4, 128], strides = [1, 1]} : vector<4x256xf32> to vector<4x128xf32>
    %480 = arith.addf %478, %479 : vector<4x128xf32>
    %481 = vector.extract_strided_slice %477 {offsets = [0, 0], sizes = [4, 32], strides = [1, 1]} : vector<4x128xf32> to vector<4x32xf32>
    %cst_123 = arith.constant 0.000000e+00 : f32
    %482 = vector.broadcast %cst_123 : f32 to vector<4x32xf32>
    %483 = arith.subf %482, %481 : vector<4x32xf32>
    %484 = math.exp %483 : vector<4x32xf32>
    %cst_124 = arith.constant 1.000000e+00 : f32
    %485 = vector.broadcast %cst_124 : f32 to vector<4x32xf32>
    %486 = arith.addf %485, %484 : vector<4x32xf32>
    %487 = tpu.reciprocal %486 : vector<4x32xf32> -> vector<4x32xf32>
    %488 = vector.extract_strided_slice %477 {offsets = [0, 32], sizes = [4, 32], strides = [1, 1]} : vector<4x128xf32> to vector<4x32xf32>
    %cst_125 = arith.constant 0.000000e+00 : f32
    %489 = vector.broadcast %cst_125 : f32 to vector<4x32xf32>
    %490 = arith.subf %489, %488 : vector<4x32xf32>
    %491 = math.exp %490 : vector<4x32xf32>
    %cst_126 = arith.constant 1.000000e+00 : f32
    %492 = vector.broadcast %cst_126 : f32 to vector<4x32xf32>
    %493 = arith.addf %492, %491 : vector<4x32xf32>
    %494 = tpu.reciprocal %493 : vector<4x32xf32> -> vector<4x32xf32>
    %495 = vector.extract_strided_slice %477 {offsets = [0, 64], sizes = [4, 32], strides = [1, 1]} : vector<4x128xf32> to vector<4x32xf32>
    %496 = math.tanh %495 : vector<4x32xf32>
    %497 = vector.extract_strided_slice %477 {offsets = [0, 96], sizes = [4, 32], strides = [1, 1]} : vector<4x128xf32> to vector<4x32xf32>
    %cst_127 = arith.constant 0.000000e+00 : f32
    %498 = vector.broadcast %cst_127 : f32 to vector<4x32xf32>
    %499 = arith.subf %498, %497 : vector<4x32xf32>
    %500 = math.exp %499 : vector<4x32xf32>
    %cst_128 = arith.constant 1.000000e+00 : f32
    %501 = vector.broadcast %cst_128 : f32 to vector<4x32xf32>
    %502 = arith.addf %501, %500 : vector<4x32xf32>
    %503 = tpu.reciprocal %502 : vector<4x32xf32> -> vector<4x32xf32>
    %504 = arith.mulf %494, %440 : vector<4x32xf32>
    %505 = arith.mulf %487, %496 : vector<4x32xf32>
    %506 = arith.addf %504, %505 : vector<4x32xf32>
    %507 = math.tanh %506 : vector<4x32xf32>
    %508 = arith.mulf %503, %507 : vector<4x32xf32>
    %509 = vector.extract_strided_slice %480 {offsets = [0, 0], sizes = [4, 32], strides = [1, 1]} : vector<4x128xf32> to vector<4x32xf32>
    %cst_129 = arith.constant 0.000000e+00 : f32
    %510 = vector.broadcast %cst_129 : f32 to vector<4x32xf32>
    %511 = arith.subf %510, %509 : vector<4x32xf32>
    %512 = math.exp %511 : vector<4x32xf32>
    %cst_130 = arith.constant 1.000000e+00 : f32
    %513 = vector.broadcast %cst_130 : f32 to vector<4x32xf32>
    %514 = arith.addf %513, %512 : vector<4x32xf32>
    %515 = tpu.reciprocal %514 : vector<4x32xf32> -> vector<4x32xf32>
    %516 = vector.extract_strided_slice %480 {offsets = [0, 32], sizes = [4, 32], strides = [1, 1]} : vector<4x128xf32> to vector<4x32xf32>
    %cst_131 = arith.constant 0.000000e+00 : f32
    %517 = vector.broadcast %cst_131 : f32 to vector<4x32xf32>
    %518 = arith.subf %517, %516 : vector<4x32xf32>
    %519 = math.exp %518 : vector<4x32xf32>
    %cst_132 = arith.constant 1.000000e+00 : f32
    %520 = vector.broadcast %cst_132 : f32 to vector<4x32xf32>
    %521 = arith.addf %520, %519 : vector<4x32xf32>
    %522 = tpu.reciprocal %521 : vector<4x32xf32> -> vector<4x32xf32>
    %523 = vector.extract_strided_slice %480 {offsets = [0, 64], sizes = [4, 32], strides = [1, 1]} : vector<4x128xf32> to vector<4x32xf32>
    %524 = math.tanh %523 : vector<4x32xf32>
    %525 = vector.extract_strided_slice %480 {offsets = [0, 96], sizes = [4, 32], strides = [1, 1]} : vector<4x128xf32> to vector<4x32xf32>
    %cst_133 = arith.constant 0.000000e+00 : f32
    %526 = vector.broadcast %cst_133 : f32 to vector<4x32xf32>
    %527 = arith.subf %526, %525 : vector<4x32xf32>
    %528 = math.exp %527 : vector<4x32xf32>
    %cst_134 = arith.constant 1.000000e+00 : f32
    %529 = vector.broadcast %cst_134 : f32 to vector<4x32xf32>
    %530 = arith.addf %529, %528 : vector<4x32xf32>
    %531 = tpu.reciprocal %530 : vector<4x32xf32> -> vector<4x32xf32>
    %532 = arith.mulf %522, %468 : vector<4x32xf32>
    %533 = arith.mulf %515, %524 : vector<4x32xf32>
    %534 = arith.addf %532, %533 : vector<4x32xf32>
    %535 = math.tanh %534 : vector<4x32xf32>
    %536 = arith.mulf %531, %535 : vector<4x32xf32>
    %c28_135 = arith.constant 28 : index
    %c0_136 = arith.constant 0 : index
    %537 = vector.load %arg13[%c28_135, %c0_136] : memref<32x64xf32, #tpu.memory_space<vmem>>, vector<4x32xf32>
    tpu.vector_store %arg13[%c28_135, %c0_136], %508 {strides = array<i32>} : memref<32x64xf32, #tpu.memory_space<vmem>>, vector<4x32xf32>,
    %c0_137 = arith.constant 0 : index
    %c32_138 = arith.constant 32 : index
    %538 = vector.load %arg13[%c0_137, %c32_138] : memref<32x64xf32, #tpu.memory_space<vmem>>, vector<4x32xf32>
    tpu.vector_store %arg13[%c0_137, %c32_138], %536 {strides = array<i32>} : memref<32x64xf32, #tpu.memory_space<vmem>>, vector<4x32xf32>,
    %c0_139 = arith.constant 0 : index
    %c0_140 = arith.constant 0 : index
    %539 = vector.load %arg13[%c0_139, %c0_140] : memref<32x64xf32, #tpu.memory_space<vmem>>, vector<32x64xf32>
    %c0_141 = arith.constant 0 : index
    %c0_142 = arith.constant 0 : index
    %540 = vector.load %arg5[%c0_141, %c0_142] : memref<64x256xf32, #tpu.memory_space<vmem>>, vector<64x256xf32>
    %cst_143 = arith.constant dense<0.000000e+00> : vector<32x256xf32>
    %541 = tpu.matmul %539, %540, %cst_143 {dimension_numbers = #tpu.dot_dimension_numbers<[1], [0], [0], [1], [0, 0, 1, 1], [], []>} : vector<32x64xf32>, vector<64x256xf32>, vector<32x256xf32> -> vector<32x256xf32>
    %c0_144 = arith.constant 0 : index
    %c0_145 = arith.constant 0 : index
    %542 = vector.load %arg7[%c0_144, %c0_145] : memref<1x256xf32, #tpu.memory_space<vmem>>, vector<1x256xf32>
    %543 = vector.broadcast %542 : vector<1x256xf32> to vector<32x256xf32>
    %544 = arith.addf %541, %543 : vector<32x256xf32>
    %c0_146 = arith.constant 0 : index
    %c0_147 = arith.constant 0 : index
    %545 = vector.load %arg6[%c0_146, %c0_147] : memref<64x256xf32, #tpu.memory_space<vmem>>, vector<64x256xf32>
    %cst_148 = arith.constant 0.000000e+00 : f32
    %546 = vector.broadcast %cst_148 : f32 to vector<4x32xf32>
    %cst_149 = arith.constant 0.000000e+00 : f32
    %547 = vector.broadcast %cst_149 : f32 to vector<4x32xf32>
    %cst_150 = arith.constant 0.000000e+00 : f32
    %548 = vector.broadcast %cst_150 : f32 to vector<4x32xf32>
    %cst_151 = arith.constant 0.000000e+00 : f32
    %549 = vector.broadcast %cst_151 : f32 to vector<4x32xf32>
    %cst_152 = arith.constant 0.000000e+00 : f32
    %550 = vector.broadcast %cst_152 : f32 to vector<4x64xf32>
    %551 = tpu.concatenate %546, %547 in 1 : vector<4x32xf32>, vector<4x32xf32> -> vector<4x64xf32>
    %cst_153 = arith.constant dense<0.000000e+00> : vector<4x256xf32>
    %552 = tpu.matmul %551, %545, %cst_153 {dimension_numbers = #tpu.dot_dimension_numbers<[1], [0], [0], [1], [0, 0, 1, 1], [], []>} : vector<4x64xf32>, vector<64x256xf32>, vector<4x256xf32> -> vector<4x256xf32>
    %553 = vector.extract_strided_slice %544 {offsets = [0, 0], sizes = [4, 128], strides = [1, 1]} : vector<32x256xf32> to vector<4x128xf32>
    %554 = vector.extract_strided_slice %552 {offsets = [0, 0], sizes = [4, 128], strides = [1, 1]} : vector<4x256xf32> to vector<4x128xf32>
    %555 = arith.addf %553, %554 : vector<4x128xf32>
    %556 = vector.extract_strided_slice %544 {offsets = [28, 128], sizes = [4, 128], strides = [1, 1]} : vector<32x256xf32> to vector<4x128xf32>
    %557 = vector.extract_strided_slice %552 {offsets = [0, 128], sizes = [4, 128], strides = [1, 1]} : vector<4x256xf32> to vector<4x128xf32>
    %558 = arith.addf %556, %557 : vector<4x128xf32>
    %559 = vector.extract_strided_slice %555 {offsets = [0, 0], sizes = [4, 32], strides = [1, 1]} : vector<4x128xf32> to vector<4x32xf32>
    %cst_154 = arith.constant 0.000000e+00 : f32
    %560 = vector.broadcast %cst_154 : f32 to vector<4x32xf32>
    %561 = arith.subf %560, %559 : vector<4x32xf32>
    %562 = math.exp %561 : vector<4x32xf32>
    %cst_155 = arith.constant 1.000000e+00 : f32
    %563 = vector.broadcast %cst_155 : f32 to vector<4x32xf32>
    %564 = arith.addf %563, %562 : vector<4x32xf32>
    %565 = tpu.reciprocal %564 : vector<4x32xf32> -> vector<4x32xf32>
    %566 = vector.extract_strided_slice %555 {offsets = [0, 32], sizes = [4, 32], strides = [1, 1]} : vector<4x128xf32> to vector<4x32xf32>
    %cst_156 = arith.constant 0.000000e+00 : f32
    %567 = vector.broadcast %cst_156 : f32 to vector<4x32xf32>
    %568 = arith.subf %567, %566 : vector<4x32xf32>
    %569 = math.exp %568 : vector<4x32xf32>
    %cst_157 = arith.constant 1.000000e+00 : f32
    %570 = vector.broadcast %cst_157 : f32 to vector<4x32xf32>
    %571 = arith.addf %570, %569 : vector<4x32xf32>
    %572 = tpu.reciprocal %571 : vector<4x32xf32> -> vector<4x32xf32>
    %573 = vector.extract_strided_slice %555 {offsets = [0, 64], sizes = [4, 32], strides = [1, 1]} : vector<4x128xf32> to vector<4x32xf32>
    %574 = math.tanh %573 : vector<4x32xf32>
    %575 = vector.extract_strided_slice %555 {offsets = [0, 96], sizes = [4, 32], strides = [1, 1]} : vector<4x128xf32> to vector<4x32xf32>
    %cst_158 = arith.constant 0.000000e+00 : f32
    %576 = vector.broadcast %cst_158 : f32 to vector<4x32xf32>
    %577 = arith.subf %576, %575 : vector<4x32xf32>
    %578 = math.exp %577 : vector<4x32xf32>
    %cst_159 = arith.constant 1.000000e+00 : f32
    %579 = vector.broadcast %cst_159 : f32 to vector<4x32xf32>
    %580 = arith.addf %579, %578 : vector<4x32xf32>
    %581 = tpu.reciprocal %580 : vector<4x32xf32> -> vector<4x32xf32>
    %582 = arith.mulf %572, %548 : vector<4x32xf32>
    %583 = arith.mulf %565, %574 : vector<4x32xf32>
    %584 = arith.addf %582, %583 : vector<4x32xf32>
    %585 = math.tanh %584 : vector<4x32xf32>
    %586 = arith.mulf %581, %585 : vector<4x32xf32>
    %587 = vector.extract_strided_slice %558 {offsets = [0, 0], sizes = [4, 32], strides = [1, 1]} : vector<4x128xf32> to vector<4x32xf32>
    %cst_160 = arith.constant 0.000000e+00 : f32
    %588 = vector.broadcast %cst_160 : f32 to vector<4x32xf32>
    %589 = arith.subf %588, %587 : vector<4x32xf32>
    %590 = math.exp %589 : vector<4x32xf32>
    %cst_161 = arith.constant 1.000000e+00 : f32
    %591 = vector.broadcast %cst_161 : f32 to vector<4x32xf32>
    %592 = arith.addf %591, %590 : vector<4x32xf32>
    %593 = tpu.reciprocal %592 : vector<4x32xf32> -> vector<4x32xf32>
    %594 = vector.extract_strided_slice %558 {offsets = [0, 32], sizes = [4, 32], strides = [1, 1]} : vector<4x128xf32> to vector<4x32xf32>
    %cst_162 = arith.constant 0.000000e+00 : f32
    %595 = vector.broadcast %cst_162 : f32 to vector<4x32xf32>
    %596 = arith.subf %595, %594 : vector<4x32xf32>
    %597 = math.exp %596 : vector<4x32xf32>
    %cst_163 = arith.constant 1.000000e+00 : f32
    %598 = vector.broadcast %cst_163 : f32 to vector<4x32xf32>
    %599 = arith.addf %598, %597 : vector<4x32xf32>
    %600 = tpu.reciprocal %599 : vector<4x32xf32> -> vector<4x32xf32>
    %601 = vector.extract_strided_slice %558 {offsets = [0, 64], sizes = [4, 32], strides = [1, 1]} : vector<4x128xf32> to vector<4x32xf32>
    %602 = math.tanh %601 : vector<4x32xf32>
    %603 = vector.extract_strided_slice %558 {offsets = [0, 96], sizes = [4, 32], strides = [1, 1]} : vector<4x128xf32> to vector<4x32xf32>
    %cst_164 = arith.constant 0.000000e+00 : f32
    %604 = vector.broadcast %cst_164 : f32 to vector<4x32xf32>
    %605 = arith.subf %604, %603 : vector<4x32xf32>
    %606 = math.exp %605 : vector<4x32xf32>
    %cst_165 = arith.constant 1.000000e+00 : f32
    %607 = vector.broadcast %cst_165 : f32 to vector<4x32xf32>
    %608 = arith.addf %607, %606 : vector<4x32xf32>
    %609 = tpu.reciprocal %608 : vector<4x32xf32> -> vector<4x32xf32>
    %610 = arith.mulf %600, %549 : vector<4x32xf32>
    %611 = arith.mulf %593, %602 : vector<4x32xf32>
    %612 = arith.addf %610, %611 : vector<4x32xf32>
    %613 = math.tanh %612 : vector<4x32xf32>
    %614 = arith.mulf %609, %613 : vector<4x32xf32>
    %615 = tpu.concatenate %586, %614 in 1 : vector<4x32xf32>, vector<4x32xf32> -> vector<4x64xf32>
    %616 = arith.addf %550, %615 : vector<4x64xf32>
    %617 = tpu.concatenate %586, %614 in 1 : vector<4x32xf32>, vector<4x32xf32> -> vector<4x64xf32>
    %cst_166 = arith.constant dense<0.000000e+00> : vector<4x256xf32>
    %618 = tpu.matmul %617, %545, %cst_166 {dimension_numbers = #tpu.dot_dimension_numbers<[1], [0], [0], [1], [0, 0, 1, 1], [], []>} : vector<4x64xf32>, vector<64x256xf32>, vector<4x256xf32> -> vector<4x256xf32>
    %619 = vector.extract_strided_slice %544 {offsets = [4, 0], sizes = [4, 128], strides = [1, 1]} : vector<32x256xf32> to vector<4x128xf32>
    %620 = vector.extract_strided_slice %618 {offsets = [0, 0], sizes = [4, 128], strides = [1, 1]} : vector<4x256xf32> to vector<4x128xf32>
    %621 = arith.addf %619, %620 : vector<4x128xf32>
    %622 = vector.extract_strided_slice %544 {offsets = [24, 128], sizes = [4, 128], strides = [1, 1]} : vector<32x256xf32> to vector<4x128xf32>
    %623 = vector.extract_strided_slice %618 {offsets = [0, 128], sizes = [4, 128], strides = [1, 1]} : vector<4x256xf32> to vector<4x128xf32>
    %624 = arith.addf %622, %623 : vector<4x128xf32>
    %625 = vector.extract_strided_slice %621 {offsets = [0, 0], sizes = [4, 32], strides = [1, 1]} : vector<4x128xf32> to vector<4x32xf32>
    %cst_167 = arith.constant 0.000000e+00 : f32
    %626 = vector.broadcast %cst_167 : f32 to vector<4x32xf32>
    %627 = arith.subf %626, %625 : vector<4x32xf32>
    %628 = math.exp %627 : vector<4x32xf32>
    %cst_168 = arith.constant 1.000000e+00 : f32
    %629 = vector.broadcast %cst_168 : f32 to vector<4x32xf32>
    %630 = arith.addf %629, %628 : vector<4x32xf32>
    %631 = tpu.reciprocal %630 : vector<4x32xf32> -> vector<4x32xf32>
    %632 = vector.extract_strided_slice %621 {offsets = [0, 32], sizes = [4, 32], strides = [1, 1]} : vector<4x128xf32> to vector<4x32xf32>
    %cst_169 = arith.constant 0.000000e+00 : f32
    %633 = vector.broadcast %cst_169 : f32 to vector<4x32xf32>
    %634 = arith.subf %633, %632 : vector<4x32xf32>
    %635 = math.exp %634 : vector<4x32xf32>
    %cst_170 = arith.constant 1.000000e+00 : f32
    %636 = vector.broadcast %cst_170 : f32 to vector<4x32xf32>
    %637 = arith.addf %636, %635 : vector<4x32xf32>
    %638 = tpu.reciprocal %637 : vector<4x32xf32> -> vector<4x32xf32>
    %639 = vector.extract_strided_slice %621 {offsets = [0, 64], sizes = [4, 32], strides = [1, 1]} : vector<4x128xf32> to vector<4x32xf32>
    %640 = math.tanh %639 : vector<4x32xf32>
    %641 = vector.extract_strided_slice %621 {offsets = [0, 96], sizes = [4, 32], strides = [1, 1]} : vector<4x128xf32> to vector<4x32xf32>
    %cst_171 = arith.constant 0.000000e+00 : f32
    %642 = vector.broadcast %cst_171 : f32 to vector<4x32xf32>
    %643 = arith.subf %642, %641 : vector<4x32xf32>
    %644 = math.exp %643 : vector<4x32xf32>
    %cst_172 = arith.constant 1.000000e+00 : f32
    %645 = vector.broadcast %cst_172 : f32 to vector<4x32xf32>
    %646 = arith.addf %645, %644 : vector<4x32xf32>
    %647 = tpu.reciprocal %646 : vector<4x32xf32> -> vector<4x32xf32>
    %648 = arith.mulf %638, %584 : vector<4x32xf32>
    %649 = arith.mulf %631, %640 : vector<4x32xf32>
    %650 = arith.addf %648, %649 : vector<4x32xf32>
    %651 = math.tanh %650 : vector<4x32xf32>
    %652 = arith.mulf %647, %651 : vector<4x32xf32>
    %653 = vector.extract_strided_slice %624 {offsets = [0, 0], sizes = [4, 32], strides = [1, 1]} : vector<4x128xf32> to vector<4x32xf32>
    %cst_173 = arith.constant 0.000000e+00 : f32
    %654 = vector.broadcast %cst_173 : f32 to vector<4x32xf32>
    %655 = arith.subf %654, %653 : vector<4x32xf32>
    %656 = math.exp %655 : vector<4x32xf32>
    %cst_174 = arith.constant 1.000000e+00 : f32
    %657 = vector.broadcast %cst_174 : f32 to vector<4x32xf32>
    %658 = arith.addf %657, %656 : vector<4x32xf32>
    %659 = tpu.reciprocal %658 : vector<4x32xf32> -> vector<4x32xf32>
    %660 = vector.extract_strided_slice %624 {offsets = [0, 32], sizes = [4, 32], strides = [1, 1]} : vector<4x128xf32> to vector<4x32xf32>
    %cst_175 = arith.constant 0.000000e+00 : f32
    %661 = vector.broadcast %cst_175 : f32 to vector<4x32xf32>
    %662 = arith.subf %661, %660 : vector<4x32xf32>
    %663 = math.exp %662 : vector<4x32xf32>
    %cst_176 = arith.constant 1.000000e+00 : f32
    %664 = vector.broadcast %cst_176 : f32 to vector<4x32xf32>
    %665 = arith.addf %664, %663 : vector<4x32xf32>
    %666 = tpu.reciprocal %665 : vector<4x32xf32> -> vector<4x32xf32>
    %667 = vector.extract_strided_slice %624 {offsets = [0, 64], sizes = [4, 32], strides = [1, 1]} : vector<4x128xf32> to vector<4x32xf32>
    %668 = math.tanh %667 : vector<4x32xf32>
    %669 = vector.extract_strided_slice %624 {offsets = [0, 96], sizes = [4, 32], strides = [1, 1]} : vector<4x128xf32> to vector<4x32xf32>
    %cst_177 = arith.constant 0.000000e+00 : f32
    %670 = vector.broadcast %cst_177 : f32 to vector<4x32xf32>
    %671 = arith.subf %670, %669 : vector<4x32xf32>
    %672 = math.exp %671 : vector<4x32xf32>
    %cst_178 = arith.constant 1.000000e+00 : f32
    %673 = vector.broadcast %cst_178 : f32 to vector<4x32xf32>
    %674 = arith.addf %673, %672 : vector<4x32xf32>
    %675 = tpu.reciprocal %674 : vector<4x32xf32> -> vector<4x32xf32>
    %676 = arith.mulf %666, %612 : vector<4x32xf32>
    %677 = arith.mulf %659, %668 : vector<4x32xf32>
    %678 = arith.addf %676, %677 : vector<4x32xf32>
    %679 = math.tanh %678 : vector<4x32xf32>
    %680 = arith.mulf %675, %679 : vector<4x32xf32>
    %681 = tpu.concatenate %652, %680 in 1 : vector<4x32xf32>, vector<4x32xf32> -> vector<4x64xf32>
    %682 = arith.addf %616, %681 : vector<4x64xf32>
    %683 = tpu.concatenate %652, %680 in 1 : vector<4x32xf32>, vector<4x32xf32> -> vector<4x64xf32>
    %cst_179 = arith.constant dense<0.000000e+00> : vector<4x256xf32>
    %684 = tpu.matmul %683, %545, %cst_179 {dimension_numbers = #tpu.dot_dimension_numbers<[1], [0], [0], [1], [0, 0, 1, 1], [], []>} : vector<4x64xf32>, vector<64x256xf32>, vector<4x256xf32> -> vector<4x256xf32>
    %685 = vector.extract_strided_slice %544 {offsets = [8, 0], sizes = [4, 128], strides = [1, 1]} : vector<32x256xf32> to vector<4x128xf32>
    %686 = vector.extract_strided_slice %684 {offsets = [0, 0], sizes = [4, 128], strides = [1, 1]} : vector<4x256xf32> to vector<4x128xf32>
    %687 = arith.addf %685, %686 : vector<4x128xf32>
    %688 = vector.extract_strided_slice %544 {offsets = [20, 128], sizes = [4, 128], strides = [1, 1]} : vector<32x256xf32> to vector<4x128xf32>
    %689 = vector.extract_strided_slice %684 {offsets = [0, 128], sizes = [4, 128], strides = [1, 1]} : vector<4x256xf32> to vector<4x128xf32>
    %690 = arith.addf %688, %689 : vector<4x128xf32>
    %691 = vector.extract_strided_slice %687 {offsets = [0, 0], sizes = [4, 32], strides = [1, 1]} : vector<4x128xf32> to vector<4x32xf32>
    %cst_180 = arith.constant 0.000000e+00 : f32
    %692 = vector.broadcast %cst_180 : f32 to vector<4x32xf32>
    %693 = arith.subf %692, %691 : vector<4x32xf32>
    %694 = math.exp %693 : vector<4x32xf32>
    %cst_181 = arith.constant 1.000000e+00 : f32
    %695 = vector.broadcast %cst_181 : f32 to vector<4x32xf32>
    %696 = arith.addf %695, %694 : vector<4x32xf32>
    %697 = tpu.reciprocal %696 : vector<4x32xf32> -> vector<4x32xf32>
    %698 = vector.extract_strided_slice %687 {offsets = [0, 32], sizes = [4, 32], strides = [1, 1]} : vector<4x128xf32> to vector<4x32xf32>
    %cst_182 = arith.constant 0.000000e+00 : f32
    %699 = vector.broadcast %cst_182 : f32 to vector<4x32xf32>
    %700 = arith.subf %699, %698 : vector<4x32xf32>
    %701 = math.exp %700 : vector<4x32xf32>
    %cst_183 = arith.constant 1.000000e+00 : f32
    %702 = vector.broadcast %cst_183 : f32 to vector<4x32xf32>
    %703 = arith.addf %702, %701 : vector<4x32xf32>
    %704 = tpu.reciprocal %703 : vector<4x32xf32> -> vector<4x32xf32>
    %705 = vector.extract_strided_slice %687 {offsets = [0, 64], sizes = [4, 32], strides = [1, 1]} : vector<4x128xf32> to vector<4x32xf32>
    %706 = math.tanh %705 : vector<4x32xf32>
    %707 = vector.extract_strided_slice %687 {offsets = [0, 96], sizes = [4, 32], strides = [1, 1]} : vector<4x128xf32> to vector<4x32xf32>
    %cst_184 = arith.constant 0.000000e+00 : f32
    %708 = vector.broadcast %cst_184 : f32 to vector<4x32xf32>
    %709 = arith.subf %708, %707 : vector<4x32xf32>
    %710 = math.exp %709 : vector<4x32xf32>
    %cst_185 = arith.constant 1.000000e+00 : f32
    %711 = vector.broadcast %cst_185 : f32 to vector<4x32xf32>
    %712 = arith.addf %711, %710 : vector<4x32xf32>
    %713 = tpu.reciprocal %712 : vector<4x32xf32> -> vector<4x32xf32>
    %714 = arith.mulf %704, %650 : vector<4x32xf32>
    %715 = arith.mulf %697, %706 : vector<4x32xf32>
    %716 = arith.addf %714, %715 : vector<4x32xf32>
    %717 = math.tanh %716 : vector<4x32xf32>
    %718 = arith.mulf %713, %717 : vector<4x32xf32>
    %719 = vector.extract_strided_slice %690 {offsets = [0, 0], sizes = [4, 32], strides = [1, 1]} : vector<4x128xf32> to vector<4x32xf32>
    %cst_186 = arith.constant 0.000000e+00 : f32
    %720 = vector.broadcast %cst_186 : f32 to vector<4x32xf32>
    %721 = arith.subf %720, %719 : vector<4x32xf32>
    %722 = math.exp %721 : vector<4x32xf32>
    %cst_187 = arith.constant 1.000000e+00 : f32
    %723 = vector.broadcast %cst_187 : f32 to vector<4x32xf32>
    %724 = arith.addf %723, %722 : vector<4x32xf32>
    %725 = tpu.reciprocal %724 : vector<4x32xf32> -> vector<4x32xf32>
    %726 = vector.extract_strided_slice %690 {offsets = [0, 32], sizes = [4, 32], strides = [1, 1]} : vector<4x128xf32> to vector<4x32xf32>
    %cst_188 = arith.constant 0.000000e+00 : f32
    %727 = vector.broadcast %cst_188 : f32 to vector<4x32xf32>
    %728 = arith.subf %727, %726 : vector<4x32xf32>
    %729 = math.exp %728 : vector<4x32xf32>
    %cst_189 = arith.constant 1.000000e+00 : f32
    %730 = vector.broadcast %cst_189 : f32 to vector<4x32xf32>
    %731 = arith.addf %730, %729 : vector<4x32xf32>
    %732 = tpu.reciprocal %731 : vector<4x32xf32> -> vector<4x32xf32>
    %733 = vector.extract_strided_slice %690 {offsets = [0, 64], sizes = [4, 32], strides = [1, 1]} : vector<4x128xf32> to vector<4x32xf32>
    %734 = math.tanh %733 : vector<4x32xf32>
    %735 = vector.extract_strided_slice %690 {offsets = [0, 96], sizes = [4, 32], strides = [1, 1]} : vector<4x128xf32> to vector<4x32xf32>
    %cst_190 = arith.constant 0.000000e+00 : f32
    %736 = vector.broadcast %cst_190 : f32 to vector<4x32xf32>
    %737 = arith.subf %736, %735 : vector<4x32xf32>
    %738 = math.exp %737 : vector<4x32xf32>
    %cst_191 = arith.constant 1.000000e+00 : f32
    %739 = vector.broadcast %cst_191 : f32 to vector<4x32xf32>
    %740 = arith.addf %739, %738 : vector<4x32xf32>
    %741 = tpu.reciprocal %740 : vector<4x32xf32> -> vector<4x32xf32>
    %742 = arith.mulf %732, %678 : vector<4x32xf32>
    %743 = arith.mulf %725, %734 : vector<4x32xf32>
    %744 = arith.addf %742, %743 : vector<4x32xf32>
    %745 = math.tanh %744 : vector<4x32xf32>
    %746 = arith.mulf %741, %745 : vector<4x32xf32>
    %747 = tpu.concatenate %718, %746 in 1 : vector<4x32xf32>, vector<4x32xf32> -> vector<4x64xf32>
    %748 = arith.addf %682, %747 : vector<4x64xf32>
    %749 = tpu.concatenate %718, %746 in 1 : vector<4x32xf32>, vector<4x32xf32> -> vector<4x64xf32>
    %cst_192 = arith.constant dense<0.000000e+00> : vector<4x256xf32>
    %750 = tpu.matmul %749, %545, %cst_192 {dimension_numbers = #tpu.dot_dimension_numbers<[1], [0], [0], [1], [0, 0, 1, 1], [], []>} : vector<4x64xf32>, vector<64x256xf32>, vector<4x256xf32> -> vector<4x256xf32>
    %751 = vector.extract_strided_slice %544 {offsets = [12, 0], sizes = [4, 128], strides = [1, 1]} : vector<32x256xf32> to vector<4x128xf32>
    %752 = vector.extract_strided_slice %750 {offsets = [0, 0], sizes = [4, 128], strides = [1, 1]} : vector<4x256xf32> to vector<4x128xf32>
    %753 = arith.addf %751, %752 : vector<4x128xf32>
    %754 = vector.extract_strided_slice %544 {offsets = [16, 128], sizes = [4, 128], strides = [1, 1]} : vector<32x256xf32> to vector<4x128xf32>
    %755 = vector.extract_strided_slice %750 {offsets = [0, 128], sizes = [4, 128], strides = [1, 1]} : vector<4x256xf32> to vector<4x128xf32>
    %756 = arith.addf %754, %755 : vector<4x128xf32>
    %757 = vector.extract_strided_slice %753 {offsets = [0, 0], sizes = [4, 32], strides = [1, 1]} : vector<4x128xf32> to vector<4x32xf32>
    %cst_193 = arith.constant 0.000000e+00 : f32
    %758 = vector.broadcast %cst_193 : f32 to vector<4x32xf32>
    %759 = arith.subf %758, %757 : vector<4x32xf32>
    %760 = math.exp %759 : vector<4x32xf32>
    %cst_194 = arith.constant 1.000000e+00 : f32
    %761 = vector.broadcast %cst_194 : f32 to vector<4x32xf32>
    %762 = arith.addf %761, %760 : vector<4x32xf32>
    %763 = tpu.reciprocal %762 : vector<4x32xf32> -> vector<4x32xf32>
    %764 = vector.extract_strided_slice %753 {offsets = [0, 32], sizes = [4, 32], strides = [1, 1]} : vector<4x128xf32> to vector<4x32xf32>
    %cst_195 = arith.constant 0.000000e+00 : f32
    %765 = vector.broadcast %cst_195 : f32 to vector<4x32xf32>
    %766 = arith.subf %765, %764 : vector<4x32xf32>
    %767 = math.exp %766 : vector<4x32xf32>
    %cst_196 = arith.constant 1.000000e+00 : f32
    %768 = vector.broadcast %cst_196 : f32 to vector<4x32xf32>
    %769 = arith.addf %768, %767 : vector<4x32xf32>
    %770 = tpu.reciprocal %769 : vector<4x32xf32> -> vector<4x32xf32>
    %771 = vector.extract_strided_slice %753 {offsets = [0, 64], sizes = [4, 32], strides = [1, 1]} : vector<4x128xf32> to vector<4x32xf32>
    %772 = math.tanh %771 : vector<4x32xf32>
    %773 = vector.extract_strided_slice %753 {offsets = [0, 96], sizes = [4, 32], strides = [1, 1]} : vector<4x128xf32> to vector<4x32xf32>
    %cst_197 = arith.constant 0.000000e+00 : f32
    %774 = vector.broadcast %cst_197 : f32 to vector<4x32xf32>
    %775 = arith.subf %774, %773 : vector<4x32xf32>
    %776 = math.exp %775 : vector<4x32xf32>
    %cst_198 = arith.constant 1.000000e+00 : f32
    %777 = vector.broadcast %cst_198 : f32 to vector<4x32xf32>
    %778 = arith.addf %777, %776 : vector<4x32xf32>
    %779 = tpu.reciprocal %778 : vector<4x32xf32> -> vector<4x32xf32>
    %780 = arith.mulf %770, %716 : vector<4x32xf32>
    %781 = arith.mulf %763, %772 : vector<4x32xf32>
    %782 = arith.addf %780, %781 : vector<4x32xf32>
    %783 = math.tanh %782 : vector<4x32xf32>
    %784 = arith.mulf %779, %783 : vector<4x32xf32>
    %785 = vector.extract_strided_slice %756 {offsets = [0, 0], sizes = [4, 32], strides = [1, 1]} : vector<4x128xf32> to vector<4x32xf32>
    %cst_199 = arith.constant 0.000000e+00 : f32
    %786 = vector.broadcast %cst_199 : f32 to vector<4x32xf32>
    %787 = arith.subf %786, %785 : vector<4x32xf32>
    %788 = math.exp %787 : vector<4x32xf32>
    %cst_200 = arith.constant 1.000000e+00 : f32
    %789 = vector.broadcast %cst_200 : f32 to vector<4x32xf32>
    %790 = arith.addf %789, %788 : vector<4x32xf32>
    %791 = tpu.reciprocal %790 : vector<4x32xf32> -> vector<4x32xf32>
    %792 = vector.extract_strided_slice %756 {offsets = [0, 32], sizes = [4, 32], strides = [1, 1]} : vector<4x128xf32> to vector<4x32xf32>
    %cst_201 = arith.constant 0.000000e+00 : f32
    %793 = vector.broadcast %cst_201 : f32 to vector<4x32xf32>
    %794 = arith.subf %793, %792 : vector<4x32xf32>
    %795 = math.exp %794 : vector<4x32xf32>
    %cst_202 = arith.constant 1.000000e+00 : f32
    %796 = vector.broadcast %cst_202 : f32 to vector<4x32xf32>
    %797 = arith.addf %796, %795 : vector<4x32xf32>
    %798 = tpu.reciprocal %797 : vector<4x32xf32> -> vector<4x32xf32>
    %799 = vector.extract_strided_slice %756 {offsets = [0, 64], sizes = [4, 32], strides = [1, 1]} : vector<4x128xf32> to vector<4x32xf32>
    %800 = math.tanh %799 : vector<4x32xf32>
    %801 = vector.extract_strided_slice %756 {offsets = [0, 96], sizes = [4, 32], strides = [1, 1]} : vector<4x128xf32> to vector<4x32xf32>
    %cst_203 = arith.constant 0.000000e+00 : f32
    %802 = vector.broadcast %cst_203 : f32 to vector<4x32xf32>
    %803 = arith.subf %802, %801 : vector<4x32xf32>
    %804 = math.exp %803 : vector<4x32xf32>
    %cst_204 = arith.constant 1.000000e+00 : f32
    %805 = vector.broadcast %cst_204 : f32 to vector<4x32xf32>
    %806 = arith.addf %805, %804 : vector<4x32xf32>
    %807 = tpu.reciprocal %806 : vector<4x32xf32> -> vector<4x32xf32>
    %808 = arith.mulf %798, %744 : vector<4x32xf32>
    %809 = arith.mulf %791, %800 : vector<4x32xf32>
    %810 = arith.addf %808, %809 : vector<4x32xf32>
    %811 = math.tanh %810 : vector<4x32xf32>
    %812 = arith.mulf %807, %811 : vector<4x32xf32>
    %813 = tpu.concatenate %784, %812 in 1 : vector<4x32xf32>, vector<4x32xf32> -> vector<4x64xf32>
    %814 = arith.addf %748, %813 : vector<4x64xf32>
    %815 = tpu.concatenate %784, %812 in 1 : vector<4x32xf32>, vector<4x32xf32> -> vector<4x64xf32>
    %cst_205 = arith.constant dense<0.000000e+00> : vector<4x256xf32>
    %816 = tpu.matmul %815, %545, %cst_205 {dimension_numbers = #tpu.dot_dimension_numbers<[1], [0], [0], [1], [0, 0, 1, 1], [], []>} : vector<4x64xf32>, vector<64x256xf32>, vector<4x256xf32> -> vector<4x256xf32>
    %817 = vector.extract_strided_slice %544 {offsets = [16, 0], sizes = [4, 128], strides = [1, 1]} : vector<32x256xf32> to vector<4x128xf32>
    %818 = vector.extract_strided_slice %816 {offsets = [0, 0], sizes = [4, 128], strides = [1, 1]} : vector<4x256xf32> to vector<4x128xf32>
    %819 = arith.addf %817, %818 : vector<4x128xf32>
    %820 = vector.extract_strided_slice %544 {offsets = [12, 128], sizes = [4, 128], strides = [1, 1]} : vector<32x256xf32> to vector<4x128xf32>
    %821 = vector.extract_strided_slice %816 {offsets = [0, 128], sizes = [4, 128], strides = [1, 1]} : vector<4x256xf32> to vector<4x128xf32>
    %822 = arith.addf %820, %821 : vector<4x128xf32>
    %823 = vector.extract_strided_slice %819 {offsets = [0, 0], sizes = [4, 32], strides = [1, 1]} : vector<4x128xf32> to vector<4x32xf32>
    %cst_206 = arith.constant 0.000000e+00 : f32
    %824 = vector.broadcast %cst_206 : f32 to vector<4x32xf32>
    %825 = arith.subf %824, %823 : vector<4x32xf32>
    %826 = math.exp %825 : vector<4x32xf32>
    %cst_207 = arith.constant 1.000000e+00 : f32
    %827 = vector.broadcast %cst_207 : f32 to vector<4x32xf32>
    %828 = arith.addf %827, %826 : vector<4x32xf32>
    %829 = tpu.reciprocal %828 : vector<4x32xf32> -> vector<4x32xf32>
    %830 = vector.extract_strided_slice %819 {offsets = [0, 32], sizes = [4, 32], strides = [1, 1]} : vector<4x128xf32> to vector<4x32xf32>
    %cst_208 = arith.constant 0.000000e+00 : f32
    %831 = vector.broadcast %cst_208 : f32 to vector<4x32xf32>
    %832 = arith.subf %831, %830 : vector<4x32xf32>
    %833 = math.exp %832 : vector<4x32xf32>
    %cst_209 = arith.constant 1.000000e+00 : f32
    %834 = vector.broadcast %cst_209 : f32 to vector<4x32xf32>
    %835 = arith.addf %834, %833 : vector<4x32xf32>
    %836 = tpu.reciprocal %835 : vector<4x32xf32> -> vector<4x32xf32>
    %837 = vector.extract_strided_slice %819 {offsets = [0, 64], sizes = [4, 32], strides = [1, 1]} : vector<4x128xf32> to vector<4x32xf32>
    %838 = math.tanh %837 : vector<4x32xf32>
    %839 = vector.extract_strided_slice %819 {offsets = [0, 96], sizes = [4, 32], strides = [1, 1]} : vector<4x128xf32> to vector<4x32xf32>
    %cst_210 = arith.constant 0.000000e+00 : f32
    %840 = vector.broadcast %cst_210 : f32 to vector<4x32xf32>
    %841 = arith.subf %840, %839 : vector<4x32xf32>
    %842 = math.exp %841 : vector<4x32xf32>
    %cst_211 = arith.constant 1.000000e+00 : f32
    %843 = vector.broadcast %cst_211 : f32 to vector<4x32xf32>
    %844 = arith.addf %843, %842 : vector<4x32xf32>
    %845 = tpu.reciprocal %844 : vector<4x32xf32> -> vector<4x32xf32>
    %846 = arith.mulf %836, %782 : vector<4x32xf32>
    %847 = arith.mulf %829, %838 : vector<4x32xf32>
    %848 = arith.addf %846, %847 : vector<4x32xf32>
    %849 = math.tanh %848 : vector<4x32xf32>
    %850 = arith.mulf %845, %849 : vector<4x32xf32>
    %851 = vector.extract_strided_slice %822 {offsets = [0, 0], sizes = [4, 32], strides = [1, 1]} : vector<4x128xf32> to vector<4x32xf32>
    %cst_212 = arith.constant 0.000000e+00 : f32
    %852 = vector.broadcast %cst_212 : f32 to vector<4x32xf32>
    %853 = arith.subf %852, %851 : vector<4x32xf32>
    %854 = math.exp %853 : vector<4x32xf32>
    %cst_213 = arith.constant 1.000000e+00 : f32
    %855 = vector.broadcast %cst_213 : f32 to vector<4x32xf32>
    %856 = arith.addf %855, %854 : vector<4x32xf32>
    %857 = tpu.reciprocal %856 : vector<4x32xf32> -> vector<4x32xf32>
    %858 = vector.extract_strided_slice %822 {offsets = [0, 32], sizes = [4, 32], strides = [1, 1]} : vector<4x128xf32> to vector<4x32xf32>
    %cst_214 = arith.constant 0.000000e+00 : f32
    %859 = vector.broadcast %cst_214 : f32 to vector<4x32xf32>
    %860 = arith.subf %859, %858 : vector<4x32xf32>
    %861 = math.exp %860 : vector<4x32xf32>
    %cst_215 = arith.constant 1.000000e+00 : f32
    %862 = vector.broadcast %cst_215 : f32 to vector<4x32xf32>
    %863 = arith.addf %862, %861 : vector<4x32xf32>
    %864 = tpu.reciprocal %863 : vector<4x32xf32> -> vector<4x32xf32>
    %865 = vector.extract_strided_slice %822 {offsets = [0, 64], sizes = [4, 32], strides = [1, 1]} : vector<4x128xf32> to vector<4x32xf32>
    %866 = math.tanh %865 : vector<4x32xf32>
    %867 = vector.extract_strided_slice %822 {offsets = [0, 96], sizes = [4, 32], strides = [1, 1]} : vector<4x128xf32> to vector<4x32xf32>
    %cst_216 = arith.constant 0.000000e+00 : f32
    %868 = vector.broadcast %cst_216 : f32 to vector<4x32xf32>
    %869 = arith.subf %868, %867 : vector<4x32xf32>
    %870 = math.exp %869 : vector<4x32xf32>
    %cst_217 = arith.constant 1.000000e+00 : f32
    %871 = vector.broadcast %cst_217 : f32 to vector<4x32xf32>
    %872 = arith.addf %871, %870 : vector<4x32xf32>
    %873 = tpu.reciprocal %872 : vector<4x32xf32> -> vector<4x32xf32>
    %874 = arith.mulf %864, %810 : vector<4x32xf32>
    %875 = arith.mulf %857, %866 : vector<4x32xf32>
    %876 = arith.addf %874, %875 : vector<4x32xf32>
    %877 = math.tanh %876 : vector<4x32xf32>
    %878 = arith.mulf %873, %877 : vector<4x32xf32>
    %879 = tpu.concatenate %850, %878 in 1 : vector<4x32xf32>, vector<4x32xf32> -> vector<4x64xf32>
    %880 = arith.addf %814, %879 : vector<4x64xf32>
    %881 = tpu.concatenate %850, %878 in 1 : vector<4x32xf32>, vector<4x32xf32> -> vector<4x64xf32>
    %cst_218 = arith.constant dense<0.000000e+00> : vector<4x256xf32>
    %882 = tpu.matmul %881, %545, %cst_218 {dimension_numbers = #tpu.dot_dimension_numbers<[1], [0], [0], [1], [0, 0, 1, 1], [], []>} : vector<4x64xf32>, vector<64x256xf32>, vector<4x256xf32> -> vector<4x256xf32>
    %883 = vector.extract_strided_slice %544 {offsets = [20, 0], sizes = [4, 128], strides = [1, 1]} : vector<32x256xf32> to vector<4x128xf32>
    %884 = vector.extract_strided_slice %882 {offsets = [0, 0], sizes = [4, 128], strides = [1, 1]} : vector<4x256xf32> to vector<4x128xf32>
    %885 = arith.addf %883, %884 : vector<4x128xf32>
    %886 = vector.extract_strided_slice %544 {offsets = [8, 128], sizes = [4, 128], strides = [1, 1]} : vector<32x256xf32> to vector<4x128xf32>
    %887 = vector.extract_strided_slice %882 {offsets = [0, 128], sizes = [4, 128], strides = [1, 1]} : vector<4x256xf32> to vector<4x128xf32>
    %888 = arith.addf %886, %887 : vector<4x128xf32>
    %889 = vector.extract_strided_slice %885 {offsets = [0, 0], sizes = [4, 32], strides = [1, 1]} : vector<4x128xf32> to vector<4x32xf32>
    %cst_219 = arith.constant 0.000000e+00 : f32
    %890 = vector.broadcast %cst_219 : f32 to vector<4x32xf32>
    %891 = arith.subf %890, %889 : vector<4x32xf32>
    %892 = math.exp %891 : vector<4x32xf32>
    %cst_220 = arith.constant 1.000000e+00 : f32
    %893 = vector.broadcast %cst_220 : f32 to vector<4x32xf32>
    %894 = arith.addf %893, %892 : vector<4x32xf32>
    %895 = tpu.reciprocal %894 : vector<4x32xf32> -> vector<4x32xf32>
    %896 = vector.extract_strided_slice %885 {offsets = [0, 32], sizes = [4, 32], strides = [1, 1]} : vector<4x128xf32> to vector<4x32xf32>
    %cst_221 = arith.constant 0.000000e+00 : f32
    %897 = vector.broadcast %cst_221 : f32 to vector<4x32xf32>
    %898 = arith.subf %897, %896 : vector<4x32xf32>
    %899 = math.exp %898 : vector<4x32xf32>
    %cst_222 = arith.constant 1.000000e+00 : f32
    %900 = vector.broadcast %cst_222 : f32 to vector<4x32xf32>
    %901 = arith.addf %900, %899 : vector<4x32xf32>
    %902 = tpu.reciprocal %901 : vector<4x32xf32> -> vector<4x32xf32>
    %903 = vector.extract_strided_slice %885 {offsets = [0, 64], sizes = [4, 32], strides = [1, 1]} : vector<4x128xf32> to vector<4x32xf32>
    %904 = math.tanh %903 : vector<4x32xf32>
    %905 = vector.extract_strided_slice %885 {offsets = [0, 96], sizes = [4, 32], strides = [1, 1]} : vector<4x128xf32> to vector<4x32xf32>
    %cst_223 = arith.constant 0.000000e+00 : f32
    %906 = vector.broadcast %cst_223 : f32 to vector<4x32xf32>
    %907 = arith.subf %906, %905 : vector<4x32xf32>
    %908 = math.exp %907 : vector<4x32xf32>
    %cst_224 = arith.constant 1.000000e+00 : f32
    %909 = vector.broadcast %cst_224 : f32 to vector<4x32xf32>
    %910 = arith.addf %909, %908 : vector<4x32xf32>
    %911 = tpu.reciprocal %910 : vector<4x32xf32> -> vector<4x32xf32>
    %912 = arith.mulf %902, %848 : vector<4x32xf32>
    %913 = arith.mulf %895, %904 : vector<4x32xf32>
    %914 = arith.addf %912, %913 : vector<4x32xf32>
    %915 = math.tanh %914 : vector<4x32xf32>
    %916 = arith.mulf %911, %915 : vector<4x32xf32>
    %917 = vector.extract_strided_slice %888 {offsets = [0, 0], sizes = [4, 32], strides = [1, 1]} : vector<4x128xf32> to vector<4x32xf32>
    %cst_225 = arith.constant 0.000000e+00 : f32
    %918 = vector.broadcast %cst_225 : f32 to vector<4x32xf32>
    %919 = arith.subf %918, %917 : vector<4x32xf32>
    %920 = math.exp %919 : vector<4x32xf32>
    %cst_226 = arith.constant 1.000000e+00 : f32
    %921 = vector.broadcast %cst_226 : f32 to vector<4x32xf32>
    %922 = arith.addf %921, %920 : vector<4x32xf32>
    %923 = tpu.reciprocal %922 : vector<4x32xf32> -> vector<4x32xf32>
    %924 = vector.extract_strided_slice %888 {offsets = [0, 32], sizes = [4, 32], strides = [1, 1]} : vector<4x128xf32> to vector<4x32xf32>
    %cst_227 = arith.constant 0.000000e+00 : f32
    %925 = vector.broadcast %cst_227 : f32 to vector<4x32xf32>
    %926 = arith.subf %925, %924 : vector<4x32xf32>
    %927 = math.exp %926 : vector<4x32xf32>
    %cst_228 = arith.constant 1.000000e+00 : f32
    %928 = vector.broadcast %cst_228 : f32 to vector<4x32xf32>
    %929 = arith.addf %928, %927 : vector<4x32xf32>
    %930 = tpu.reciprocal %929 : vector<4x32xf32> -> vector<4x32xf32>
    %931 = vector.extract_strided_slice %888 {offsets = [0, 64], sizes = [4, 32], strides = [1, 1]} : vector<4x128xf32> to vector<4x32xf32>
    %932 = math.tanh %931 : vector<4x32xf32>
    %933 = vector.extract_strided_slice %888 {offsets = [0, 96], sizes = [4, 32], strides = [1, 1]} : vector<4x128xf32> to vector<4x32xf32>
    %cst_229 = arith.constant 0.000000e+00 : f32
    %934 = vector.broadcast %cst_229 : f32 to vector<4x32xf32>
    %935 = arith.subf %934, %933 : vector<4x32xf32>
    %936 = math.exp %935 : vector<4x32xf32>
    %cst_230 = arith.constant 1.000000e+00 : f32
    %937 = vector.broadcast %cst_230 : f32 to vector<4x32xf32>
    %938 = arith.addf %937, %936 : vector<4x32xf32>
    %939 = tpu.reciprocal %938 : vector<4x32xf32> -> vector<4x32xf32>
    %940 = arith.mulf %930, %876 : vector<4x32xf32>
    %941 = arith.mulf %923, %932 : vector<4x32xf32>
    %942 = arith.addf %940, %941 : vector<4x32xf32>
    %943 = math.tanh %942 : vector<4x32xf32>
    %944 = arith.mulf %939, %943 : vector<4x32xf32>
    %945 = tpu.concatenate %916, %944 in 1 : vector<4x32xf32>, vector<4x32xf32> -> vector<4x64xf32>
    %946 = arith.addf %880, %945 : vector<4x64xf32>
    %947 = tpu.concatenate %916, %944 in 1 : vector<4x32xf32>, vector<4x32xf32> -> vector<4x64xf32>
    %cst_231 = arith.constant dense<0.000000e+00> : vector<4x256xf32>
    %948 = tpu.matmul %947, %545, %cst_231 {dimension_numbers = #tpu.dot_dimension_numbers<[1], [0], [0], [1], [0, 0, 1, 1], [], []>} : vector<4x64xf32>, vector<64x256xf32>, vector<4x256xf32> -> vector<4x256xf32>
    %949 = vector.extract_strided_slice %544 {offsets = [24, 0], sizes = [4, 128], strides = [1, 1]} : vector<32x256xf32> to vector<4x128xf32>
    %950 = vector.extract_strided_slice %948 {offsets = [0, 0], sizes = [4, 128], strides = [1, 1]} : vector<4x256xf32> to vector<4x128xf32>
    %951 = arith.addf %949, %950 : vector<4x128xf32>
    %952 = vector.extract_strided_slice %544 {offsets = [4, 128], sizes = [4, 128], strides = [1, 1]} : vector<32x256xf32> to vector<4x128xf32>
    %953 = vector.extract_strided_slice %948 {offsets = [0, 128], sizes = [4, 128], strides = [1, 1]} : vector<4x256xf32> to vector<4x128xf32>
    %954 = arith.addf %952, %953 : vector<4x128xf32>
    %955 = vector.extract_strided_slice %951 {offsets = [0, 0], sizes = [4, 32], strides = [1, 1]} : vector<4x128xf32> to vector<4x32xf32>
    %cst_232 = arith.constant 0.000000e+00 : f32
    %956 = vector.broadcast %cst_232 : f32 to vector<4x32xf32>
    %957 = arith.subf %956, %955 : vector<4x32xf32>
    %958 = math.exp %957 : vector<4x32xf32>
    %cst_233 = arith.constant 1.000000e+00 : f32
    %959 = vector.broadcast %cst_233 : f32 to vector<4x32xf32>
    %960 = arith.addf %959, %958 : vector<4x32xf32>
    %961 = tpu.reciprocal %960 : vector<4x32xf32> -> vector<4x32xf32>
    %962 = vector.extract_strided_slice %951 {offsets = [0, 32], sizes = [4, 32], strides = [1, 1]} : vector<4x128xf32> to vector<4x32xf32>
    %cst_234 = arith.constant 0.000000e+00 : f32
    %963 = vector.broadcast %cst_234 : f32 to vector<4x32xf32>
    %964 = arith.subf %963, %962 : vector<4x32xf32>
    %965 = math.exp %964 : vector<4x32xf32>
    %cst_235 = arith.constant 1.000000e+00 : f32
    %966 = vector.broadcast %cst_235 : f32 to vector<4x32xf32>
    %967 = arith.addf %966, %965 : vector<4x32xf32>
    %968 = tpu.reciprocal %967 : vector<4x32xf32> -> vector<4x32xf32>
    %969 = vector.extract_strided_slice %951 {offsets = [0, 64], sizes = [4, 32], strides = [1, 1]} : vector<4x128xf32> to vector<4x32xf32>
    %970 = math.tanh %969 : vector<4x32xf32>
    %971 = vector.extract_strided_slice %951 {offsets = [0, 96], sizes = [4, 32], strides = [1, 1]} : vector<4x128xf32> to vector<4x32xf32>
    %cst_236 = arith.constant 0.000000e+00 : f32
    %972 = vector.broadcast %cst_236 : f32 to vector<4x32xf32>
    %973 = arith.subf %972, %971 : vector<4x32xf32>
    %974 = math.exp %973 : vector<4x32xf32>
    %cst_237 = arith.constant 1.000000e+00 : f32
    %975 = vector.broadcast %cst_237 : f32 to vector<4x32xf32>
    %976 = arith.addf %975, %974 : vector<4x32xf32>
    %977 = tpu.reciprocal %976 : vector<4x32xf32> -> vector<4x32xf32>
    %978 = arith.mulf %968, %914 : vector<4x32xf32>
    %979 = arith.mulf %961, %970 : vector<4x32xf32>
    %980 = arith.addf %978, %979 : vector<4x32xf32>
    %981 = math.tanh %980 : vector<4x32xf32>
    %982 = arith.mulf %977, %981 : vector<4x32xf32>
    %983 = vector.extract_strided_slice %954 {offsets = [0, 0], sizes = [4, 32], strides = [1, 1]} : vector<4x128xf32> to vector<4x32xf32>
    %cst_238 = arith.constant 0.000000e+00 : f32
    %984 = vector.broadcast %cst_238 : f32 to vector<4x32xf32>
    %985 = arith.subf %984, %983 : vector<4x32xf32>
    %986 = math.exp %985 : vector<4x32xf32>
    %cst_239 = arith.constant 1.000000e+00 : f32
    %987 = vector.broadcast %cst_239 : f32 to vector<4x32xf32>
    %988 = arith.addf %987, %986 : vector<4x32xf32>
    %989 = tpu.reciprocal %988 : vector<4x32xf32> -> vector<4x32xf32>
    %990 = vector.extract_strided_slice %954 {offsets = [0, 32], sizes = [4, 32], strides = [1, 1]} : vector<4x128xf32> to vector<4x32xf32>
    %cst_240 = arith.constant 0.000000e+00 : f32
    %991 = vector.broadcast %cst_240 : f32 to vector<4x32xf32>
    %992 = arith.subf %991, %990 : vector<4x32xf32>
    %993 = math.exp %992 : vector<4x32xf32>
    %cst_241 = arith.constant 1.000000e+00 : f32
    %994 = vector.broadcast %cst_241 : f32 to vector<4x32xf32>
    %995 = arith.addf %994, %993 : vector<4x32xf32>
    %996 = tpu.reciprocal %995 : vector<4x32xf32> -> vector<4x32xf32>
    %997 = vector.extract_strided_slice %954 {offsets = [0, 64], sizes = [4, 32], strides = [1, 1]} : vector<4x128xf32> to vector<4x32xf32>
    %998 = math.tanh %997 : vector<4x32xf32>
    %999 = vector.extract_strided_slice %954 {offsets = [0, 96], sizes = [4, 32], strides = [1, 1]} : vector<4x128xf32> to vector<4x32xf32>
    %cst_242 = arith.constant 0.000000e+00 : f32
    %1000 = vector.broadcast %cst_242 : f32 to vector<4x32xf32>
    %1001 = arith.subf %1000, %999 : vector<4x32xf32>
    %1002 = math.exp %1001 : vector<4x32xf32>
    %cst_243 = arith.constant 1.000000e+00 : f32
    %1003 = vector.broadcast %cst_243 : f32 to vector<4x32xf32>
    %1004 = arith.addf %1003, %1002 : vector<4x32xf32>
    %1005 = tpu.reciprocal %1004 : vector<4x32xf32> -> vector<4x32xf32>
    %1006 = arith.mulf %996, %942 : vector<4x32xf32>
    %1007 = arith.mulf %989, %998 : vector<4x32xf32>
    %1008 = arith.addf %1006, %1007 : vector<4x32xf32>
    %1009 = math.tanh %1008 : vector<4x32xf32>
    %1010 = arith.mulf %1005, %1009 : vector<4x32xf32>
    %1011 = tpu.concatenate %982, %1010 in 1 : vector<4x32xf32>, vector<4x32xf32> -> vector<4x64xf32>
    %1012 = arith.addf %946, %1011 : vector<4x64xf32>
    %1013 = tpu.concatenate %982, %1010 in 1 : vector<4x32xf32>, vector<4x32xf32> -> vector<4x64xf32>
    %cst_244 = arith.constant dense<0.000000e+00> : vector<4x256xf32>
    %1014 = tpu.matmul %1013, %545, %cst_244 {dimension_numbers = #tpu.dot_dimension_numbers<[1], [0], [0], [1], [0, 0, 1, 1], [], []>} : vector<4x64xf32>, vector<64x256xf32>, vector<4x256xf32> -> vector<4x256xf32>
    %1015 = vector.extract_strided_slice %544 {offsets = [28, 0], sizes = [4, 128], strides = [1, 1]} : vector<32x256xf32> to vector<4x128xf32>
    %1016 = vector.extract_strided_slice %1014 {offsets = [0, 0], sizes = [4, 128], strides = [1, 1]} : vector<4x256xf32> to vector<4x128xf32>
    %1017 = arith.addf %1015, %1016 : vector<4x128xf32>
    %1018 = vector.extract_strided_slice %544 {offsets = [0, 128], sizes = [4, 128], strides = [1, 1]} : vector<32x256xf32> to vector<4x128xf32>
    %1019 = vector.extract_strided_slice %1014 {offsets = [0, 128], sizes = [4, 128], strides = [1, 1]} : vector<4x256xf32> to vector<4x128xf32>
    %1020 = arith.addf %1018, %1019 : vector<4x128xf32>
    %1021 = vector.extract_strided_slice %1017 {offsets = [0, 0], sizes = [4, 32], strides = [1, 1]} : vector<4x128xf32> to vector<4x32xf32>
    %cst_245 = arith.constant 0.000000e+00 : f32
    %1022 = vector.broadcast %cst_245 : f32 to vector<4x32xf32>
    %1023 = arith.subf %1022, %1021 : vector<4x32xf32>
    %1024 = math.exp %1023 : vector<4x32xf32>
    %cst_246 = arith.constant 1.000000e+00 : f32
    %1025 = vector.broadcast %cst_246 : f32 to vector<4x32xf32>
    %1026 = arith.addf %1025, %1024 : vector<4x32xf32>
    %1027 = tpu.reciprocal %1026 : vector<4x32xf32> -> vector<4x32xf32>
    %1028 = vector.extract_strided_slice %1017 {offsets = [0, 32], sizes = [4, 32], strides = [1, 1]} : vector<4x128xf32> to vector<4x32xf32>
    %cst_247 = arith.constant 0.000000e+00 : f32
    %1029 = vector.broadcast %cst_247 : f32 to vector<4x32xf32>
    %1030 = arith.subf %1029, %1028 : vector<4x32xf32>
    %1031 = math.exp %1030 : vector<4x32xf32>
    %cst_248 = arith.constant 1.000000e+00 : f32
    %1032 = vector.broadcast %cst_248 : f32 to vector<4x32xf32>
    %1033 = arith.addf %1032, %1031 : vector<4x32xf32>
    %1034 = tpu.reciprocal %1033 : vector<4x32xf32> -> vector<4x32xf32>
    %1035 = vector.extract_strided_slice %1017 {offsets = [0, 64], sizes = [4, 32], strides = [1, 1]} : vector<4x128xf32> to vector<4x32xf32>
    %1036 = math.tanh %1035 : vector<4x32xf32>
    %1037 = vector.extract_strided_slice %1017 {offsets = [0, 96], sizes = [4, 32], strides = [1, 1]} : vector<4x128xf32> to vector<4x32xf32>
    %cst_249 = arith.constant 0.000000e+00 : f32
    %1038 = vector.broadcast %cst_249 : f32 to vector<4x32xf32>
    %1039 = arith.subf %1038, %1037 : vector<4x32xf32>
    %1040 = math.exp %1039 : vector<4x32xf32>
    %cst_250 = arith.constant 1.000000e+00 : f32
    %1041 = vector.broadcast %cst_250 : f32 to vector<4x32xf32>
    %1042 = arith.addf %1041, %1040 : vector<4x32xf32>
    %1043 = tpu.reciprocal %1042 : vector<4x32xf32> -> vector<4x32xf32>
    %1044 = arith.mulf %1034, %980 : vector<4x32xf32>
    %1045 = arith.mulf %1027, %1036 : vector<4x32xf32>
    %1046 = arith.addf %1044, %1045 : vector<4x32xf32>
    %1047 = math.tanh %1046 : vector<4x32xf32>
    %1048 = arith.mulf %1043, %1047 : vector<4x32xf32>
    %1049 = vector.extract_strided_slice %1020 {offsets = [0, 0], sizes = [4, 32], strides = [1, 1]} : vector<4x128xf32> to vector<4x32xf32>
    %cst_251 = arith.constant 0.000000e+00 : f32
    %1050 = vector.broadcast %cst_251 : f32 to vector<4x32xf32>
    %1051 = arith.subf %1050, %1049 : vector<4x32xf32>
    %1052 = math.exp %1051 : vector<4x32xf32>
    %cst_252 = arith.constant 1.000000e+00 : f32
    %1053 = vector.broadcast %cst_252 : f32 to vector<4x32xf32>
    %1054 = arith.addf %1053, %1052 : vector<4x32xf32>
    %1055 = tpu.reciprocal %1054 : vector<4x32xf32> -> vector<4x32xf32>
    %1056 = vector.extract_strided_slice %1020 {offsets = [0, 32], sizes = [4, 32], strides = [1, 1]} : vector<4x128xf32> to vector<4x32xf32>
    %cst_253 = arith.constant 0.000000e+00 : f32
    %1057 = vector.broadcast %cst_253 : f32 to vector<4x32xf32>
    %1058 = arith.subf %1057, %1056 : vector<4x32xf32>
    %1059 = math.exp %1058 : vector<4x32xf32>
    %cst_254 = arith.constant 1.000000e+00 : f32
    %1060 = vector.broadcast %cst_254 : f32 to vector<4x32xf32>
    %1061 = arith.addf %1060, %1059 : vector<4x32xf32>
    %1062 = tpu.reciprocal %1061 : vector<4x32xf32> -> vector<4x32xf32>
    %1063 = vector.extract_strided_slice %1020 {offsets = [0, 64], sizes = [4, 32], strides = [1, 1]} : vector<4x128xf32> to vector<4x32xf32>
    %1064 = math.tanh %1063 : vector<4x32xf32>
    %1065 = vector.extract_strided_slice %1020 {offsets = [0, 96], sizes = [4, 32], strides = [1, 1]} : vector<4x128xf32> to vector<4x32xf32>
    %cst_255 = arith.constant 0.000000e+00 : f32
    %1066 = vector.broadcast %cst_255 : f32 to vector<4x32xf32>
    %1067 = arith.subf %1066, %1065 : vector<4x32xf32>
    %1068 = math.exp %1067 : vector<4x32xf32>
    %cst_256 = arith.constant 1.000000e+00 : f32
    %1069 = vector.broadcast %cst_256 : f32 to vector<4x32xf32>
    %1070 = arith.addf %1069, %1068 : vector<4x32xf32>
    %1071 = tpu.reciprocal %1070 : vector<4x32xf32> -> vector<4x32xf32>
    %1072 = arith.mulf %1062, %1008 : vector<4x32xf32>
    %1073 = arith.mulf %1055, %1064 : vector<4x32xf32>
    %1074 = arith.addf %1072, %1073 : vector<4x32xf32>
    %1075 = math.tanh %1074 : vector<4x32xf32>
    %1076 = arith.mulf %1071, %1075 : vector<4x32xf32>
    %1077 = tpu.concatenate %1048, %1076 in 1 : vector<4x32xf32>, vector<4x32xf32> -> vector<4x64xf32>
    %1078 = arith.addf %1012, %1077 : vector<4x64xf32>
    %cst_257 = arith.constant 1.250000e-01 : f32
    %1079 = vector.broadcast %cst_257 : f32 to vector<4x64xf32>
    %1080 = arith.mulf %1078, %1079 : vector<4x64xf32>
    %c0_258 = arith.constant 0 : index
    %c0_259 = arith.constant 0 : index
    %1081 = vector.load %arg8[%c0_258, %c0_259] : memref<64x32xf32, #tpu.memory_space<vmem>>, vector<64x32xf32>
    %cst_260 = arith.constant dense<0.000000e+00> : vector<4x32xf32>
    %1082 = tpu.matmul %1080, %1081, %cst_260 {dimension_numbers = #tpu.dot_dimension_numbers<[1], [0], [0], [1], [0, 0, 1, 1], [], []>} : vector<4x64xf32>, vector<64x32xf32>, vector<4x32xf32> -> vector<4x32xf32>
    %c0_261 = arith.constant 0 : index
    %c0_262 = arith.constant 0 : index
    %1083 = vector.load %arg9[%c0_261, %c0_262] : memref<1x32xf32, #tpu.memory_space<vmem>>, vector<1x32xf32>
    %1084 = vector.broadcast %1083 : vector<1x32xf32> to vector<4x32xf32>
    %1085 = arith.addf %1082, %1084 : vector<4x32xf32>
    %cst_263 = arith.constant 0.000000e+00 : f32
    %1086 = vector.broadcast %cst_263 : f32 to vector<4x32xf32>
    %1087 = arith.maximumf %1085, %1086 : vector<4x32xf32>
    %c0_264 = arith.constant 0 : index
    %c0_265 = arith.constant 0 : index
    %1088 = vector.load %arg10[%c0_264, %c0_265] : memref<32x8xf32, #tpu.memory_space<vmem>>, vector<32x8xf32>
    %cst_266 = arith.constant dense<0.000000e+00> : vector<4x8xf32>
    %1089 = tpu.matmul %1087, %1088, %cst_266 {dimension_numbers = #tpu.dot_dimension_numbers<[1], [0], [0], [1], [0, 0, 1, 1], [], []>} : vector<4x32xf32>, vector<32x8xf32>, vector<4x8xf32> -> vector<4x8xf32>
    %c0_267 = arith.constant 0 : index
    %c0_268 = arith.constant 0 : index
    %1090 = vector.load %arg11[%c0_267, %c0_268] : memref<1x8xf32, #tpu.memory_space<vmem>>, vector<1x8xf32>
    %1091 = vector.broadcast %1090 : vector<1x8xf32> to vector<4x8xf32>
    %1092 = arith.addf %1089, %1091 : vector<4x8xf32>
    %c0_269 = arith.constant 0 : index
    %c0_270 = arith.constant 0 : index
    %1093 = vector.load %arg12[%c0_269, %c0_270] : memref<4x8xf32, #tpu.memory_space<vmem>>, vector<4x8xf32>
    tpu.vector_store %arg12[%c0_269, %c0_270], %1092 {strides = array<i32>} : memref<4x8xf32, #tpu.memory_space<vmem>>, vector<4x8xf32>,
    return
  }
  func.func @transform_0(%arg0: i32) -> (i32, i32) {
    %c0_i32 = arith.constant 0 : i32
    %c0_i32_0 = arith.constant 0 : i32
    %c0_i32_1 = arith.constant 0 : i32
    return %c0_i32, %c0_i32_0 : i32, i32
  }
  func.func @transform_1(%arg0: i32) -> (i32, i32) {
    %c0_i32 = arith.constant 0 : i32
    %c0_i32_0 = arith.constant 0 : i32
    %c0_i32_1 = arith.constant 0 : i32
    return %c0_i32, %c0_i32_0 : i32, i32
  }
  func.func @transform_2(%arg0: i32) -> (i32, i32) {
    %c0_i32 = arith.constant 0 : i32
    %c0_i32_0 = arith.constant 0 : i32
    %c0_i32_1 = arith.constant 0 : i32
    return %c0_i32, %c0_i32_0 : i32, i32
  }
  func.func @transform_3(%arg0: i32) -> (i32, i32) {
    %c0_i32 = arith.constant 0 : i32
    %c0_i32_0 = arith.constant 0 : i32
    %c0_i32_1 = arith.constant 0 : i32
    return %c0_i32, %c0_i32_0 : i32, i32
  }
  func.func @transform_4(%arg0: i32) -> (i32, i32) {
    %c0_i32 = arith.constant 0 : i32
    %c0_i32_0 = arith.constant 0 : i32
    %c0_i32_1 = arith.constant 0 : i32
    return %c0_i32, %c0_i32_0 : i32, i32
  }
  func.func @transform_5(%arg0: i32) -> (i32, i32) {
    %c0_i32 = arith.constant 0 : i32
    %c0_i32_0 = arith.constant 0 : i32
    %c0_i32_1 = arith.constant 0 : i32
    return %c0_i32, %c0_i32_0 : i32, i32
  }
  func.func @transform_6(%arg0: i32) -> (i32, i32) {
    %c0_i32 = arith.constant 0 : i32
    %c0_i32_0 = arith.constant 0 : i32
    %c0_i32_1 = arith.constant 0 : i32
    return %c0_i32, %c0_i32_0 : i32, i32
  }
  func.func @transform_7(%arg0: i32) -> (i32, i32) {
    %c0_i32 = arith.constant 0 : i32
    %c0_i32_0 = arith.constant 0 : i32
    %c0_i32_1 = arith.constant 0 : i32
    return %c0_i32, %c0_i32_0 : i32, i32
  }
  func.func @transform_8(%arg0: i32) -> (i32, i32) {
    %c0_i32 = arith.constant 0 : i32
    %c0_i32_0 = arith.constant 0 : i32
    %c0_i32_1 = arith.constant 0 : i32
    return %c0_i32, %c0_i32_0 : i32, i32
  }
  func.func @transform_9(%arg0: i32) -> (i32, i32) {
    %c0_i32 = arith.constant 0 : i32
    %c0_i32_0 = arith.constant 0 : i32
    %c0_i32_1 = arith.constant 0 : i32
    return %c0_i32, %c0_i32_0 : i32, i32
  }
  func.func @transform_10(%arg0: i32) -> (i32, i32) {
    %c0_i32 = arith.constant 0 : i32
    %c0_i32_0 = arith.constant 0 : i32
    %c0_i32_1 = arith.constant 0 : i32
    return %c0_i32, %c0_i32_0 : i32, i32
  }
  func.func @transform_11(%arg0: i32) -> (i32, i32) {
    %c0_i32 = arith.constant 0 : i32
    %c0_i32_0 = arith.constant 0 : i32
    %c0_i32_1 = arith.constant 0 : i32
    return %c0_i32, %c0_i32_0 : i32, i32
  }
}

</mosaic_0001>

<bundles_post_ra>
// kernel: bilstm_forward.1
= control target key start
LH: loop header
LB: loop body
LE: loop exit
PB: predicated region body
PF: predicated region fallthrough
CT: control target
= control target key end

     0   :  { %16 = vsyncpa [#allocation4], 0  ;;  %s4539_s0 = inlined_call_operand.vmem [shape: f32[32,128], index: 0, kind: input, shape index: {}]   ;;  %s4540_s1 = inlined_call_operand.vmem [shape: f32[128,256], index: 1, kind: input, shape index: {}]   ;;  %s4541_s2 = inlined_call_operand.vmem [shape: f32[64,256], index: 2, kind: input, shape index: {}]   ;;  %s4542_s3 = inlined_call_operand.vmem [shape: f32[1,256], index: 3, kind: input, shape index: {}]   ;;  %s4543_s4 = inlined_call_operand.hbm [shape: f32[64,256], index: 4, kind: input, shape index: {}]   ;;  %s4544_s5 = inlined_call_operand.hbm [shape: f32[64,256], index: 5, kind: input, shape index: {}]   ;;  %s4545_s6 = inlined_call_operand.vmem [shape: f32[1,256], index: 6, kind: input, shape index: {}]   ;;  %s4546_s7 = inlined_call_operand.hbm [shape: f32[64,32], index: 7, kind: input, shape index: {}]   ;;  %s4547_s8 = inlined_call_operand.vmem [shape: f32[1,32], index: 8, kind: input, shape index: {}]   ;;  %s4548_s9 = inlined_call_operand.hbm [shape: f32[32,8], index: 9, kind: input, shape index: {}]   ;;  %s4549_s10 = inlined_call_operand.vmem [shape: f32[1,8], index: 10, kind: input, shape index: {}]   ;;  %s4550_s11 = inlined_call_operand.hbm [shape: f32[4,8], index: 11, kind: output, shape index: {}]  }
   0x1   :  { %17 = vsyncpa [#allocation7], 0 }
   0x2   :  { %18 = vsyncpa [#allocation10], 0 }
   0x3   :  { %19 = vsyncpa [#allocation5], 0  ;;  %s3667_s17 = smov [#allocation6]   ;;  %s3668_s19 = smov [#allocation3]  }
   0x4   :  { %s45_s18 = sshll.u32 %s3667_s17, 4  ;;  %s33_s20 = sshll.u32 %s3668_s19, 4  ;;  %s46_s18 = int_to_ptr.vmem [resolvable:$true] %s45_s18  ;;  %s3741_s20 = int_to_ptr.vmem [resolvable:$true] %s33_s20 }
   0x5   :  { %s3549_s23 = scalar_lea.hbm %s4544_s5, 2048 }
   0x6   :  { %p3550_p0 = scmp.ne.s32.totalorder %s4544_s5, %s3549_s23  ;;  %p3553_p1 = scmp.lt.u32.totalorder %s3549_s23, %s4544_s5 }
   0x8   :  { %p3555_p2 = pnand %p3553_p1, %p3550_p0 }
   0xa   :  { %3558 = shalt.err (!%p3555_p2)
}
   0xb   :  { %s3559_s28 = scalar_lea.vmem %s46_s18, 2048  ;;  %p3564_p4 = scmp.lt.s32.totalorder %s46_s18, %s46_s18 }
   0xc   :  { %p3560_p3 = scmp.ne.s32.totalorder %s46_s18, %s3559_s28  ;;  %p3565_p5 = scmp.lt.s32.totalorder %s3559_s28, %s3559_s28 }
   0xe   :  { %p3566_p6 = por %p3565_p5, %p3564_p4 }
  0x10   :  { %p3567_p7 = pnand %p3566_p6, %p3560_p3 }
  0x12   :  { %3570 = shalt.err (!%p3567_p7)
}
  0x13   :  { %s3669_s29 = smov 256   ;;  %s3670_s30 = smov 16  }
  0x14   :  { %51 = dma.hbm_to_vmem [thread:$0]  %s4544_s5, 2048, %s46_s18, [#allocation7], %s3669_s29, %s3669_s29, %s3670_s30  }
  0x15   :  { %s3571_s16 = scalar_lea.hbm %s4543_s4, 2048 }
  0x16   :  { %p3572_p8 = scmp.ne.s32.totalorder %s4543_s4, %s3571_s16  ;;  %p3575_p9 = scmp.lt.u32.totalorder %s3571_s16, %s4543_s4 }
  0x18   :  { %p3577_p10 = pnand %p3575_p9, %p3572_p8 }
  0x1a   :  { %3580 = shalt.err (!%p3577_p10)
}
  0x1b   :  { %s3581_s23 = scalar_lea.vmem %s3741_s20, 2048  ;;  %p3586_p12 = scmp.lt.s32.totalorder %s3741_s20, %s3741_s20 }
  0x1c   :  { %p3582_p11 = scmp.ne.s32.totalorder %s3741_s20, %s3581_s23  ;;  %p3587_p13 = scmp.lt.s32.totalorder %s3581_s23, %s3581_s23 }
  0x1e   :  { %p3588_p0 = por %p3587_p13, %p3586_p12 }
  0x20   :  { %p3589_p1 = pnand %p3588_p0, %p3582_p11 }
  0x22   :  { %3592 = shalt.err (!%p3589_p1)
}
  0x23   :  { %39 = dma.hbm_to_vmem [thread:$0]  %s4543_s4, 2048, %s3741_s20, [#allocation4], %s3669_s29, %s3669_s29, %s3670_s30  }
  0x24   :  { %s3671_s24 = smov [#allocation8]   ;;  %s3593_s28 = scalar_lea.hbm %s4546_s7, 1024 }
  0x25   :  { %s59_s25 = sshll.u32 %s3671_s24, 4  ;;  %p3594_p2 = scmp.ne.s32.totalorder %s4546_s7, %s3593_s28  ;;  %s60_s25 = int_to_ptr.vmem [resolvable:$true] %s59_s25 }
  0x26   :  { %p3597_p3 = scmp.lt.u32.totalorder %s3593_s28, %s4546_s7 }
  0x28   :  { %p3599_p4 = pnand %p3597_p3, %p3594_p2 }
  0x2a   :  { %3602 = shalt.err (!%p3599_p4)
}
  0x2b   :  { %s3603_s16 = scalar_lea.vmem %s60_s25, 1024  ;;  %p3608_p6 = scmp.lt.s32.totalorder %s60_s25, %s60_s25 }
  0x2c   :  { %p3604_p5 = scmp.ne.s32.totalorder %s60_s25, %s3603_s16  ;;  %p3609_p7 = scmp.lt.s32.totalorder %s3603_s16, %s3603_s16 }
  0x2e   :  { %p3610_p8 = por %p3609_p7, %p3608_p6 }
  0x30   :  { %p3611_p9 = pnand %p3610_p8, %p3604_p5 }
  0x32   :  { %3614 = shalt.err (!%p3611_p9)
}
  0x33   :  { %s3672_s4 = smov 128   ;;  %s3673_s20 = smov 8  }
  0x34   :  { %65 = dma.hbm_to_vmem [thread:$0]  %s4546_s7, 1024, %s60_s25, [#allocation7], %s3672_s4, %s3672_s4, %s3673_s20  }
  0x35   :  { %s3674_s17 = smov [#allocation9]   ;;  %s3615_s23 = scalar_lea.hbm %s4548_s9, 512 }
  0x36   :  { %s73_s19 = sshll.u32 %s3674_s17, 4  ;;  %p3616_p10 = scmp.ne.s32.totalorder %s4548_s9, %s3615_s23  ;;  %s74_s19 = int_to_ptr.vmem [resolvable:$true] %s73_s19 }
  0x37   :  { %p3619_p11 = scmp.lt.u32.totalorder %s3615_s23, %s4548_s9 }
  0x39   :  { %p3621_p12 = pnand %p3619_p11, %p3616_p10 }
  0x3b   :  { %3624 = shalt.err (!%p3621_p12)
}
  0x3c   :  { %s3625_s27 = scalar_lea.vmem %s74_s19, 512  ;;  %p3630_p0 = scmp.lt.s32.totalorder %s74_s19, %s74_s19 }
  0x3d   :  { %p3626_p13 = scmp.ne.s32.totalorder %s74_s19, %s3625_s27  ;;  %p3631_p1 = scmp.lt.s32.totalorder %s3625_s27, %s3625_s27 }
  0x3f   :  { %p3632_p2 = por %p3631_p1, %p3630_p0 }
  0x41   :  { %p3633_p3 = pnand %p3632_p2, %p3626_p13 }
  0x43   :  { %3636 = shalt.err (!%p3633_p3)
}
  0x44   :  { %79 = dma.hbm_to_vmem [thread:$0]  %s4548_s9, 512, %s74_s19, [#allocation10], %s3672_s4, %s3672_s4, %s3673_s20  }
  0x45   :  { %3659 = dma.done.wait [#allocation4], 2048  }
  0x46   :  { %3660 = vsyncadd [#allocation4], 4294965248 }
  0x47   :  { %3661 = dma.done.wait [#allocation7], 3072  }
  0x48   :  { %3662 = vsyncadd [#allocation7], 4294964224 }
  0x49   :  { %3663 = dma.done.wait [#allocation10], 512  }
  0x4a   :  { %3664 = vsyncadd [#allocation10], 4294966784  ;;  %v3675_v0 = vmov 0.0   ;;  %v99_v1 = vld [vmem:[%s4540_s1 + $0x8] sm:$0xff]  ;;  %v101_v2 = vld [vmem:[%s4540_s1 + $0x18] sm:$0xff]  ;;  %s3677_s17 = smov 32  }
  0x4b   :  { %206 = vmatprep.mubr.f32.mxu0 %v3675_v0  ;;  %315 = vmatprep.mubr.f32.mxu1 %v3675_v0  ;;  %v98_v3 = vld [vmem:[%s4540_s1] sm:$0xff]  ;;  %v2957_v4 = vpack.c.bf16 %v101_v2, %v99_v1  ;;  %v100_v5 = vld [vmem:[%s4540_s1 + $0x10] sm:$0xff]  ;;  %v103_v6 = vld [vmem:[%s4540_s1 + $0x28] sm:$0xff]  ;;  %vm377_vm0 = vcmask 257024   ;;  %vm389_vm1 = vcmask 261120   ;;  %vm247_vm2 = vcmask 523264  }
  0x4c   :  { %v105_v7 = vld [vmem:[%s4540_s1 + $0x38] sm:$0xff]  ;;  %v2959_v8 = vpack.c.bf16 %v100_v5, %v98_v3  ;;  %v102_v10 = vld [vmem:[%s4540_s1 + $0x20] sm:$0xff]  ;;  %v104_v11 = vld [vmem:[%s4540_s1 + $0x30] sm:$0xff]  ;;  %vm526_vm3 = vcmask 261124   ;;  %vm383_vm4 = vcmask 523524   ;;  %vm532_vm5 = vcmask 519424  }
  0x4d   :  { %v2961_v9 = vpack.c.bf16 %v105_v7, %v103_v6  ;;  %v107_v12 = vld [vmem:[%s4540_s1 + $0x48] sm:$0xff]  ;;  %2958 = vmatprep.subr.bf16.mxu0 %v2957_v4  ;;  %v109_v13 = vld [vmem:[%s4540_s1 + $0x58] sm:$0xff]  ;;  %v2963_v14 = vpack.c.bf16 %v104_v11, %v102_v10  ;;  %v106_v16 = vld [vmem:[%s4540_s1 + $0x40] sm:$0xff]  ;;  %vm3679_vm6 = vmmov 0   ;;  %s3680_s5 = smov [#allocation11]   ;;  %vm2872_vm7 = vcmask 60416  }
  0x4e   :  { %2960 = vmatpush1.bf16.msra.mxu0 %v2959_v8  ;;  %v2965_v15 = vpack.c.bf16 %v109_v13, %v107_v12  ;;  %v108_v17 = vld [vmem:[%s4540_s1 + $0x50] sm:$0xff]  ;;  %v111_v18 = vld [vmem:[%s4540_s1 + $0x68] sm:$0xff]  ;;  %v113_v19 = vld [vmem:[%s4540_s1 + $0x78] sm:$0xff]  ;;  %s2880_s18 = sshll.u32 %s3680_s5, 4  ;;  %s2881_s18 = int_to_ptr.vmem [resolvable:$true] %s2880_s18 }
  0x4f   :  { %2962 = vmatprep.subr.bf16.mxu0 %v2961_v9  ;;  %v232_v20 = vld [vmem:[%s4541_s2 + $0x8] sm:$0xff]  ;;  %v234_v21 = vld [vmem:[%s4541_s2 + $0x18] sm:$0xff]  ;;  %v231_v22 = vld [vmem:[%s4541_s2] sm:$0xff]  ;;  %v2967_v24 = vpack.c.bf16 %v108_v17, %v106_v16  ;;  %v2969_v29 = vpack.c.bf16 %v113_v19, %v111_v18  ;;  %s3637_s24 = scalar_lea.vmem %s2881_s18, 64  ;;  %p3642_p5 = scmp.lt.s32.totalorder %s2881_s18, %s2881_s18 }
  0x50   :  { %v233_v23 = vld [vmem:[%s4541_s2 + $0x10] sm:$0xff]  ;;  %v110_v25 = vld [vmem:[%s4540_s1 + $0x60] sm:$0xff]  ;;  %v3858_v27 = vpack.c.bf16 %v234_v21, %v232_v20  ;;  %v115_v30 = vld [vmem:[%s4540_s1 + $0x88] sm:$0xff]  ;;  %p3638_p4 = scmp.ne.s32.totalorder %s2881_s18, %s3637_s24  ;;  %p3643_p6 = scmp.lt.s32.totalorder %s3637_s24, %s3637_s24 }
  0x51   :  { %v112_v26 = vld [vmem:[%s4540_s1 + $0x70] sm:$0xff]  ;;  %v3860_v28 = vpack.c.bf16 %v233_v23, %v231_v22  ;;  %v236_v31 = vld [vmem:[%s4541_s2 + $0x28] sm:$0xff]  ;;  %v238_v32 = vld [vmem:[%s4541_s2 + $0x38] sm:$0xff] }
  0x52   :  { %2964 = vmatpush1.bf16.msra.mxu0 %v2963_v14  ;;  %v117_v33 = vld [vmem:[%s4540_s1 + $0x98] sm:$0xff]  ;;  %2990 = vmatprep.subr.bf16.mxu1 %v3858_v27  ;;  %v3875_v34 = vpack.c.bf16 %v238_v32, %v236_v31  ;;  %v235_v35 = vld [vmem:[%s4541_s2 + $0x20] sm:$0xff]  ;;  %v237_v36 = vld [vmem:[%s4541_s2 + $0x30] sm:$0xff]  ;;  %v2971_v38 = vpack.c.bf16 %v112_v26, %v110_v25  ;;  %v132_v14 = vlaneseq  ;;  %p3644_p7 = por %p3643_p6, %p3642_p5 }
  0x53   :  { %2966 = vmatprep.subr.bf16.mxu0 %v2965_v15  ;;  %2992 = vmatpush1.bf16.msra.mxu1 %v3860_v28  ;;  %v3884_v37 = vpack.c.bf16 %v237_v36, %v235_v35  ;;  %v240_v39 = vld [vmem:[%s4541_s2 + $0x48] sm:$0xff]  ;;  %v242_v40 = vld [vmem:[%s4541_s2 + $0x58] sm:$0xff]  ;;  %v239_v41 = vld [vmem:[%s4541_s2 + $0x40] sm:$0xff]  ;;  %v2973_v42 = vpack.c.bf16 %v117_v33, %v115_v30 }
  0x54   :  { %2994 = vmatprep.subr.bf16.mxu1 %v3875_v34  ;;  %v114_v43 = vld [vmem:[%s4540_s1 + $0x80] sm:$0xff]  ;;  %v116_v44 = vld [vmem:[%s4540_s1 + $0x90] sm:$0xff]  ;;  %v3902_v45 = vpack.c.bf16 %v242_v40, %v240_v39  ;;  %v119_v47 = vld [vmem:[%s4540_s1 + $0xa8] sm:$0xff]  ;;  %v4002_v15 = vshrl.u32 %v132_v14, 7  ;;  %p3645_p8 = pnand %p3644_p7, %p3638_p4 }
  0x55   :  { %v241_v46 = vld [vmem:[%s4541_s2 + $0x50] sm:$0xff]  ;;  %v121_v48 = vld [vmem:[%s4540_s1 + $0xb8] sm:$0xff]  ;;  %v244_v49 = vld [vmem:[%s4541_s2 + $0x68] sm:$0xff]  ;;  %v2975_v52 = vpack.c.bf16 %v116_v44, %v114_v43 }
  0x56   :  { %2968 = vmatpush1.bf16.msra.mxu0 %v2967_v24  ;;  %v3917_v50 = vpack.c.bf16 %v241_v46, %v239_v41  ;;  %v246_v51 = vld [vmem:[%s4541_s2 + $0x78] sm:$0xff]  ;;  %v243_v54 = vld [vmem:[%s4541_s2 + $0x60] sm:$0xff]  ;;  %v245_v55 = vld [vmem:[%s4541_s2 + $0x70] sm:$0xff]  ;;  %v2977_v56 = vpack.c.bf16 %v121_v48, %v119_v47  ;;  %v138_v18 = vsub.s32 1, %v4002_v15  ;;  %v134_v21 = vsub.s32 0, %v4002_v15 }
  0x57   :  { %2970 = vmatprep.subr.bf16.mxu0 %v2969_v29  ;;  %2996 = vmatpush1.bf16.msra.mxu1 %v3884_v37  ;;  %v3923_v53 = vpack.c.bf16 %v246_v51, %v244_v49  ;;  %v118_v57 = vld [vmem:[%s4540_s1 + $0xa0] sm:$0xff]  ;;  %v120_v58 = vld [vmem:[%s4540_s1 + $0xb0] sm:$0xff]  ;;  %v123_v59 = vld [vmem:[%s4540_s1 + $0xc8] sm:$0xff]  ;;  %v3944_v61 = vpack.c.bf16 %v245_v55, %v243_v54 }
  0x58   :  { %2998 = vmatprep.subr.bf16.mxu1 %v3902_v45  ;;  %v125_v60 = vld [vmem:[%s4540_s1 + $0xd8] sm:$0xff]  ;;  %v2979_v62 = vpack.c.bf16 %v120_v58, %v118_v57  ;;  %v122_v1 = vld [vmem:[%s4540_s1 + $0xc0] sm:$0xff]  ;;  %v124_v2 = vld [vmem:[%s4540_s1 + $0xd0] sm:$0xff] }
  0x59   :  { %v2981_v63 = vpack.c.bf16 %v125_v60, %v123_v59  ;;  %v127_v3 = vld [vmem:[%s4540_s1 + $0xe8] sm:$0xff]  ;;  %v129_v4 = vld [vmem:[%s4540_s1 + $0xf8] sm:$0xff]  ;;  %v2983_v5 = vpack.c.bf16 %v124_v2, %v122_v1  ;;  %v126_v7 = vld [vmem:[%s4540_s1 + $0xe0] sm:$0xff] }
  0x5a   :  { %2972 = vmatpush1.bf16.msra.mxu0 %v2971_v38  ;;  %v2985_v6 = vpack.c.bf16 %v129_v4, %v127_v3  ;;  %v128_v8 = vld [vmem:[%s4540_s1 + $0xf0] sm:$0xff]  ;;  %v94_v10 = vld [vmem:[%s4539_s0] sm:$0xff]  ;;  %v95_v11 = vld [vmem:[%s4539_s0 + $0x8] sm:$0xff] }
  0x5b   :  { %2974 = vmatprep.subr.bf16.mxu0 %v2973_v42  ;;  %3000 = vmatpush1.bf16.msra.mxu1 %v3917_v50  ;;  %v2987_v9 = vpack.c.bf16 %v128_v8, %v126_v7  ;;  %v96_v12 = vld [vmem:[%s4539_s0 + $0x10] sm:$0xff]  ;;  %v97_v13 = vld [vmem:[%s4539_s0 + $0x18] sm:$0xff]  ;;  %v130_v19 = vld [vmem:[%s4542_s3] sm:$0x3]  ;;  %s3676_s3 = smov 64  }
  0x5c   :  { %3002 = vmatprep.subr.bf16.mxu1 %v3923_v53  ;;  %v139_v20 = vrot.slane %v130_v19, %v138_v18  ;;  %v135_v25 = vrot.slane %v130_v19, %v134_v21 }
  0x5e   :  { %2976 = vmatpush1.bf16.msra.mxu0 %v2975_v52 }
  0x5f   :  { %2978 = vmatprep.subr.bf16.mxu0 %v2977_v56  ;;  %3004 = vmatpush1.bf16.msra.mxu1 %v3944_v61 }
  0x60   :  { %3006 = vmatprep.subr.bf16.mxu1 %v3858_v27 }
  0x62   :  { %2980 = vmatpush1.bf16.msra.mxu0 %v2979_v62  ;;  %316 = vmatmul.mubr.f32.vlgmr.msra.gmra.mrb[0].mxu1 %v3675_v0 }
  0x63   :  { %2982 = vmatprep.subr.bf16.mxu0 %v2981_v63  ;;  %3008 = vmatpush1.bf16.msra.mxu1 %v3860_v28 }
  0x64   :  { %458 = vmatprep.mubr.f32.mxu1 %v3675_v0  ;;  %3010 = vmatprep.subr.bf16.mxu1 %v3875_v34 }
  0x66   :  { %2984 = vmatpush1.bf16.msra.mxu0 %v2983_v5 }
  0x67   :  { %2986 = vmatprep.subr.bf16.mxu0 %v2985_v6  ;;  %3012 = vmatpush1.bf16.msra.mxu1 %v3884_v37 }
  0x68   :  { %3014 = vmatprep.subr.bf16.mxu1 %v3902_v45 }
  0x6a   :  { %2988 = vmatpush1.bf16.msra.mxu0 %v2987_v9 }
  0x6b   :  { %3022 = vmatprep.subr.bf16.mxu0 %v3858_v27  ;;  %3016 = vmatpush1.bf16.msra.mxu1 %v3917_v50 }
  0x6c   :  { %3018 = vmatprep.subr.bf16.mxu1 %v3923_v53 }
  0x6d   :  { %207 = vmatmul.mubr.f32.vlgmr.msra.gmra.mrb[0].mxu0 %v94_v10 }
  0x6e   :  { %212 = vmatprep.mubr.f32.mxu0 %v3675_v0  ;;  %3024 = vmatpush1.bf16.msra.mxu0 %v3860_v28 }
  0x6f   :  { %3026 = vmatprep.subr.bf16.mxu0 %v3875_v34  ;;  %3020 = vmatpush1.bf16.msra.mxu1 %v3944_v61 }
  0x70   :  { %3038 = vmatprep.subr.bf16.mxu1 %v3858_v27 }
  0x71   :  { %213 = vmatmul.mubr.f32.gmra.mrb[2].mxu0 %v95_v11 }
  0x72   :  { %218 = vmatprep.mubr.f32.mxu0 %v3675_v0  ;;  %3028 = vmatpush1.bf16.msra.mxu0 %v3884_v37 }
  0x73   :  { %3030 = vmatprep.subr.bf16.mxu0 %v3902_v45 }
  0x75   :  { %219 = vmatmul.mubr.f32.gmra.mrb[4].mxu0 %v96_v12 }
  0x76   :  { %224 = vmatprep.mubr.f32.mxu0 %v3675_v0  ;;  %3032 = vmatpush1.bf16.msra.mxu0 %v3917_v50 }
  0x77   :  { %3034 = vmatprep.subr.bf16.mxu0 %v3923_v53 }
  0x79   :  { %225 = vmatmul.mubr.f32.gmra.mrb[6].mxu0 %v97_v13 }
  0x7a   :  { %607 = vmatprep.mubr.f32.mxu0 %v3675_v0  ;;  %3036 = vmatpush1.bf16.msra.mxu0 %v3944_v61 }
  0x7b   :  { %3054 = vmatprep.subr.bf16.mxu0 %v3858_v27 }
 0x135   :  { %v317_v16 = vpop.f32.mrb[0].mxu1 }
 0x136   :  { %v319_v17 = vpop.f32.mrb[1].mxu1 }
 0x137   :  { %v324_v39 = vrot.slane %v319_v17, 4 }
 0x140   :  { %v208_v22 = vpop.f32.mrb[0].mxu0 }
 0x141   :  { %v210_v23 = vpop.f32.mrb[1].mxu0  ;;  %v4025_v42 = vadd.f32 %v208_v22, %v135_v25 }
 0x142   :  { %v4011_v24 = vadd.f32 %v210_v23, %v139_v20 }
 0x143   :  { %v322_v46 = vadd.f32 %v317_v16, %v4025_v42 }
 0x144   :  { %v214_v26 = vpop.f32.mrb[2].mxu0 }
 0x145   :  { %v4015_v29 = vadd.f32 %v214_v26, %v135_v25  ;;  %v216_v30 = vpop.f32.mrb[3].mxu0  ;;  %v327_v51 = vsub.f32 0.0, %v322_v46 }
 0x146   :  { %v4017_v31 = vadd.f32 %v216_v30, %v139_v20 }
 0x147   :  { %v328_v54 = vmul.f32 1.442695, %v327_v51 }
 0x148   :  { %v220_v32 = vpop.f32.mrb[4].mxu0 }
 0x149   :  { %v4019_v33 = vadd.f32 %v220_v32, %v135_v25  ;;  %v222_v35 = vpop.f32.mrb[5].mxu0 }
 0x14a   :  { %v4021_v36 = vadd.f32 %v222_v35, %v139_v20 }
 0x14c   :  { %v226_v38 = vpop.f32.mrb[6].mxu0 }
 0x14d   :  { %v4023_v40 = vadd.f32 %v226_v38, %v135_v25  ;;  %v228_v41 = vpop.f32.mrb[7].mxu0 }
 0x14e   :  { %v4027_v43 = vadd.f32 %v228_v41, %v139_v20 }
 0x150   :  { %v326_v44 = vadd.f32 %v324_v39, %v4027_v43 }
 0x152   :  { %3293 = vtanh.f32 %v326_v44  ;;  %v350_v49 = vsub.f32 0.0, %v326_v44 }
 0x153   :  { %3295 = vtanh.f32 %v322_v46 }
 0x154   :  { %v351_v52 = vmul.f32 1.442695, %v350_v49 }
 0x156   :  { %3297 = vpow2.f32 %v351_v52 }
 0x157   :  { %3299 = vpow2.f32 %v328_v54 }
 0x15c   :  { %v3294_v47 = vpop.eup %3293 }
 0x15d   :  { %358 = vrot.lane.b32.xlu0 %v3294_v47, %s3676_s3  ;;  %v3296_v48 = vpop.eup %3295 }
 0x160   :  { %v3298_v55 = vpop.eup %3297 }
 0x161   :  { %335 = vrot.lane.b32.xlu0 %v3296_v48, %s3676_s3  ;;  %v353_v56 = vadd.f32 1.0, %v3298_v55  ;;  %v3300_v57 = vpop.eup %3299 }
 0x162   :  { %v330_v58 = vadd.f32 1.0, %v3300_v57 }
 0x163   :  { %3301 = vrcp.f32 %v353_v56 }
 0x164   :  { %3303 = vrcp.f32 %v330_v58 }
 0x16d   :  { %v3302_v59 = vpop.eup %3301 }
 0x16e   :  { %v3304_v63 = vpop.eup %3303  ;;  %v356_v3 = vmul.f32 0.0, %v3302_v59 }
 0x16f   :  { %v333_v6 = vmul.f32 0.0, %v3304_v63 }
 0x1cf   :  { %v359_v60 = vpop.permute.xlu0 %358 }
 0x1d0   :  { %v361_v62 = vmul.f32 %v3302_v59, %v359_v60 }
 0x1d2   :  { %363 = vrot.lane.b32.xlu1 %v361_v62, %s3677_s17 }
 0x1d3   :  { %v336_v1 = vpop.permute.xlu0 %335 }
 0x1d4   :  { %v338_v2 = vmul.f32 %v3304_v63, %v336_v1 }
 0x1d6   :  { %340 = vrot.lane.b32.xlu1 %v338_v2, %s3677_s17 }
 0x244   :  { %v364_v4 = vpop.permute.xlu1 %363 }
 0x245   :  { %v4035_v5 = vadd.f32 %v364_v4, %v356_v3 }
 0x247   :  { %3305 = vtanh.f32 %v4035_v5  ;;  %v503_v56 = vrot.slane %v4035_v5, 4 }
 0x248   :  { %v341_v7 = vpop.permute.xlu1 %340 }
 0x249   :  { %v4038_v8 = vadd.f32 %v341_v7, %v333_v6 }
 0x24b   :  { %3307 = vtanh.f32 %v4038_v8  ;;  %v477_v57 = vrot.slane %v4038_v8, 4 }
 0x251   :  { %v3306_v9 = vpop.eup %3305 }
 0x252   :  { %369 = vrot.lane.b32.xlu0 %v3306_v9, %s3676_s3 }
 0x255   :  { %v3308_v10 = vpop.eup %3307 }
 0x256   :  { %346 = vrot.lane.b32.xlu1 %v3308_v10, %s3676_s3 }
 0x2c4   :  { %v370_v11 = vpop.permute.xlu0 %369 }
 0x2c5   :  { %v4043_v12 = vmul.f32 %v3302_v59, %v370_v11 }
 0x2c7   :  { %v385_v13 = vrot.slane %v4043_v12, 4 }
 0x2c8   :  { %v347_v14 = vpop.permute.xlu1 %346 }
 0x2c9   :  { %v349_v16 = vmul.f32 %v3304_v63, %v347_v14  ;;  %386 = vrot.lane.b32.xlu1 %v385_v13, %s3676_s3 }
 0x2cb   :  { %374 = vrot.lane.b32.xlu0 %v349_v16, %s3677_s17 }
 0x33b   :  { %v387_v17 = vpop.permute.xlu1 %386 }
 0x33d   :  { %v375_v19 = vpop.permute.xlu0 %374 }
 0x33e   :  { %378 = vst.msk [vmem:[#allocation2] sm:$0xf] %vm377_vm0, %v375_v19  ;;  %v390_v20 = vsel %vm389_vm1, %v375_v19, %v387_v17 }
 0x33f   :  { %2891 = vmatmul.mubr.msk.f32.vlgmr.msra.gmra.mrb[2].mxu1 %vm247_vm2, %v390_v20 }
 0x340   :  { %3040 = vmatpush1.bf16.msra.mxu1 %v3860_v28  ;;  %753 = vmatprep.mubr.f32.mxu1 %v3675_v0 }
 0x341   :  { %3042 = vmatprep.subr.bf16.mxu1 %v3875_v34 }
 0x344   :  { %3044 = vmatpush1.bf16.msra.mxu1 %v3884_v37 }
 0x345   :  { %3046 = vmatprep.subr.bf16.mxu1 %v3902_v45 }
 0x348   :  { %3048 = vmatpush1.bf16.msra.mxu1 %v3917_v50 }
 0x349   :  { %3050 = vmatprep.subr.bf16.mxu1 %v3923_v53 }
 0x34c   :  { %3052 = vmatpush1.bf16.msra.mxu1 %v3944_v61 }
 0x34d   :  { %3070 = vmatprep.subr.bf16.mxu1 %v3858_v27 }
 0x412   :  { %v460_v22 = vpop.f32.mrb[2].mxu1 }
 0x413   :  { %v466_v23 = vrot.slane %v460_v22, 4  ;;  %v462_v25 = vpop.f32.mrb[3].mxu1 }
 0x414   :  { %v469_v26 = vadd.f32 %v462_v25, %v4027_v43 }
 0x415   :  { %v468_v30 = vadd.f32 %v466_v23, %v4025_v42 }
 0x416   :  { %3309 = vtanh.f32 %v469_v26  ;;  %v496_v38 = vsub.f32 0.0, %v469_v26 }
 0x417   :  { %3311 = vtanh.f32 %v468_v30  ;;  %v470_v39 = vsub.f32 0.0, %v468_v30 }
 0x418   :  { %v497_v41 = vmul.f32 1.442695, %v496_v38 }
 0x419   :  { %v471_v44 = vmul.f32 1.442695, %v470_v39 }
 0x41a   :  { %3313 = vpow2.f32 %v497_v41 }
 0x41b   :  { %3315 = vpow2.f32 %v471_v44 }
 0x420   :  { %v3310_v32 = vpop.eup %3309 }
 0x421   :  { %v3312_v35 = vpop.eup %3311  ;;  %507 = vrot.lane.b32.xlu0 %v3310_v32, %s3676_s3 }
 0x422   :  { %481 = vrot.lane.b32.xlu1 %v3312_v35, %s3676_s3 }
 0x424   :  { %v3314_v46 = vpop.eup %3313 }
 0x425   :  { %v3316_v47 = vpop.eup %3315  ;;  %v499_v48 = vadd.f32 1.0, %v3314_v46 }
 0x426   :  { %v473_v43 = vadd.f32 1.0, %v3316_v47 }
 0x427   :  { %3317 = vrcp.f32 %v499_v48 }
 0x428   :  { %3319 = vrcp.f32 %v473_v43 }
 0x431   :  { %v3318_v42 = vpop.eup %3317 }
 0x432   :  { %v3320_v51 = vpop.eup %3319  ;;  %v505_v58 = vmul.f32 %v3318_v42, %v503_v56 }
 0x433   :  { %v479_v60 = vmul.f32 %v3320_v51, %v477_v57 }
 0x493   :  { %v508_v49 = vpop.permute.xlu0 %507 }
 0x494   :  { %v510_v52 = vmul.f32 %v3318_v42, %v508_v49  ;;  %v482_v54 = vpop.permute.xlu1 %481 }
 0x495   :  { %v484_v55 = vmul.f32 %v3320_v51, %v482_v54 }
 0x496   :  { %512 = vrot.lane.b32.xlu0 %v510_v52, %s3677_s17 }
 0x497   :  { %486 = vrot.lane.b32.xlu1 %v484_v55, %s3677_s17 }
 0x508   :  { %v513_v59 = vpop.permute.xlu0 %512 }
 0x509   :  { %v4068_v62 = vadd.f32 %v513_v59, %v505_v58  ;;  %v487_v63 = vpop.permute.xlu1 %486 }
 0x50a   :  { %v4070_v1 = vadd.f32 %v487_v63, %v479_v60 }
 0x50b   :  { %3321 = vtanh.f32 %v4068_v62  ;;  %v652_v52 = vrot.slane %v4068_v62, 4 }
 0x50c   :  { %3323 = vtanh.f32 %v4070_v1  ;;  %v626_v49 = vrot.slane %v4070_v1, 4 }
 0x515   :  { %v3322_v2 = vpop.eup %3321 }
 0x516   :  { %v3324_v3 = vpop.eup %3323  ;;  %518 = vrot.lane.b32.xlu0 %v3322_v2, %s3676_s3 }
 0x517   :  { %492 = vrot.lane.b32.xlu1 %v3324_v3, %s3676_s3 }
 0x588   :  { %v519_v4 = vpop.permute.xlu0 %518 }
 0x589   :  { %v4076_v5 = vmul.f32 %v3318_v42, %v519_v4  ;;  %v493_v6 = vpop.permute.xlu1 %492 }
 0x58a   :  { %v495_v7 = vmul.f32 %v3320_v51, %v493_v6 }
 0x58b   :  { %v534_v8 = vrot.slane %v4076_v5, 4 }
 0x58c   :  { %523 = vrot.lane.b32.xlu0 %v495_v7, %s3677_s17 }
 0x58d   :  { %535 = vrot.lane.b32.xlu1 %v534_v8, %s3676_s3 }
 0x5fe   :  { %v524_v9 = vpop.permute.xlu0 %523 }
 0x5ff   :  { %527 = vst.msk [vmem:[#allocation2] sm:$0xf0] %vm526_vm3, %v524_v9  ;;  %v536_v10 = vpop.permute.xlu1 %535 }
 0x600   :  { %v538_v11 = vsel %vm389_vm1, %v524_v9, %v536_v10 }
 0x601   :  { %v540_v13 = vrot.slane %v538_v11, 4 }
 0x603   :  { %2892 = vmatmul.mubr.msk.f32.vlgmr.msra.gmra.mrb[8].mxu0 %vm247_vm2, %v540_v13 }
 0x604   :  { %3056 = vmatpush1.bf16.msra.mxu0 %v3860_v28  ;;  %900 = vmatprep.mubr.f32.mxu0 %v3675_v0 }
 0x605   :  { %3058 = vmatprep.subr.bf16.mxu0 %v3875_v34 }
 0x608   :  { %3060 = vmatpush1.bf16.msra.mxu0 %v3884_v37 }
 0x609   :  { %3062 = vmatprep.subr.bf16.mxu0 %v3902_v45 }
 0x60c   :  { %3064 = vmatpush1.bf16.msra.mxu0 %v3917_v50 }
 0x60d   :  { %3066 = vmatprep.subr.bf16.mxu0 %v3923_v53 }
 0x610   :  { %3068 = vmatpush1.bf16.msra.mxu0 %v3944_v61 }
 0x611   :  { %3086 = vmatprep.subr.bf16.mxu0 %v3858_v27 }
 0x6d6   :  { %v609_v14 = vpop.f32.mrb[8].mxu0 }
 0x6d7   :  { %v614_v16 = vadd.f32 %v609_v14, %v4015_v29  ;;  %v611_v17 = vpop.f32.mrb[9].mxu0 }
 0x6d8   :  { %v616_v19 = vrot.slane %v611_v17, 4 }
 0x6d9   :  { %3325 = vtanh.f32 %v614_v16  ;;  %v619_v25 = vsub.f32 0.0, %v614_v16 }
 0x6da   :  { %v618_v20 = vadd.f32 %v616_v19, %v4021_v36 }
 0x6db   :  { %v620_v30 = vmul.f32 1.442695, %v619_v25 }
 0x6dc   :  { %3327 = vtanh.f32 %v618_v20  ;;  %v645_v26 = vsub.f32 0.0, %v618_v20 }
 0x6dd   :  { %3329 = vpow2.f32 %v620_v30 }
 0x6de   :  { %v646_v32 = vmul.f32 1.442695, %v645_v26 }
 0x6e0   :  { %3331 = vpow2.f32 %v646_v32 }
 0x6e3   :  { %v3326_v22 = vpop.eup %3325 }
 0x6e4   :  { %630 = vrot.lane.b32.xlu1 %v3326_v22, %s3676_s3 }
 0x6e6   :  { %v3328_v23 = vpop.eup %3327 }
 0x6e7   :  { %656 = vrot.lane.b32.xlu0 %v3328_v23, %s3676_s3  ;;  %v3330_v35 = vpop.eup %3329 }
 0x6e8   :  { %v622_v39 = vadd.f32 1.0, %v3330_v35 }
 0x6ea   :  { %v3332_v38 = vpop.eup %3331  ;;  %3333 = vrcp.f32 %v622_v39 }
 0x6eb   :  { %v648_v41 = vadd.f32 1.0, %v3332_v38 }
 0x6ed   :  { %3335 = vrcp.f32 %v648_v41 }
 0x6f4   :  { %v3334_v44 = vpop.eup %3333 }
 0x6f5   :  { %v628_v51 = vmul.f32 %v3334_v44, %v626_v49 }
 0x6f7   :  { %v3336_v48 = vpop.eup %3335 }
 0x6f8   :  { %v654_v56 = vmul.f32 %v3336_v48, %v652_v52 }
 0x756   :  { %v631_v46 = vpop.permute.xlu1 %630 }
 0x757   :  { %v633_v47 = vmul.f32 %v3334_v44, %v631_v46 }
 0x759   :  { %635 = vrot.lane.b32.xlu1 %v633_v47, %s3677_s17  ;;  %v657_v43 = vpop.permute.xlu0 %656 }
 0x75a   :  { %v659_v42 = vmul.f32 %v3336_v48, %v657_v43 }
 0x75c   :  { %661 = vrot.lane.b32.xlu0 %v659_v42, %s3677_s17 }
 0x7cb   :  { %v636_v54 = vpop.permute.xlu1 %635 }
 0x7cc   :  { %v4101_v55 = vadd.f32 %v636_v54, %v628_v51 }
 0x7ce   :  { %3337 = vtanh.f32 %v4101_v55  ;;  %v662_v57 = vpop.permute.xlu0 %661  ;;  %v772_v41 = vrot.slane %v4101_v55, 4 }
 0x7cf   :  { %v664_v58 = vadd.f32 %v662_v57, %v654_v56 }
 0x7d1   :  { %3339 = vtanh.f32 %v664_v58  ;;  %v798_v39 = vrot.slane %v664_v58, 4 }
 0x7d8   :  { %v3338_v59 = vpop.eup %3337 }
 0x7d9   :  { %641 = vrot.lane.b32.xlu1 %v3338_v59, %s3676_s3 }
 0x7db   :  { %v3340_v60 = vpop.eup %3339 }
 0x7dc   :  { %667 = vrot.lane.b32.xlu0 %v3340_v60, %s3676_s3 }
 0x84b   :  { %v642_v63 = vpop.permute.xlu1 %641 }
 0x84c   :  { %v644_v1 = vmul.f32 %v3334_v44, %v642_v63 }
 0x84e   :  { %672 = vrot.lane.b32.xlu0 %v644_v1, %s3677_s17  ;;  %v668_v62 = vpop.permute.xlu0 %667 }
 0x84f   :  { %v4107_v2 = vmul.f32 %v3336_v48, %v668_v62 }
 0x851   :  { %v681_v3 = vrot.slane %v4107_v2, 4 }
 0x853   :  { %682 = vrot.lane.b32.xlu1 %v681_v3, %s3676_s3 }
 0x8c0   :  { %v673_v4 = vpop.permute.xlu0 %672 }
 0x8c1   :  { %675 = vst.msk [vmem:[#allocation2 + $0x8] sm:$0xf] %vm377_vm0, %v673_v4 }
 0x8c5   :  { %v683_v6 = vpop.permute.xlu1 %682 }
 0x8c6   :  { %v685_v7 = vsel %vm389_vm1, %v673_v4, %v683_v6 }
 0x8c7   :  { %2893 = vmatmul.mubr.msk.f32.vlgmr.msra.gmra.mrb[4].mxu1 %vm247_vm2, %v685_v7 }
 0x8c8   :  { %3072 = vmatpush1.bf16.msra.mxu1 %v3860_v28  ;;  %1046 = vmatprep.mubr.f32.mxu1 %v3675_v0 }
 0x8c9   :  { %3074 = vmatprep.subr.bf16.mxu1 %v3875_v34 }
 0x8cc   :  { %3076 = vmatpush1.bf16.msra.mxu1 %v3884_v37 }
 0x8cd   :  { %3078 = vmatprep.subr.bf16.mxu1 %v3902_v45 }
 0x8d0   :  { %3080 = vmatpush1.bf16.msra.mxu1 %v3917_v50 }
 0x8d1   :  { %3082 = vmatprep.subr.bf16.mxu1 %v3923_v53 }
 0x8d4   :  { %3084 = vmatpush1.bf16.msra.mxu1 %v3944_v61 }
 0x8d5   :  { %3102 = vmatprep.subr.bf16.mxu1 %v3858_v27 }
 0x99a   :  { %v755_v8 = vpop.f32.mrb[4].mxu1 }
 0x99b   :  { %v761_v9 = vrot.slane %v755_v8, 4  ;;  %v757_v10 = vpop.f32.mrb[5].mxu1 }
 0x99c   :  { %v764_v11 = vadd.f32 %v757_v10, %v4021_v36 }
 0x99d   :  { %v763_v13 = vadd.f32 %v761_v9, %v4015_v29 }
 0x99e   :  { %3341 = vtanh.f32 %v764_v11  ;;  %v791_v17 = vsub.f32 0.0, %v764_v11 }
 0x99f   :  { %3343 = vtanh.f32 %v763_v13  ;;  %v765_v19 = vsub.f32 0.0, %v763_v13 }
 0x9a0   :  { %v792_v20 = vmul.f32 1.442695, %v791_v17 }
 0x9a1   :  { %v766_v22 = vmul.f32 1.442695, %v765_v19 }
 0x9a2   :  { %3345 = vpow2.f32 %v792_v20 }
 0x9a3   :  { %3347 = vpow2.f32 %v766_v22 }
 0x9a8   :  { %v3342_v14 = vpop.eup %3341 }
 0x9a9   :  { %v3344_v16 = vpop.eup %3343  ;;  %802 = vrot.lane.b32.xlu0 %v3342_v14, %s3676_s3 }
 0x9aa   :  { %776 = vrot.lane.b32.xlu1 %v3344_v16, %s3676_s3 }
 0x9ac   :  { %v3346_v27 = vpop.eup %3345 }
 0x9ad   :  { %v3348_v23 = vpop.eup %3347  ;;  %v794_v25 = vadd.f32 1.0, %v3346_v27 }
 0x9ae   :  { %v768_v36 = vadd.f32 1.0, %v3348_v23 }
 0x9af   :  { %3349 = vrcp.f32 %v794_v25 }
 0x9b0   :  { %3351 = vrcp.f32 %v768_v36 }
 0x9b9   :  { %v3350_v29 = vpop.eup %3349 }
 0x9ba   :  { %v3352_v30 = vpop.eup %3351  ;;  %v800_v44 = vmul.f32 %v3350_v29, %v798_v39 }
 0x9bb   :  { %v774_v47 = vmul.f32 %v3352_v30, %v772_v41 }
 0xa1b   :  { %v803_v26 = vpop.permute.xlu0 %802 }
 0xa1c   :  { %v805_v32 = vmul.f32 %v3350_v29, %v803_v26  ;;  %v777_v35 = vpop.permute.xlu1 %776 }
 0xa1d   :  { %v779_v38 = vmul.f32 %v3352_v30, %v777_v35 }
 0xa1e   :  { %807 = vrot.lane.b32.xlu0 %v805_v32, %s3677_s17 }
 0xa1f   :  { %781 = vrot.lane.b32.xlu1 %v779_v38, %s3677_s17 }
 0xa90   :  { %v808_v46 = vpop.permute.xlu0 %807 }
 0xa91   :  { %v4130_v48 = vadd.f32 %v808_v46, %v800_v44  ;;  %v782_v43 = vpop.permute.xlu1 %781 }
 0xa92   :  { %v784_v42 = vadd.f32 %v782_v43, %v774_v47 }
 0xa93   :  { %3353 = vtanh.f32 %v4130_v48 }
 0xa94   :  { %3355 = vtanh.f32 %v784_v42 }
 0xa9d   :  { %v3354_v49 = vpop.eup %3353 }
 0xa9e   :  { %v3356_v51 = vpop.eup %3355  ;;  %813 = vrot.lane.b32.xlu0 %v3354_v49, %s3676_s3 }
 0xa9f   :  { %787 = vrot.lane.b32.xlu1 %v3356_v51, %s3676_s3 }
 0xb10   :  { %v814_v52 = vpop.permute.xlu0 %813 }
 0xb11   :  { %v4135_v54 = vmul.f32 %v3350_v29, %v814_v52  ;;  %v788_v55 = vpop.permute.xlu1 %787  ;;  %v919_v29 = vrot.slane %v784_v42, 4 }
 0xb12   :  { %v790_v56 = vmul.f32 %v3352_v30, %v788_v55  ;;  %v945_v30 = vrot.slane %v4130_v48, 4 }
 0xb13   :  { %v827_v57 = vrot.slane %v4135_v54, 4 }
 0xb14   :  { %818 = vrot.lane.b32.xlu0 %v790_v56, %s3677_s17 }
 0xb15   :  { %828 = vrot.lane.b32.xlu1 %v827_v57, %s3676_s3 }
 0xb86   :  { %v819_v58 = vpop.permute.xlu0 %818 }
 0xb87   :  { %821 = vst.msk [vmem:[#allocation2 + $0x8] sm:$0xf0] %vm526_vm3, %v819_v58  ;;  %v829_v59 = vpop.permute.xlu1 %828 }
 0xb88   :  { %v831_v60 = vsel %vm389_vm1, %v819_v58, %v829_v59 }
 0xb89   :  { %v833_v63 = vrot.slane %v831_v60, 4 }
 0xb8b   :  { %2894 = vmatmul.mubr.msk.f32.vlgmr.msra.gmra.mrb[10].mxu0 %vm247_vm2, %v833_v63 }
 0xb8c   :  { %3088 = vmatpush1.bf16.msra.mxu0 %v3860_v28  ;;  %1193 = vmatprep.mubr.f32.mxu0 %v3675_v0 }
 0xb8d   :  { %3090 = vmatprep.subr.bf16.mxu0 %v3875_v34 }
 0xb90   :  { %3092 = vmatpush1.bf16.msra.mxu0 %v3884_v37 }
 0xb91   :  { %3094 = vmatprep.subr.bf16.mxu0 %v3902_v45 }
 0xb94   :  { %3096 = vmatpush1.bf16.msra.mxu0 %v3917_v50 }
 0xb95   :  { %3098 = vmatprep.subr.bf16.mxu0 %v3923_v53 }
 0xb98   :  { %3100 = vmatpush1.bf16.msra.mxu0 %v3944_v61 }
 0xc5e   :  { %v902_v1 = vpop.f32.mrb[10].mxu0 }
 0xc5f   :  { %v907_v62 = vadd.f32 %v902_v1, %v4019_v33  ;;  %v904_v3 = vpop.f32.mrb[11].mxu0 }
 0xc60   :  { %v909_v4 = vrot.slane %v904_v3, 4 }
 0xc61   :  { %3357 = vtanh.f32 %v907_v62  ;;  %v912_v9 = vsub.f32 0.0, %v907_v62 }
 0xc62   :  { %v911_v6 = vadd.f32 %v909_v4, %v4017_v31 }
 0xc63   :  { %v913_v11 = vmul.f32 1.442695, %v912_v9 }
 0xc64   :  { %3359 = vtanh.f32 %v911_v6  ;;  %v938_v10 = vsub.f32 0.0, %v911_v6 }
 0xc65   :  { %3361 = vpow2.f32 %v913_v11 }
 0xc66   :  { %v939_v13 = vmul.f32 1.442695, %v938_v10 }
 0xc68   :  { %3363 = vpow2.f32 %v939_v13 }
 0xc6b   :  { %v3358_v7 = vpop.eup %3357 }
 0xc6c   :  { %923 = vrot.lane.b32.xlu1 %v3358_v7, %s3676_s3 }
 0xc6e   :  { %v3360_v8 = vpop.eup %3359 }
 0xc6f   :  { %949 = vrot.lane.b32.xlu0 %v3360_v8, %s3676_s3  ;;  %v3362_v14 = vpop.eup %3361 }
 0xc70   :  { %v915_v17 = vadd.f32 1.0, %v3362_v14 }
 0xc72   :  { %v3364_v16 = vpop.eup %3363  ;;  %3365 = vrcp.f32 %v915_v17 }
 0xc73   :  { %v941_v19 = vadd.f32 1.0, %v3364_v16 }
 0xc75   :  { %3367 = vrcp.f32 %v941_v19 }
 0xc7c   :  { %v3366_v20 = vpop.eup %3365 }
 0xc7d   :  { %v921_v26 = vmul.f32 %v3366_v20, %v919_v29 }
 0xc7f   :  { %v3368_v23 = vpop.eup %3367 }
 0xc80   :  { %v947_v38 = vmul.f32 %v3368_v23, %v945_v30 }
 0xcde   :  { %v924_v22 = vpop.permute.xlu1 %923 }
 0xcdf   :  { %v926_v27 = vmul.f32 %v3366_v20, %v924_v22 }
 0xce1   :  { %928 = vrot.lane.b32.xlu1 %v926_v27, %s3677_s17  ;;  %v950_v25 = vpop.permute.xlu0 %949 }
 0xce2   :  { %v952_v36 = vmul.f32 %v3368_v23, %v950_v25 }
 0xce4   :  { %954 = vrot.lane.b32.xlu0 %v952_v36, %s3677_s17 }
 0xd53   :  { %v929_v32 = vpop.permute.xlu1 %928 }
 0xd54   :  { %v4158_v35 = vadd.f32 %v929_v32, %v921_v26 }
 0xd56   :  { %3369 = vtanh.f32 %v4158_v35  ;;  %v955_v39 = vpop.permute.xlu0 %954  ;;  %v1065_v9 = vrot.slane %v4158_v35, 4 }
 0xd57   :  { %v957_v41 = vadd.f32 %v955_v39, %v947_v38 }
 0xd59   :  { %3371 = vtanh.f32 %v957_v41  ;;  %v1091_v8 = vrot.slane %v957_v41, 4 }
 0xd60   :  { %v3370_v44 = vpop.eup %3369 }
 0xd61   :  { %934 = vrot.lane.b32.xlu1 %v3370_v44, %s3676_s3 }
 0xd63   :  { %v3372_v46 = vpop.eup %3371 }
 0xd64   :  { %960 = vrot.lane.b32.xlu0 %v3372_v46, %s3676_s3 }
 0xdd3   :  { %v935_v47 = vpop.permute.xlu1 %934 }
 0xdd4   :  { %v937_v43 = vmul.f32 %v3366_v20, %v935_v47 }
 0xdd6   :  { %965 = vrot.lane.b32.xlu0 %v937_v43, %s3677_s17  ;;  %v961_v48 = vpop.permute.xlu0 %960 }
 0xdd7   :  { %v4164_v42 = vmul.f32 %v3368_v23, %v961_v48 }
 0xdd9   :  { %v974_v49 = vrot.slane %v4164_v42, 4 }
 0xddb   :  { %975 = vrot.lane.b32.xlu1 %v974_v49, %s3676_s3 }
 0xe48   :  { %v4168_v51 = vpop.permute.xlu0 %965 }
 0xe4d   :  { %v976_v52 = vpop.permute.xlu1 %975 }
 0xe4e   :  { %v978_v55 = vsel %vm389_vm1, %v4168_v51, %v976_v52 }
 0xe4f   :  { %2895 = vmatmul.mubr.msk.f32.vlgmr.msra.gmra.mrb[6].mxu1 %vm247_vm2, %v978_v55 }
 0xe50   :  { %3104 = vmatpush1.bf16.msra.mxu1 %v3860_v28  ;;  %1339 = vmatprep.mubr.f32.mxu1 %v3675_v0 }
 0xe51   :  { %3106 = vmatprep.subr.bf16.mxu1 %v3875_v34 }
 0xe54   :  { %3108 = vmatpush1.bf16.msra.mxu1 %v3884_v37 }
 0xe55   :  { %3110 = vmatprep.subr.bf16.mxu1 %v3902_v45 }
 0xe58   :  { %3112 = vmatpush1.bf16.msra.mxu1 %v3917_v50 }
 0xe59   :  { %3114 = vmatprep.subr.bf16.mxu1 %v3923_v53 }
 0xe5c   :  { %3116 = vmatpush1.bf16.msra.mxu1 %v3944_v61 }
 0xf22   :  { %v1048_v56 = vpop.f32.mrb[6].mxu1 }
 0xf23   :  { %v1054_v57 = vrot.slane %v1048_v56, 4  ;;  %v1050_v58 = vpop.f32.mrb[7].mxu1 }
 0xf24   :  { %v1057_v59 = vadd.f32 %v1050_v58, %v4017_v31 }
 0xf25   :  { %v1056_v28 = vadd.f32 %v1054_v57, %v4019_v33 }
 0xf26   :  { %3373 = vtanh.f32 %v1057_v59  ;;  %v1084_v37 = vsub.f32 0.0, %v1057_v59 }
 0xf27   :  { %3375 = vtanh.f32 %v1056_v28  ;;  %v1058_v45 = vsub.f32 0.0, %v1056_v28 }
 0xf28   :  { %v1085_v50 = vmul.f32 1.442695, %v1084_v37 }
 0xf29   :  { %v1059_v53 = vmul.f32 1.442695, %v1058_v45 }
 0xf2a   :  { %3377 = vpow2.f32 %v1085_v50 }
 0xf2b   :  { %3379 = vpow2.f32 %v1059_v53 }
 0xf30   :  { %v3374_v34 = vpop.eup %3373 }
 0xf31   :  { %v3376_v60 = vpop.eup %3375  ;;  %1095 = vrot.lane.b32.xlu0 %v3374_v34, %s3676_s3 }
 0xf32   :  { %1069 = vrot.lane.b32.xlu1 %v3376_v60, %s3676_s3 }
 0xf34   :  { %v3378_v61 = vpop.eup %3377 }
 0xf35   :  { %v3380_v63 = vpop.eup %3379  ;;  %v1087_v1 = vadd.f32 1.0, %v3378_v61 }
 0xf36   :  { %v1061_v31 = vadd.f32 1.0, %v3380_v63 }
 0xf37   :  { %3381 = vrcp.f32 %v1087_v1 }
 0xf38   :  { %3383 = vrcp.f32 %v1061_v31 }
 0xf41   :  { %v3382_v33 = vpop.eup %3381 }
 0xf42   :  { %v3384_v3 = vpop.eup %3383  ;;  %v1093_v10 = vmul.f32 %v3382_v33, %v1091_v8 }
 0xf43   :  { %v1067_v13 = vmul.f32 %v3384_v3, %v1065_v9 }
 0xfa3   :  { %v1096_v62 = vpop.permute.xlu0 %1095 }
 0xfa4   :  { %v1098_v4 = vmul.f32 %v3382_v33, %v1096_v62  ;;  %v1070_v6 = vpop.permute.xlu1 %1069 }
 0xfa5   :  { %v1072_v7 = vmul.f32 %v3384_v3, %v1070_v6 }
 0xfa6   :  { %1100 = vrot.lane.b32.xlu0 %v1098_v4, %s3677_s17 }
 0xfa7   :  { %1074 = vrot.lane.b32.xlu1 %v1072_v7, %s3677_s17 }
0x1018   :  { %v1101_v11 = vpop.permute.xlu0 %1100 }
0x1019   :  { %v1103_v14 = vadd.f32 %v1101_v11, %v1093_v10  ;;  %v1075_v16 = vpop.permute.xlu1 %1074 }
0x101a   :  { %v1077_v17 = vadd.f32 %v1075_v16, %v1067_v13 }
0x101b   :  { %3385 = vtanh.f32 %v1103_v14  ;;  %v1238_v61 = vrot.slane %v1103_v14, 4 }
0x101c   :  { %3387 = vtanh.f32 %v1077_v17  ;;  %v1212_v50 = vrot.slane %v1077_v17, 4 }
0x1025   :  { %v3386_v19 = vpop.eup %3385 }
0x1026   :  { %v3388_v20 = vpop.eup %3387  ;;  %1106 = vrot.lane.b32.xlu0 %v3386_v19, %s3676_s3 }
0x1027   :  { %1080 = vrot.lane.b32.xlu1 %v3388_v20, %s3676_s3 }
0x1098   :  { %v1107_v22 = vpop.permute.xlu0 %1106 }
0x1099   :  { %v4190_v27 = vmul.f32 %v3382_v33, %v1107_v22  ;;  %v1081_v23 = vpop.permute.xlu1 %1080 }
0x109a   :  { %v1083_v25 = vmul.f32 %v3384_v3, %v1081_v23 }
0x109b   :  { %v1120_v36 = vrot.slane %v4190_v27, 4 }
0x109c   :  { %1111 = vrot.lane.b32.xlu0 %v1083_v25, %s3677_s17 }
0x109d   :  { %1121 = vrot.lane.b32.xlu1 %v1120_v36, %s3676_s3 }
0x110e   :  { %v4195_v29 = vpop.permute.xlu0 %1111 }
0x110f   :  { %v1122_v26 = vpop.permute.xlu1 %1121 }
0x1110   :  { %v1124_v30 = vsel %vm389_vm1, %v4195_v29, %v1122_v26 }
0x1111   :  { %v1126_v32 = vrot.slane %v1124_v30, 4 }
0x1113   :  { %2896 = vmatmul.mubr.msk.f32.vlgmr.msra.gmra.mrb[12].mxu0 %vm247_vm2, %v1126_v32 }
0x1114   :  { %1521 = vmatprep.mubr.f32.mxu0 %v3675_v0 }
0x11e6   :  { %v1195_v35 = vpop.f32.mrb[12].mxu0 }
0x11e7   :  { %v1200_v38 = vadd.f32 %v1195_v35, %v4023_v40  ;;  %v1197_v39 = vpop.f32.mrb[13].mxu0 }
0x11e8   :  { %v1202_v41 = vrot.slane %v1197_v39, 4 }
0x11e9   :  { %3389 = vtanh.f32 %v1200_v38  ;;  %v1205_v43 = vsub.f32 0.0, %v1200_v38 }
0x11ea   :  { %v1204_v44 = vadd.f32 %v1202_v41, %v4011_v24 }
0x11eb   :  { %v1206_v49 = vmul.f32 1.442695, %v1205_v43 }
0x11ec   :  { %3391 = vtanh.f32 %v1204_v44  ;;  %v1231_v48 = vsub.f32 0.0, %v1204_v44 }
0x11ed   :  { %3393 = vpow2.f32 %v1206_v49 }
0x11ee   :  { %v1232_v52 = vmul.f32 1.442695, %v1231_v48 }
0x11f0   :  { %3395 = vpow2.f32 %v1232_v52 }
0x11f3   :  { %v3390_v46 = vpop.eup %3389 }
0x11f4   :  { %1216 = vrot.lane.b32.xlu1 %v3390_v46, %s3676_s3 }
0x11f6   :  { %v3392_v47 = vpop.eup %3391 }
0x11f7   :  { %1242 = vrot.lane.b32.xlu0 %v3392_v47, %s3676_s3  ;;  %v3394_v55 = vpop.eup %3393 }
0x11f8   :  { %v1208_v57 = vadd.f32 1.0, %v3394_v55 }
0x11fa   :  { %v3396_v56 = vpop.eup %3395  ;;  %3397 = vrcp.f32 %v1208_v57 }
0x11fb   :  { %v1234_v58 = vadd.f32 1.0, %v3396_v56 }
0x11fd   :  { %3399 = vrcp.f32 %v1234_v58 }
0x1204   :  { %v3398_v59 = vpop.eup %3397 }
0x1205   :  { %v1214_v53 = vmul.f32 %v3398_v59, %v1212_v50 }
0x1207   :  { %v3400_v60 = vpop.eup %3399 }
0x1208   :  { %v1240_v31 = vmul.f32 %v3400_v60, %v1238_v61  ;;  %v1547_v61 = vld [vmem:[#allocation6 + $0x8] sm:$0xff] }
0x1266   :  { %v1217_v28 = vpop.permute.xlu1 %1216 }
0x1267   :  { %v1219_v34 = vmul.f32 %v3398_v59, %v1217_v28 }
0x1269   :  { %1221 = vrot.lane.b32.xlu1 %v1219_v34, %s3677_s17  ;;  %v1243_v37 = vpop.permute.xlu0 %1242 }
0x126a   :  { %v1245_v45 = vmul.f32 %v3400_v60, %v1243_v37  ;;  %v1420_v37 = vld [vmem:[#allocation3 + $0x18] sm:$0xff] }
0x126c   :  { %1247 = vrot.lane.b32.xlu0 %v1245_v45, %s3677_s17  ;;  %v1417_v45 = vld [vmem:[#allocation3] sm:$0xff] }
0x12db   :  { %v1222_v63 = vpop.permute.xlu1 %1221 }
0x12dc   :  { %v1224_v1 = vadd.f32 %v1222_v63, %v1214_v53  ;;  %v1419_v53 = vld [vmem:[#allocation3 + $0x10] sm:$0xff]  ;;  %v1549_v63 = vld [vmem:[#allocation6 + $0x18] sm:$0xff] }
0x12de   :  { %3401 = vtanh.f32 %v1224_v1  ;;  %v1248_v33 = vpop.permute.xlu0 %1247  ;;  %v1358_v49 = vrot.slane %v1224_v1, 4  ;;  %v3119_v1 = vpack.c.bf16 %v1419_v53, %v1417_v45 }
0x12df   :  { %v1250_v62 = vadd.f32 %v1248_v33, %v1240_v31  ;;  %v4234_v31 = vpack.c.bf16 %v1549_v63, %v1547_v61  ;;  %v1546_v33 = vld [vmem:[#allocation6] sm:$0xff] }
0x12e1   :  { %3403 = vtanh.f32 %v1250_v62  ;;  %v1384_v48 = vrot.slane %v1250_v62, 4  ;;  %v1548_v62 = vld [vmem:[#allocation6 + $0x10] sm:$0xff]  ;;  %3134 = vmatprep.subr.bf16.mxu1 %v4234_v31 }
0x12e8   :  { %v3402_v3 = vpop.eup %3401 }
0x12e9   :  { %1227 = vrot.lane.b32.xlu1 %v3402_v3, %s3676_s3  ;;  %v1422_v3 = vld [vmem:[#allocation3 + $0x28] sm:$0xff] }
0x12eb   :  { %v3404_v4 = vpop.eup %3403 }
0x12ec   :  { %1253 = vrot.lane.b32.xlu0 %v3404_v4, %s3676_s3  ;;  %v4236_v4 = vpack.c.bf16 %v1548_v62, %v1546_v33 }
0x135b   :  { %v1228_v6 = vpop.permute.xlu1 %1227 }
0x135c   :  { %v1230_v7 = vmul.f32 %v3398_v59, %v1228_v6  ;;  %v1424_v6 = vld [vmem:[#allocation3 + $0x38] sm:$0xff] }
0x135e   :  { %1258 = vrot.lane.b32.xlu0 %v1230_v7, %s3677_s17  ;;  %v1254_v8 = vpop.permute.xlu0 %1253  ;;  %v1421_v7 = vld [vmem:[#allocation3 + $0x20] sm:$0xff] }
0x135f   :  { %v1256_v9 = vmul.f32 %v3400_v60, %v1254_v8  ;;  %v1418_v60 = vld [vmem:[#allocation3 + $0x8] sm:$0xff]  ;;  %v1423_v8 = vld [vmem:[#allocation3 + $0x30] sm:$0xff] }
0x1360   :  { %v3117_v50 = vpack.c.bf16 %v1420_v37, %v1418_v60 }
0x1361   :  { %v1267_v10 = vrot.slane %v1256_v9, 4 }
0x1362   :  { %3118 = vmatprep.subr.bf16.mxu0 %v3117_v50 }
0x1363   :  { %1268 = vrot.lane.b32.xlu1 %v1267_v10, %s3676_s3  ;;  %3120 = vmatpush1.bf16.msra.mxu0 %v3119_v1  ;;  %v3123_v10 = vpack.c.bf16 %v1423_v8, %v1421_v7  ;;  %v1433_v1 = vld [vmem:[%s4545_s6] sm:$0x3] }
0x1364   :  { %v1438_v33 = vrot.slane %v1433_v1, %v134_v21  ;;  %v1442_v62 = vrot.slane %v1433_v1, %v138_v18 }
0x13d0   :  { %v4211_v11 = vpop.permute.xlu0 %1258 }
0x13d5   :  { %v1269_v13 = vpop.permute.xlu1 %1268 }
0x13d6   :  { %v1271_v14 = vsel %vm389_vm1, %v4211_v11, %v1269_v13  ;;  %v1551_v13 = vld [vmem:[#allocation6 + $0x28] sm:$0xff] }
0x13d7   :  { %2897 = vmatmul.mubr.msk.f32.vlgmr.msra.gmra.mrb[8].mxu1 %vm247_vm2, %v1271_v14  ;;  %v1553_v14 = vld [vmem:[#allocation6 + $0x38] sm:$0xff] }
0x13d8   :  { %1626 = vmatprep.mubr.f32.mxu1 %v3675_v0  ;;  %3136 = vmatpush1.bf16.msra.mxu1 %v4236_v4 }
0x14aa   :  { %v1341_v16 = vpop.f32.mrb[8].mxu1 }
0x14ab   :  { %v1347_v17 = vrot.slane %v1341_v16, 4  ;;  %v1343_v19 = vpop.f32.mrb[9].mxu1  ;;  %v1550_v16 = vld [vmem:[#allocation6 + $0x20] sm:$0xff] }
0x14ac   :  { %v1350_v20 = vadd.f32 %v1343_v19, %v4011_v24  ;;  %v1552_v19 = vld [vmem:[#allocation6 + $0x30] sm:$0xff] }
0x14ad   :  { %v1349_v22 = vadd.f32 %v1347_v17, %v4023_v40  ;;  %v4242_v17 = vpack.c.bf16 %v1553_v14, %v1551_v13 }
0x14ae   :  { %3405 = vtanh.f32 %v1350_v20  ;;  %v1377_v36 = vsub.f32 0.0, %v1350_v20  ;;  %v4244_v20 = vpack.c.bf16 %v1552_v19, %v1550_v16 }
0x14af   :  { %3407 = vtanh.f32 %v1349_v22  ;;  %v1351_v26 = vsub.f32 0.0, %v1349_v22  ;;  %3138 = vmatprep.subr.bf16.mxu1 %v4242_v17  ;;  %v1428_v22 = vld [vmem:[#allocation3 + $0x58] sm:$0xff] }
0x14b0   :  { %v1378_v30 = vmul.f32 1.442695, %v1377_v36  ;;  %3140 = vmatpush1.bf16.msra.mxu1 %v4244_v20  ;;  %v1427_v36 = vld [vmem:[#allocation3 + $0x50] sm:$0xff] }
0x14b1   :  { %v1352_v32 = vmul.f32 1.442695, %v1351_v26 }
0x14b2   :  { %3409 = vpow2.f32 %v1378_v30  ;;  %v1555_v30 = vld [vmem:[#allocation6 + $0x48] sm:$0xff] }
0x14b3   :  { %3411 = vpow2.f32 %v1352_v32  ;;  %v1557_v32 = vld [vmem:[#allocation6 + $0x58] sm:$0xff] }
0x14b8   :  { %v3406_v23 = vpop.eup %3405 }
0x14b9   :  { %v3408_v25 = vpop.eup %3407  ;;  %1388 = vrot.lane.b32.xlu0 %v3406_v23, %s3676_s3 }
0x14ba   :  { %1362 = vrot.lane.b32.xlu1 %v3408_v25, %s3676_s3  ;;  %v1425_v25 = vld [vmem:[#allocation3 + $0x40] sm:$0xff] }
0x14bb   :  { %v3127_v26 = vpack.c.bf16 %v1427_v36, %v1425_v25 }
0x14bc   :  { %v3410_v35 = vpop.eup %3409 }
0x14bd   :  { %v3412_v38 = vpop.eup %3411  ;;  %v1380_v39 = vadd.f32 1.0, %v3410_v35  ;;  %v4252_v35 = vpack.c.bf16 %v1557_v32, %v1555_v30 }
0x14be   :  { %v1354_v24 = vadd.f32 1.0, %v3412_v38  ;;  %v1554_v38 = vld [vmem:[#allocation6 + $0x40] sm:$0xff] }
0x14bf   :  { %3413 = vrcp.f32 %v1380_v39  ;;  %v1556_v39 = vld [vmem:[#allocation6 + $0x50] sm:$0xff]  ;;  %3142 = vmatprep.subr.bf16.mxu1 %v4252_v35 }
0x14c0   :  { %3415 = vrcp.f32 %v1354_v24  ;;  %v1430_v24 = vld [vmem:[#allocation3 + $0x68] sm:$0xff] }
0x14c9   :  { %v4221_v40 = vpop.eup %3413 }
0x14ca   :  { %v4223_v44 = vpop.eup %3415  ;;  %v1386_v52 = vmul.f32 %v4221_v40, %v1384_v48  ;;  %v1559_v48 = vld [vmem:[#allocation6 + $0x68] sm:$0xff] }
0x14cb   :  { %v1360_v56 = vmul.f32 %v4223_v44, %v1358_v49  ;;  %v1561_v49 = vld [vmem:[#allocation6 + $0x78] sm:$0xff] }
0x152b   :  { %v1389_v41 = vpop.permute.xlu0 %1388 }
0x152c   :  { %v1391_v46 = vmul.f32 %v4221_v40, %v1389_v41  ;;  %v1363_v47 = vpop.permute.xlu1 %1362  ;;  %v1432_v41 = vld [vmem:[#allocation3 + $0x78] sm:$0xff] }
0x152d   :  { %v1365_v43 = vmul.f32 %v4223_v44, %v1363_v47  ;;  %v1431_v47 = vld [vmem:[#allocation3 + $0x70] sm:$0xff] }
0x152e   :  { %1393 = vrot.lane.b32.xlu0 %v1391_v46, %s3677_s17  ;;  %v1429_v46 = vld [vmem:[#allocation3 + $0x60] sm:$0xff] }
0x152f   :  { %1367 = vrot.lane.b32.xlu1 %v1365_v43, %s3677_s17  ;;  %v3131_v43 = vpack.c.bf16 %v1431_v47, %v1429_v46 }
0x15a0   :  { %v1394_v55 = vpop.permute.xlu0 %1393 }
0x15a1   :  { %v1396_v57 = vadd.f32 %v1394_v55, %v1386_v52  ;;  %v1368_v58 = vpop.permute.xlu1 %1367  ;;  %v1558_v52 = vld [vmem:[#allocation6 + $0x60] sm:$0xff]  ;;  %v4258_v55 = vpack.c.bf16 %v1561_v49, %v1559_v48 }
0x15a2   :  { %v1370_v59 = vadd.f32 %v1368_v58, %v1360_v56  ;;  %v1560_v56 = vld [vmem:[#allocation6 + $0x70] sm:$0xff] }
0x15a3   :  { %3417 = vtanh.f32 %v1396_v57  ;;  %v4260_v57 = vpack.c.bf16 %v1560_v56, %v1558_v52 }
0x15a4   :  { %3419 = vtanh.f32 %v1370_v59 }
0x15ad   :  { %v3418_v28 = vpop.eup %3417 }
0x15ae   :  { %v3420_v34 = vpop.eup %3419  ;;  %1399 = vrot.lane.b32.xlu0 %v3418_v28, %s3676_s3 }
0x15af   :  { %1373 = vrot.lane.b32.xlu1 %v3420_v34, %s3676_s3 }
0x15b2   :  { %1263 = vrot.lane.b32.xlu0 %v1256_v9, %s3676_s3  ;;  %v3121_v9 = vpack.c.bf16 %v1424_v6, %v1422_v3 }
0x15b4   :  { %3122 = vmatprep.subr.bf16.mxu0 %v3121_v9 }
0x15b5   :  { %3124 = vmatpush1.bf16.msra.mxu0 %v3123_v10 }
0x15b6   :  { %970 = vrot.lane.b32.xlu0 %v4164_v42, %s3676_s3  ;;  %v1426_v42 = vld [vmem:[#allocation3 + $0x48] sm:$0xff] }
0x15b7   :  { %v3125_v23 = vpack.c.bf16 %v1428_v22, %v1426_v42 }
0x15b9   :  { %3126 = vmatprep.subr.bf16.mxu0 %v3125_v23 }
0x15ba   :  { %677 = vrot.lane.b32.xlu0 %v4107_v2, %s3676_s3  ;;  %3128 = vmatpush1.bf16.msra.mxu0 %v3127_v26  ;;  %v4254_v2 = vpack.c.bf16 %v1556_v39, %v1554_v38 }
0x15bc   :  { %3144 = vmatpush1.bf16.msra.mxu1 %v4254_v2 }
0x15bd   :  { %3146 = vmatprep.subr.bf16.mxu1 %v4258_v55 }
0x15be   :  { %380 = vrot.lane.b32.xlu0 %v4043_v12, %s3676_s3  ;;  %v3129_v12 = vpack.c.bf16 %v1432_v41, %v1430_v24 }
0x15c0   :  { %3130 = vmatprep.subr.bf16.mxu0 %v3129_v12  ;;  %3148 = vmatpush1.bf16.msra.mxu1 %v4260_v57 }
0x15c1   :  { %3132 = vmatpush1.bf16.msra.mxu0 %v3131_v43  ;;  %3166 = vmatprep.subr.bf16.mxu1 %v4234_v31 }
0x15c2   :  { %3150 = vmatprep.subr.bf16.mxu0 %v4234_v31 }
0x15c3   :  { %1627 = vmatmul.mubr.f32.vlgmr.msra.gmra.mrb[10].mxu1 %v3675_v0 }
0x15c4   :  { %3168 = vmatpush1.bf16.msra.mxu1 %v4236_v4  ;;  %1906 = vmatprep.mubr.f32.mxu1 %v3675_v0 }
0x15c5   :  { %3170 = vmatprep.subr.bf16.mxu1 %v4242_v17 }
0x15c8   :  { %3172 = vmatpush1.bf16.msra.mxu1 %v4244_v20 }
0x15c9   :  { %3174 = vmatprep.subr.bf16.mxu1 %v4252_v35 }
0x15cc   :  { %3176 = vmatpush1.bf16.msra.mxu1 %v4254_v2 }
0x15cd   :  { %3178 = vmatprep.subr.bf16.mxu1 %v4258_v55 }
0x15d0   :  { %3180 = vmatpush1.bf16.msra.mxu1 %v4260_v57 }
0x15d1   :  { %3198 = vmatprep.subr.bf16.mxu1 %v4234_v31 }
0x1620   :  { %v1400_v58 = vpop.permute.xlu0 %1399 }
0x1621   :  { %v1402_v59 = vmul.f32 %v4221_v40, %v1400_v58  ;;  %v1374_v28 = vpop.permute.xlu1 %1373 }
0x1622   :  { %v1376_v34 = vmul.f32 %v4223_v44, %v1374_v28 }
0x1623   :  { %1409 = vrot.lane.b32.xlu1 %v1402_v59, %s3676_s3 }
0x1624   :  { %1404 = vrot.lane.b32.xlu0 %v1376_v34, %s3677_s17  ;;  %v1264_v60 = vpop.permute.xlu0 %1263 }
0x1625   :  { %1266 = vst.msk [vmem:[#allocation2] sm:$0xf0] %vm383_vm4, %v1264_v60 }
0x1627   :  { %1116 = vrot.lane.b32.xlu1 %v4190_v27, %s3676_s3 }
0x1628   :  { %v971_v40 = vpop.permute.xlu0 %970 }
0x1629   :  { %973 = vst.msk [vmem:[#allocation2 + $0x8] sm:$0xf0] %vm383_vm4, %v971_v40 }
0x162b   :  { %823 = vrot.lane.b32.xlu1 %v4135_v54, %s3676_s3 }
0x162c   :  { %v678_v44 = vpop.permute.xlu0 %677 }
0x162d   :  { %680 = vst.msk [vmem:[#allocation2 + $0x10] sm:$0xf0] %vm383_vm4, %v678_v44 }
0x162e   :  { %1114 = vst.msk [vmem:[#allocation2 + $0x10] sm:$0xf0] %vm526_vm3, %v4195_v29 }
0x162f   :  { %529 = vrot.lane.b32.xlu1 %v4076_v5, %s3676_s3 }
0x1630   :  { %v381_v27 = vpop.permute.xlu0 %380 }
0x1631   :  { %384 = vst.msk [vmem:[#allocation2 + $0x18] sm:$0xf0] %vm383_vm4, %v381_v27 }
0x1695   :  { %v1410_v54 = vpop.permute.xlu1 %1409 }
0x1696   :  { %1412 = vst.msk [vmem:[#allocation2] sm:$0xf] %vm532_vm5, %v1410_v54  ;;  %v1405_v37 = vpop.permute.xlu0 %1404 }
0x1697   :  { %1407 = vst.msk [vmem:[#allocation2 + $0x18] sm:$0xf0] %vm526_vm3, %v1405_v37 }
0x1699   :  { %v1117_v45 = vpop.permute.xlu1 %1116 }
0x169a   :  { %1119 = vst.msk [vmem:[#allocation2 + $0x8] sm:$0xf] %vm532_vm5, %v1117_v45 }
0x169d   :  { %v824_v29 = vpop.permute.xlu1 %823  ;;  %v1413_v50 = vld [vmem:[#allocation2] sm:$0xff] }
0x169e   :  { %826 = vst.msk [vmem:[#allocation2 + $0x10] sm:$0xf] %vm532_vm5, %v824_v29  ;;  %2898 = vmatmul.mubr.msk.f32.vlgmr.msra.gmra.mrb[14].mxu0 %vm247_vm2, %v1413_v50 }
0x169f   :  { %968 = vst.msk [vmem:[#allocation2 + $0x10] sm:$0xf] %vm377_vm0, %v4168_v51  ;;  %1527 = vmatprep.mubr.f32.mxu0 %v3675_v0  ;;  %3152 = vmatpush1.bf16.msra.mxu0 %v4236_v4 }
0x16a0   :  { %3154 = vmatprep.subr.bf16.mxu0 %v4242_v17 }
0x16a1   :  { %v530_v5 = vpop.permute.xlu1 %529  ;;  %v1414_v53 = vld [vmem:[#allocation2 + $0x8] sm:$0xff] }
0x16a2   :  { %533 = vst.msk [vmem:[#allocation2 + $0x18] sm:$0xf] %vm532_vm5, %v530_v5  ;;  %2899 = vmatmul.mubr.msk.f32.gmra.mrb[16].mxu0 %vm247_vm2, %v1414_v53 }
0x16a3   :  { %1261 = vst.msk [vmem:[#allocation2 + $0x18] sm:$0xf] %vm377_vm0, %v4211_v11  ;;  %1533 = vmatprep.mubr.f32.mxu0 %v3675_v0  ;;  %3156 = vmatpush1.bf16.msra.mxu0 %v4244_v20  ;;  %v1628_v11 = vpop.f32.mrb[10].mxu1 }
0x16a4   :  { %3158 = vmatprep.subr.bf16.mxu0 %v4252_v35  ;;  %v1630_v63 = vpop.f32.mrb[11].mxu1 }
0x16a5   :  { %v1635_v22 = vrot.slane %v1630_v63, 4 }
0x16a6   :  { %v1415_v51 = vld [vmem:[#allocation2 + $0x10] sm:$0xff] }
0x16a7   :  { %2900 = vmatmul.mubr.msk.f32.gmra.mrb[18].mxu0 %vm247_vm2, %v1415_v51 }
0x16a8   :  { %1539 = vmatprep.mubr.f32.mxu0 %v3675_v0  ;;  %3160 = vmatpush1.bf16.msra.mxu0 %v4254_v2 }
0x16a9   :  { %3162 = vmatprep.subr.bf16.mxu0 %v4258_v55 }
0x16aa   :  { %v1416_v61 = vld [vmem:[#allocation2 + $0x18] sm:$0xff] }
0x16ab   :  { %2901 = vmatmul.mubr.msk.f32.gmra.mrb[20].mxu0 %vm247_vm2, %v1416_v61 }
0x16ac   :  { %3164 = vmatpush1.bf16.msra.mxu0 %v4260_v57  ;;  %1762 = vmatprep.mubr.f32.mxu0 %v3675_v0 }
0x16ad   :  { %3182 = vmatprep.subr.bf16.mxu0 %v4234_v31 }
0x1771   :  { %v1523_v3 = vpop.f32.mrb[14].mxu0 }
0x1772   :  { %v4324_v6 = vadd.f32 %v1523_v3, %v1438_v33  ;;  %v1525_v7 = vpop.f32.mrb[15].mxu0 }
0x1773   :  { %v4326_v8 = vadd.f32 %v1525_v7, %v1442_v62 }
0x1774   :  { %v1633_v9 = vadd.f32 %v1628_v11, %v4324_v6 }
0x1775   :  { %v1529_v10 = vpop.f32.mrb[16].mxu0 }
0x1776   :  { %3421 = vtanh.f32 %v1633_v9  ;;  %v4329_v13 = vadd.f32 %v1529_v10, %v1438_v33  ;;  %v1531_v14 = vpop.f32.mrb[17].mxu0  ;;  %v1638_v38 = vsub.f32 0.0, %v1633_v9 }
0x1777   :  { %v4331_v16 = vadd.f32 %v1531_v14, %v1442_v62 }
0x1778   :  { %v1639_v39 = vmul.f32 1.442695, %v1638_v38 }
0x177a   :  { %v1535_v19 = vpop.f32.mrb[18].mxu0 }
0x177b   :  { %v4333_v21 = vadd.f32 %v1535_v19, %v1438_v33  ;;  %v1537_v15 = vpop.f32.mrb[19].mxu0 }
0x177c   :  { %v4335_v18 = vadd.f32 %v1537_v15, %v1442_v62 }
0x177e   :  { %v1541_v42 = vpop.f32.mrb[20].mxu0 }
0x177f   :  { %v4337_v23 = vadd.f32 %v1541_v42, %v1438_v33  ;;  %v1543_v25 = vpop.f32.mrb[21].mxu0 }
0x1780   :  { %v3422_v36 = vpop.eup %3421  ;;  %v1544_v26 = vadd.f32 %v1543_v25, %v1442_v62 }
0x1781   :  { %1646 = vrot.lane.b32.xlu0 %v3422_v36, %s3676_s3 }
0x1782   :  { %v1637_v30 = vadd.f32 %v1635_v22, %v1544_v26 }
0x1784   :  { %3423 = vtanh.f32 %v1637_v30  ;;  %v1661_v24 = vsub.f32 0.0, %v1637_v30 }
0x1785   :  { %3425 = vpow2.f32 %v1639_v39 }
0x1786   :  { %v1662_v12 = vmul.f32 1.442695, %v1661_v24 }
0x1788   :  { %3427 = vpow2.f32 %v1662_v12 }
0x178e   :  { %v3424_v32 = vpop.eup %3423 }
0x178f   :  { %1669 = vrot.lane.b32.xlu1 %v3424_v32, %s3676_s3  ;;  %v3426_v41 = vpop.eup %3425 }
0x1790   :  { %v1641_v46 = vadd.f32 1.0, %v3426_v41 }
0x1792   :  { %3429 = vrcp.f32 %v1641_v46  ;;  %v3428_v47 = vpop.eup %3427 }
0x1793   :  { %v1664_v48 = vadd.f32 1.0, %v3428_v47 }
0x1795   :  { %3431 = vrcp.f32 %v1664_v48 }
0x179c   :  { %v3430_v43 = vpop.eup %3429 }
0x179d   :  { %v1644_v28 = vmul.f32 0.0, %v3430_v43 }
0x179f   :  { %v3432_v56 = vpop.eup %3431 }
0x17a0   :  { %v1667_v44 = vmul.f32 0.0, %v3432_v56 }
0x17f3   :  { %v1647_v49 = vpop.permute.xlu0 %1646 }
0x17f4   :  { %v1649_v52 = vmul.f32 %v3430_v43, %v1647_v49 }
0x17f6   :  { %1651 = vrot.lane.b32.xlu0 %v1649_v52, %s3677_s17 }
0x1801   :  { %v1670_v58 = vpop.permute.xlu1 %1669 }
0x1802   :  { %v1672_v59 = vmul.f32 %v3432_v56, %v1670_v58 }
0x1804   :  { %1674 = vrot.lane.b32.xlu1 %v1672_v59, %s3677_s17 }
0x1868   :  { %v1652_v34 = vpop.permute.xlu0 %1651 }
0x1869   :  { %v4343_v60 = vadd.f32 %v1652_v34, %v1644_v28 }
0x186b   :  { %3433 = vtanh.f32 %v4343_v60  ;;  %v1781_v41 = vrot.slane %v4343_v60, 4 }
0x1875   :  { %v3434_v40 = vpop.eup %3433 }
0x1876   :  { %v1675_v27 = vpop.permute.xlu1 %1674  ;;  %1657 = vrot.lane.b32.xlu0 %v3434_v40, %s3676_s3 }
0x1877   :  { %v1677_v54 = vadd.f32 %v1675_v27, %v1667_v44 }
0x1879   :  { %3435 = vtanh.f32 %v1677_v54  ;;  %v1807_v24 = vrot.slane %v1677_v54, 4 }
0x1883   :  { %v3436_v37 = vpop.eup %3435 }
0x1884   :  { %1680 = vrot.lane.b32.xlu1 %v3436_v37, %s3676_s3 }
0x18e8   :  { %v1658_v45 = vpop.permute.xlu0 %1657 }
0x18e9   :  { %v1660_v29 = vmul.f32 %v3430_v43, %v1658_v45 }
0x18eb   :  { %1685 = vrot.lane.b32.xlu1 %v1660_v29, %s3677_s17 }
0x18f6   :  { %v1681_v50 = vpop.permute.xlu1 %1680 }
0x18f7   :  { %v1683_v5 = vmul.f32 %v3432_v56, %v1681_v50 }
0x18f9   :  { %v1689_v53 = vrot.slane %v1683_v5, 4 }
0x18fb   :  { %1690 = vrot.lane.b32.xlu0 %v1689_v53, %s3676_s3 }
0x195d   :  { %v1686_v51 = vpop.permute.xlu1 %1685 }
0x196d   :  { %v1691_v61 = vpop.permute.xlu0 %1690 }
0x196e   :  { %v4351_v11 = vsel %vm389_vm1, %v1686_v51, %v1691_v61 }
0x196f   :  { %2902 = vmatmul.mubr.msk.f32.vlgmr.msra.gmra.mrb[22].mxu0 %vm247_vm2, %v4351_v11 }
0x1970   :  { %3184 = vmatpush1.bf16.msra.mxu0 %v4236_v4  ;;  %2048 = vmatprep.mubr.f32.mxu0 %v3675_v0 }
0x1971   :  { %3186 = vmatprep.subr.bf16.mxu0 %v4242_v17 }
0x1974   :  { %3188 = vmatpush1.bf16.msra.mxu0 %v4244_v20 }
0x1975   :  { %3190 = vmatprep.subr.bf16.mxu0 %v4252_v35 }
0x1978   :  { %3192 = vmatpush1.bf16.msra.mxu0 %v4254_v2 }
0x1979   :  { %3194 = vmatprep.subr.bf16.mxu0 %v4258_v55 }
0x197c   :  { %3196 = vmatpush1.bf16.msra.mxu0 %v4260_v57 }
0x197d   :  { %3214 = vmatprep.subr.bf16.mxu0 %v4234_v31 }
0x1a42   :  { %v1764_v63 = vpop.f32.mrb[22].mxu0 }
0x1a43   :  { %v1770_v1 = vrot.slane %v1764_v63, 4  ;;  %v1766_v33 = vpop.f32.mrb[23].mxu0 }
0x1a44   :  { %v1773_v62 = vadd.f32 %v1766_v33, %v1544_v26 }
0x1a45   :  { %v1772_v3 = vadd.f32 %v1770_v1, %v4324_v6 }
0x1a46   :  { %3437 = vtanh.f32 %v1773_v62  ;;  %v1800_v10 = vsub.f32 0.0, %v1773_v62 }
0x1a47   :  { %3439 = vtanh.f32 %v1772_v3  ;;  %v1774_v14 = vsub.f32 0.0, %v1772_v3 }
0x1a48   :  { %v1801_v19 = vmul.f32 1.442695, %v1800_v10 }
0x1a49   :  { %v1775_v15 = vmul.f32 1.442695, %v1774_v14 }
0x1a4a   :  { %3441 = vpow2.f32 %v1801_v19 }
0x1a4b   :  { %3443 = vpow2.f32 %v1775_v15 }
0x1a50   :  { %v3438_v7 = vpop.eup %3437 }
0x1a51   :  { %v3440_v9 = vpop.eup %3439  ;;  %1811 = vrot.lane.b32.xlu1 %v3438_v7, %s3676_s3 }
0x1a52   :  { %1785 = vrot.lane.b32.xlu0 %v3440_v9, %s3676_s3 }
0x1a54   :  { %v3442_v42 = vpop.eup %3441 }
0x1a55   :  { %v3444_v22 = vpop.eup %3443  ;;  %v1803_v25 = vadd.f32 1.0, %v3442_v42 }
0x1a56   :  { %v1777_v36 = vadd.f32 1.0, %v3444_v22 }
0x1a57   :  { %3445 = vrcp.f32 %v1803_v25 }
0x1a58   :  { %3447 = vrcp.f32 %v1777_v36 }
0x1a61   :  { %v3446_v6 = vpop.eup %3445 }
0x1a62   :  { %v3448_v30 = vpop.eup %3447  ;;  %v1809_v12 = vmul.f32 %v3446_v6, %v1807_v24 }
0x1a63   :  { %v1783_v47 = vmul.f32 %v3448_v30, %v1781_v41 }
0x1ac3   :  { %v1812_v26 = vpop.permute.xlu1 %1811 }
0x1ac4   :  { %v1814_v32 = vmul.f32 %v3446_v6, %v1812_v26  ;;  %v1786_v38 = vpop.permute.xlu0 %1785 }
0x1ac5   :  { %v1788_v39 = vmul.f32 %v3448_v30, %v1786_v38 }
0x1ac6   :  { %1816 = vrot.lane.b32.xlu1 %v1814_v32, %s3677_s17 }
0x1ac7   :  { %1790 = vrot.lane.b32.xlu0 %v1788_v39, %s3677_s17 }
0x1b38   :  { %v1817_v46 = vpop.permute.xlu1 %1816 }
0x1b39   :  { %v4370_v43 = vadd.f32 %v1817_v46, %v1809_v12  ;;  %v1791_v48 = vpop.permute.xlu0 %1790 }
0x1b3a   :  { %v1793_v49 = vadd.f32 %v1791_v48, %v1783_v47 }
0x1b3b   :  { %3449 = vtanh.f32 %v4370_v43 }
0x1b3c   :  { %3451 = vtanh.f32 %v1793_v49  ;;  %v1925_v25 = vrot.slane %v1793_v49, 4 }
0x1b45   :  { %v3450_v52 = vpop.eup %3449 }
0x1b46   :  { %v3452_v56 = vpop.eup %3451  ;;  %1822 = vrot.lane.b32.xlu1 %v3450_v52, %s3676_s3 }
0x1b47   :  { %1796 = vrot.lane.b32.xlu0 %v3452_v56, %s3676_s3 }
0x1bb8   :  { %v1823_v58 = vpop.permute.xlu1 %1822 }
0x1bb9   :  { %v1825_v59 = vmul.f32 %v3446_v6, %v1823_v58  ;;  %v1797_v28 = vpop.permute.xlu0 %1796  ;;  %v1951_v6 = vrot.slane %v4370_v43, 4 }
0x1bba   :  { %v1799_v34 = vmul.f32 %v3448_v30, %v1797_v28 }
0x1bbb   :  { %v1831_v60 = vrot.slane %v1825_v59, 4 }
0x1bbc   :  { %1827 = vrot.lane.b32.xlu1 %v1799_v34, %s3677_s17 }
0x1bbd   :  { %1832 = vrot.lane.b32.xlu0 %v1831_v60, %s3676_s3 }
0x1c2e   :  { %v1828_v40 = vpop.permute.xlu1 %1827 }
0x1c2f   :  { %v1833_v44 = vpop.permute.xlu0 %1832 }
0x1c30   :  { %v4378_v27 = vsel %vm389_vm1, %v1828_v40, %v1833_v44 }
0x1c31   :  { %v1837_v54 = vrot.slane %v4378_v27, 4 }
0x1c33   :  { %2903 = vmatmul.mubr.msk.f32.vlgmr.msra.gmra.mrb[12].mxu1 %vm247_vm2, %v1837_v54  ;;  %v1839_v49 = vadd.f32 %v1837_v54, %v4351_v11 }
0x1c34   :  { %3200 = vmatpush1.bf16.msra.mxu1 %v4236_v4  ;;  %2192 = vmatprep.mubr.f32.mxu1 %v3675_v0 }
0x1c35   :  { %3202 = vmatprep.subr.bf16.mxu1 %v4242_v17 }
0x1c38   :  { %3204 = vmatpush1.bf16.msra.mxu1 %v4244_v20 }
0x1c39   :  { %3206 = vmatprep.subr.bf16.mxu1 %v4252_v35 }
0x1c3c   :  { %3208 = vmatpush1.bf16.msra.mxu1 %v4254_v2 }
0x1c3d   :  { %3210 = vmatprep.subr.bf16.mxu1 %v4258_v55 }
0x1c40   :  { %3212 = vmatpush1.bf16.msra.mxu1 %v4260_v57 }
0x1c41   :  { %3230 = vmatprep.subr.bf16.mxu1 %v4234_v31 }
0x1d06   :  { %v1908_v37 = vpop.f32.mrb[12].mxu1 }
0x1d07   :  { %v1913_v45 = vadd.f32 %v1908_v37, %v4329_v13  ;;  %v1910_v29 = vpop.f32.mrb[13].mxu1 }
0x1d08   :  { %v1915_v50 = vrot.slane %v1910_v29, 4 }
0x1d09   :  { %3453 = vtanh.f32 %v1913_v45  ;;  %v1918_v61 = vsub.f32 0.0, %v1913_v45 }
0x1d0a   :  { %v1917_v5 = vadd.f32 %v1915_v50, %v4335_v18 }
0x1d0b   :  { %v1919_v1 = vmul.f32 1.442695, %v1918_v61 }
0x1d0c   :  { %3455 = vtanh.f32 %v1917_v5  ;;  %v1944_v63 = vsub.f32 0.0, %v1917_v5 }
0x1d0d   :  { %3457 = vpow2.f32 %v1919_v1 }
0x1d0e   :  { %v1945_v33 = vmul.f32 1.442695, %v1944_v63 }
0x1d10   :  { %3459 = vpow2.f32 %v1945_v33 }
0x1d13   :  { %v3454_v53 = vpop.eup %3453 }
0x1d14   :  { %1929 = vrot.lane.b32.xlu0 %v3454_v53, %s3676_s3 }
0x1d16   :  { %v3456_v51 = vpop.eup %3455 }
0x1d17   :  { %1955 = vrot.lane.b32.xlu1 %v3456_v51, %s3676_s3  ;;  %v3458_v62 = vpop.eup %3457 }
0x1d18   :  { %v1921_v7 = vadd.f32 1.0, %v3458_v62 }
0x1d1a   :  { %v3460_v3 = vpop.eup %3459  ;;  %3461 = vrcp.f32 %v1921_v7 }
0x1d1b   :  { %v1947_v9 = vadd.f32 1.0, %v3460_v3 }
0x1d1d   :  { %3463 = vrcp.f32 %v1947_v9 }
0x1d24   :  { %v3462_v10 = vpop.eup %3461 }
0x1d25   :  { %v1927_v36 = vmul.f32 %v3462_v10, %v1925_v25 }
0x1d27   :  { %v3464_v15 = vpop.eup %3463 }
0x1d28   :  { %v1953_v32 = vmul.f32 %v3464_v15, %v1951_v6 }
0x1d86   :  { %v1930_v14 = vpop.permute.xlu0 %1929 }
0x1d87   :  { %v1932_v19 = vmul.f32 %v3462_v10, %v1930_v14 }
0x1d89   :  { %1934 = vrot.lane.b32.xlu0 %v1932_v19, %s3677_s17  ;;  %v1956_v42 = vpop.permute.xlu1 %1955 }
0x1d8a   :  { %v1958_v22 = vmul.f32 %v3464_v15, %v1956_v42 }
0x1d8c   :  { %1960 = vrot.lane.b32.xlu1 %v1958_v22, %s3677_s17 }
0x1dfb   :  { %v1935_v26 = vpop.permute.xlu0 %1934 }
0x1dfc   :  { %v4400_v30 = vadd.f32 %v1935_v26, %v1927_v36 }
0x1dfe   :  { %3465 = vtanh.f32 %v4400_v30  ;;  %v1961_v38 = vpop.permute.xlu1 %1960  ;;  %v2067_v62 = vrot.slane %v4400_v30, 4 }
0x1dff   :  { %v1963_v39 = vadd.f32 %v1961_v38, %v1953_v32 }
0x1e01   :  { %3467 = vtanh.f32 %v1963_v39  ;;  %v2093_v33 = vrot.slane %v1963_v39, 4 }
0x1e08   :  { %v3466_v24 = vpop.eup %3465 }
0x1e09   :  { %1940 = vrot.lane.b32.xlu0 %v3466_v24, %s3676_s3 }
0x1e0b   :  { %v3468_v41 = vpop.eup %3467 }
0x1e0c   :  { %1966 = vrot.lane.b32.xlu1 %v3468_v41, %s3676_s3 }
0x1e7b   :  { %v1941_v12 = vpop.permute.xlu0 %1940 }
0x1e7c   :  { %v1943_v46 = vmul.f32 %v3462_v10, %v1941_v12 }
0x1e7e   :  { %1971 = vrot.lane.b32.xlu1 %v1943_v46, %s3677_s17  ;;  %v1967_v47 = vpop.permute.xlu1 %1966 }
0x1e7f   :  { %v1969_v43 = vmul.f32 %v3464_v15, %v1967_v47 }
0x1e81   :  { %v1975_v48 = vrot.slane %v1969_v43, 4 }
0x1e83   :  { %1976 = vrot.lane.b32.xlu0 %v1975_v48, %s3676_s3 }
0x1ef0   :  { %v1972_v52 = vpop.permute.xlu1 %1971 }
0x1ef5   :  { %v1977_v56 = vpop.permute.xlu0 %1976 }
0x1ef6   :  { %v1979_v58 = vsel %vm389_vm1, %v1972_v52, %v1977_v56 }
0x1ef7   :  { %v4411_v59 = vadd.f32 %v1979_v58, %v1839_v49  ;;  %2904 = vmatmul.mubr.msk.f32.vlgmr.msra.gmra.mrb[24].mxu0 %vm247_vm2, %v1979_v58 }
0x1ef8   :  { %3216 = vmatpush1.bf16.msra.mxu0 %v4236_v4  ;;  %2334 = vmatprep.mubr.f32.mxu0 %v3675_v0 }
0x1ef9   :  { %3218 = vmatprep.subr.bf16.mxu0 %v4242_v17 }
0x1efc   :  { %3220 = vmatpush1.bf16.msra.mxu0 %v4244_v20 }
0x1efd   :  { %3222 = vmatprep.subr.bf16.mxu0 %v4252_v35 }
0x1f00   :  { %3224 = vmatpush1.bf16.msra.mxu0 %v4254_v2 }
0x1f01   :  { %3226 = vmatprep.subr.bf16.mxu0 %v4258_v55 }
0x1f04   :  { %3228 = vmatpush1.bf16.msra.mxu0 %v4260_v57 }
0x1f05   :  { %3246 = vmatprep.subr.bf16.mxu0 %v4234_v31 }
0x1fca   :  { %v2050_v11 = vpop.f32.mrb[24].mxu0 }
0x1fcb   :  { %v2056_v28 = vrot.slane %v2050_v11, 4  ;;  %v2052_v34 = vpop.f32.mrb[25].mxu0 }
0x1fcc   :  { %v2059_v60 = vadd.f32 %v2052_v34, %v4335_v18 }
0x1fcd   :  { %v2058_v40 = vadd.f32 %v2056_v28, %v4329_v13 }
0x1fce   :  { %3469 = vtanh.f32 %v2059_v60  ;;  %v2086_v54 = vsub.f32 0.0, %v2059_v60 }
0x1fcf   :  { %3471 = vtanh.f32 %v2058_v40  ;;  %v2060_v37 = vsub.f32 0.0, %v2058_v40 }
0x1fd0   :  { %v2087_v45 = vmul.f32 1.442695, %v2086_v54 }
0x1fd1   :  { %v2061_v29 = vmul.f32 1.442695, %v2060_v37 }
0x1fd2   :  { %3473 = vpow2.f32 %v2087_v45 }
0x1fd3   :  { %3475 = vpow2.f32 %v2061_v29 }
0x1fd8   :  { %v3470_v44 = vpop.eup %3469 }
0x1fd9   :  { %v3472_v27 = vpop.eup %3471  ;;  %2097 = vrot.lane.b32.xlu1 %v3470_v44, %s3676_s3 }
0x1fda   :  { %2071 = vrot.lane.b32.xlu0 %v3472_v27, %s3676_s3 }
0x1fdc   :  { %v3474_v31 = vpop.eup %3473 }
0x1fdd   :  { %v3476_v50 = vpop.eup %3475  ;;  %v2089_v5 = vadd.f32 1.0, %v3474_v31 }
0x1fde   :  { %v2063_v18 = vadd.f32 1.0, %v3476_v50 }
0x1fdf   :  { %3477 = vrcp.f32 %v2089_v5 }
0x1fe0   :  { %3479 = vrcp.f32 %v2063_v18 }
0x1fe9   :  { %v3478_v13 = vpop.eup %3477 }
0x1fea   :  { %v3480_v51 = vpop.eup %3479  ;;  %v2095_v3 = vmul.f32 %v3478_v13, %v2093_v33 }
0x1feb   :  { %v2069_v9 = vmul.f32 %v3480_v51, %v2067_v62 }
0x204b   :  { %v2098_v53 = vpop.permute.xlu1 %2097 }
0x204c   :  { %v2100_v61 = vmul.f32 %v3478_v13, %v2098_v53  ;;  %v2072_v63 = vpop.permute.xlu0 %2071 }
0x204d   :  { %v2074_v1 = vmul.f32 %v3480_v51, %v2072_v63 }
0x204e   :  { %2102 = vrot.lane.b32.xlu1 %v2100_v61, %s3677_s17 }
0x204f   :  { %2076 = vrot.lane.b32.xlu0 %v2074_v1, %s3677_s17 }
0x20c0   :  { %v2103_v7 = vpop.permute.xlu1 %2102 }
0x20c1   :  { %v4430_v10 = vadd.f32 %v2103_v7, %v2095_v3  ;;  %v2077_v14 = vpop.permute.xlu0 %2076 }
0x20c2   :  { %v2079_v19 = vadd.f32 %v2077_v14, %v2069_v9 }
0x20c3   :  { %3481 = vtanh.f32 %v4430_v10  ;;  %v2237_v50 = vrot.slane %v4430_v10, 4 }
0x20c4   :  { %3483 = vtanh.f32 %v2079_v19  ;;  %v2211_v29 = vrot.slane %v2079_v19, 4 }
0x20cd   :  { %v3482_v15 = vpop.eup %3481 }
0x20ce   :  { %v3484_v42 = vpop.eup %3483  ;;  %2108 = vrot.lane.b32.xlu1 %v3482_v15, %s3676_s3 }
0x20cf   :  { %2082 = vrot.lane.b32.xlu0 %v3484_v42, %s3676_s3 }
0x2140   :  { %v2109_v22 = vpop.permute.xlu1 %2108 }
0x2141   :  { %v2111_v25 = vmul.f32 %v3478_v13, %v2109_v22  ;;  %v2083_v36 = vpop.permute.xlu0 %2082 }
0x2142   :  { %v2085_v6 = vmul.f32 %v3480_v51, %v2083_v36 }
0x2143   :  { %v2117_v26 = vrot.slane %v2111_v25, 4 }
0x2144   :  { %2113 = vrot.lane.b32.xlu1 %v2085_v6, %s3677_s17 }
0x2145   :  { %2118 = vrot.lane.b32.xlu0 %v2117_v26, %s3676_s3 }
0x21b6   :  { %v2114_v30 = vpop.permute.xlu1 %2113 }
0x21b7   :  { %v2119_v32 = vpop.permute.xlu0 %2118 }
0x21b8   :  { %v2121_v38 = vsel %vm389_vm1, %v2114_v30, %v2119_v32 }
0x21b9   :  { %v2123_v39 = vrot.slane %v2121_v38, 4 }
0x21bb   :  { %v4439_v24 = vadd.f32 %v2123_v39, %v4411_v59  ;;  %2905 = vmatmul.mubr.msk.f32.vlgmr.msra.gmra.mrb[14].mxu1 %vm247_vm2, %v2123_v39 }
0x21bc   :  { %3232 = vmatpush1.bf16.msra.mxu1 %v4236_v4  ;;  %2478 = vmatprep.mubr.f32.mxu1 %v3675_v0 }
0x21bd   :  { %3234 = vmatprep.subr.bf16.mxu1 %v4242_v17 }
0x21c0   :  { %3236 = vmatpush1.bf16.msra.mxu1 %v4244_v20 }
0x21c1   :  { %3238 = vmatprep.subr.bf16.mxu1 %v4252_v35 }
0x21c4   :  { %3240 = vmatpush1.bf16.msra.mxu1 %v4254_v2 }
0x21c5   :  { %3242 = vmatprep.subr.bf16.mxu1 %v4258_v55 }
0x21c8   :  { %3244 = vmatpush1.bf16.msra.mxu1 %v4260_v57 }
0x228e   :  { %v2194_v41 = vpop.f32.mrb[14].mxu1 }
0x228f   :  { %v2199_v12 = vadd.f32 %v2194_v41, %v4333_v21  ;;  %v2196_v46 = vpop.f32.mrb[15].mxu1 }
0x2290   :  { %v2201_v47 = vrot.slane %v2196_v46, 4 }
0x2291   :  { %3485 = vtanh.f32 %v2199_v12  ;;  %v2204_v52 = vsub.f32 0.0, %v2199_v12 }
0x2292   :  { %v2203_v43 = vadd.f32 %v2201_v47, %v4331_v16 }
0x2293   :  { %v2205_v58 = vmul.f32 1.442695, %v2204_v52 }
0x2294   :  { %3487 = vtanh.f32 %v2203_v43  ;;  %v2230_v56 = vsub.f32 0.0, %v2203_v43 }
0x2295   :  { %3489 = vpow2.f32 %v2205_v58 }
0x2296   :  { %v2231_v59 = vmul.f32 1.442695, %v2230_v56 }
0x2298   :  { %3491 = vpow2.f32 %v2231_v59 }
0x229b   :  { %v3486_v48 = vpop.eup %3485 }
0x229c   :  { %2215 = vrot.lane.b32.xlu0 %v3486_v48, %s3676_s3 }
0x229e   :  { %v3488_v49 = vpop.eup %3487 }
0x229f   :  { %2241 = vrot.lane.b32.xlu1 %v3488_v49, %s3676_s3  ;;  %v3490_v11 = vpop.eup %3489 }
0x22a0   :  { %v2207_v34 = vadd.f32 1.0, %v3490_v11 }
0x22a2   :  { %v3492_v28 = vpop.eup %3491  ;;  %3493 = vrcp.f32 %v2207_v34 }
0x22a3   :  { %v2233_v60 = vadd.f32 1.0, %v3492_v28 }
0x22a5   :  { %3495 = vrcp.f32 %v2233_v60 }
0x22ac   :  { %v3494_v40 = vpop.eup %3493 }
0x22ad   :  { %v2213_v31 = vmul.f32 %v3494_v40, %v2211_v29 }
0x22af   :  { %v3496_v54 = vpop.eup %3495 }
0x22b0   :  { %v2239_v13 = vmul.f32 %v3496_v54, %v2237_v50 }
0x230e   :  { %v2216_v44 = vpop.permute.xlu0 %2215 }
0x230f   :  { %v2218_v27 = vmul.f32 %v3494_v40, %v2216_v44 }
0x2311   :  { %2220 = vrot.lane.b32.xlu0 %v2218_v27, %s3677_s17  ;;  %v2242_v37 = vpop.permute.xlu1 %2241 }
0x2312   :  { %v2244_v45 = vmul.f32 %v3496_v54, %v2242_v37 }
0x2314   :  { %2246 = vrot.lane.b32.xlu1 %v2244_v45, %s3677_s17 }
0x2383   :  { %v2221_v5 = vpop.permute.xlu0 %2220 }
0x2384   :  { %v4457_v18 = vadd.f32 %v2221_v5, %v2213_v31 }
0x2386   :  { %3497 = vtanh.f32 %v4457_v18  ;;  %v2247_v53 = vpop.permute.xlu1 %2246  ;;  %v2353_v12 = vrot.slane %v4457_v18, 4 }
0x2387   :  { %v2249_v51 = vadd.f32 %v2247_v53, %v2239_v13 }
0x2389   :  { %3499 = vtanh.f32 %v2249_v51  ;;  %v2379_v41 = vrot.slane %v2249_v51, 4 }
0x2390   :  { %v3498_v61 = vpop.eup %3497 }
0x2391   :  { %2226 = vrot.lane.b32.xlu0 %v3498_v61, %s3676_s3 }
0x2393   :  { %v3500_v63 = vpop.eup %3499 }
0x2394   :  { %2252 = vrot.lane.b32.xlu1 %v3500_v63, %s3676_s3 }
0x2403   :  { %v2227_v1 = vpop.permute.xlu0 %2226 }
0x2404   :  { %v2229_v33 = vmul.f32 %v3494_v40, %v2227_v1 }
0x2406   :  { %2257 = vrot.lane.b32.xlu1 %v2229_v33, %s3677_s17  ;;  %v2253_v62 = vpop.permute.xlu1 %2252 }
0x2407   :  { %v2255_v3 = vmul.f32 %v3496_v54, %v2253_v62 }
0x2409   :  { %v2261_v7 = vrot.slane %v2255_v3, 4 }
0x240b   :  { %2262 = vrot.lane.b32.xlu0 %v2261_v7, %s3676_s3 }
0x2478   :  { %v2258_v9 = vpop.permute.xlu1 %2257 }
0x247d   :  { %v2263_v10 = vpop.permute.xlu0 %2262 }
0x247e   :  { %v2265_v14 = vsel %vm389_vm1, %v2258_v9, %v2263_v10 }
0x247f   :  { %v4466_v19 = vadd.f32 %v2265_v14, %v4439_v24  ;;  %2906 = vmatmul.mubr.msk.f32.vlgmr.msra.gmra.mrb[26].mxu0 %vm247_vm2, %v2265_v14 }
0x2480   :  { %3248 = vmatpush1.bf16.msra.mxu0 %v4236_v4  ;;  %2620 = vmatprep.mubr.f32.mxu0 %v3675_v0 }
0x2481   :  { %3250 = vmatprep.subr.bf16.mxu0 %v4242_v17 }
0x2484   :  { %3252 = vmatpush1.bf16.msra.mxu0 %v4244_v20 }
0x2485   :  { %3254 = vmatprep.subr.bf16.mxu0 %v4252_v35 }
0x2488   :  { %3256 = vmatpush1.bf16.msra.mxu0 %v4254_v2 }
0x2489   :  { %3258 = vmatprep.subr.bf16.mxu0 %v4258_v55 }
0x248c   :  { %3260 = vmatpush1.bf16.msra.mxu0 %v4260_v57 }
0x2552   :  { %v2336_v15 = vpop.f32.mrb[26].mxu0 }
0x2553   :  { %v2342_v42 = vrot.slane %v2336_v15, 4  ;;  %v2338_v22 = vpop.f32.mrb[27].mxu0 }
0x2554   :  { %v2345_v25 = vadd.f32 %v2338_v22, %v4331_v16 }
0x2555   :  { %v2344_v4 = vadd.f32 %v2342_v42, %v4333_v21 }
0x2556   :  { %3501 = vtanh.f32 %v2345_v25  ;;  %v2372_v20 = vsub.f32 0.0, %v2345_v25 }
0x2557   :  { %3503 = vtanh.f32 %v2344_v4  ;;  %v2346_v35 = vsub.f32 0.0, %v2344_v4 }
0x2558   :  { %v2373_v2 = vmul.f32 1.442695, %v2372_v20 }
0x2559   :  { %v2347_v55 = vmul.f32 1.442695, %v2346_v35 }
0x255a   :  { %3505 = vpow2.f32 %v2373_v2 }
0x255b   :  { %3507 = vpow2.f32 %v2347_v55 }
0x2560   :  { %v3502_v17 = vpop.eup %3501 }
0x2561   :  { %v3504_v36 = vpop.eup %3503  ;;  %2383 = vrot.lane.b32.xlu1 %v3502_v17, %s3676_s3 }
0x2562   :  { %2357 = vrot.lane.b32.xlu0 %v3504_v36, %s3676_s3 }
0x2564   :  { %v3506_v57 = vpop.eup %3505 }
0x2565   :  { %v3508_v6 = vpop.eup %3507  ;;  %v2375_v26 = vadd.f32 1.0, %v3506_v57 }
0x2566   :  { %v2349_v16 = vadd.f32 1.0, %v3508_v6 }
0x2567   :  { %3509 = vrcp.f32 %v2375_v26 }
0x2568   :  { %3511 = vrcp.f32 %v2349_v16 }
0x2571   :  { %v3510_v21 = vpop.eup %3509 }
0x2572   :  { %v3512_v32 = vpop.eup %3511  ;;  %v2381_v46 = vmul.f32 %v3510_v21, %v2379_v41 }
0x2573   :  { %v2355_v43 = vmul.f32 %v3512_v32, %v2353_v12 }
0x25d3   :  { %v2384_v30 = vpop.permute.xlu1 %2383 }
0x25d4   :  { %v2386_v38 = vmul.f32 %v3510_v21, %v2384_v30  ;;  %v2358_v39 = vpop.permute.xlu0 %2357 }
0x25d5   :  { %v2360_v24 = vmul.f32 %v3512_v32, %v2358_v39 }
0x25d6   :  { %2388 = vrot.lane.b32.xlu1 %v2386_v38, %s3677_s17 }
0x25d7   :  { %2362 = vrot.lane.b32.xlu0 %v2360_v24, %s3677_s17 }
0x2648   :  { %v2389_v47 = vpop.permute.xlu1 %2388 }
0x2649   :  { %v2391_v48 = vadd.f32 %v2389_v47, %v2381_v46  ;;  %v2363_v49 = vpop.permute.xlu0 %2362 }
0x264a   :  { %v2365_v52 = vadd.f32 %v2363_v49, %v2355_v43 }
0x264b   :  { %3513 = vtanh.f32 %v2391_v48  ;;  %v2523_v25 = vrot.slane %v2391_v48, 4 }
0x264c   :  { %3515 = vtanh.f32 %v2365_v52  ;;  %v2497_v42 = vrot.slane %v2365_v52, 4 }
0x2655   :  { %v3514_v56 = vpop.eup %3513 }
0x2656   :  { %v3516_v58 = vpop.eup %3515  ;;  %2394 = vrot.lane.b32.xlu1 %v3514_v56, %s3676_s3 }
0x2657   :  { %2368 = vrot.lane.b32.xlu0 %v3516_v58, %s3676_s3 }
0x26c8   :  { %v2395_v59 = vpop.permute.xlu1 %2394 }
0x26c9   :  { %v2397_v11 = vmul.f32 %v3510_v21, %v2395_v59  ;;  %v2369_v28 = vpop.permute.xlu0 %2368 }
0x26ca   :  { %v2371_v34 = vmul.f32 %v3512_v32, %v2369_v28 }
0x26cb   :  { %v2403_v60 = vrot.slane %v2397_v11, 4 }
0x26cc   :  { %2399 = vrot.lane.b32.xlu1 %v2371_v34, %s3677_s17 }
0x26cd   :  { %2404 = vrot.lane.b32.xlu0 %v2403_v60, %s3676_s3 }
0x273e   :  { %v2400_v40 = vpop.permute.xlu1 %2399 }
0x273f   :  { %v2405_v44 = vpop.permute.xlu0 %2404 }
0x2740   :  { %v2407_v27 = vsel %vm389_vm1, %v2400_v40, %v2405_v44 }
0x2741   :  { %v2409_v54 = vrot.slane %v2407_v27, 4 }
0x2743   :  { %v2411_v37 = vadd.f32 %v2409_v54, %v4466_v19  ;;  %2907 = vmatmul.mubr.msk.f32.vlgmr.msra.gmra.mrb[16].mxu1 %vm247_vm2, %v2409_v54 }
0x2744   :  { %2943 = vmatprep.mubr.msk.f32.mxu1 %vm3679_vm6, %v3675_v0 }
0x2816   :  { %v2480_v45 = vpop.f32.mrb[16].mxu1 }
0x2817   :  { %v2485_v29 = vadd.f32 %v2480_v45, %v4337_v23  ;;  %v2482_v31 = vpop.f32.mrb[17].mxu1 }
0x2818   :  { %v2487_v50 = vrot.slane %v2482_v31, 4 }
0x2819   :  { %3517 = vtanh.f32 %v2485_v29  ;;  %v2490_v53 = vsub.f32 0.0, %v2485_v29 }
0x281a   :  { %v2489_v5 = vadd.f32 %v2487_v50, %v4326_v8 }
0x281b   :  { %v2491_v61 = vmul.f32 1.442695, %v2490_v53  ;;  %v2700_v53 = vld [vmem:[#allocation8 + $0x8] sm:$0xff] }
0x281c   :  { %3519 = vtanh.f32 %v2489_v5  ;;  %v2516_v51 = vsub.f32 0.0, %v2489_v5 }
0x281d   :  { %3521 = vpow2.f32 %v2491_v61  ;;  %v3678_v61 = vmov 0.0|0.0  }
0x281e   :  { %v2517_v63 = vmul.f32 1.442695, %v2516_v51  ;;  %v2701_v51 = vld [vmem:[#allocation8 + $0x10] sm:$0xff]  ;;  %3261 = vmatprep.subr.bf16.mxu1 %v3678_v61  ;;  %3273 = vmatprep.subr.bf16.mxu0 %v3678_v61 }
0x2820   :  { %3523 = vpow2.f32 %v2517_v63 }
0x2823   :  { %v3518_v18 = vpop.eup %3517 }
0x2824   :  { %2501 = vrot.lane.b32.xlu0 %v3518_v18, %s3676_s3 }
0x2826   :  { %v3520_v13 = vpop.eup %3519 }
0x2827   :  { %2527 = vrot.lane.b32.xlu1 %v3520_v13, %s3676_s3  ;;  %v3522_v1 = vpop.eup %3521  ;;  %v2699_v13 = vld [vmem:[#allocation8] sm:$0xff] }
0x2828   :  { %v2493_v62 = vadd.f32 1.0, %v3522_v1  ;;  %v3262_v63 = vpack.c.bf16 %v2700_v53, %v2699_v13  ;;  %v2702_v1 = vld [vmem:[#allocation8 + $0x18] sm:$0xff] }
0x282a   :  { %v3524_v33 = vpop.eup %3523  ;;  %3525 = vrcp.f32 %v2493_v62  ;;  %3263 = vmatpush3.bf16.msra.mxu1 %v3262_v63 }
0x282b   :  { %v2519_v3 = vadd.f32 1.0, %v3524_v33  ;;  %v3265_v33 = vpack.c.bf16 %v2702_v1, %v2701_v51  ;;  %3264 = vmatprep.subr.bf16.mxu1 %v3678_v61 }
0x282d   :  { %3527 = vrcp.f32 %v2519_v3 }
0x282e   :  { %3266 = vmatpush3.bf16.msra.mxu1 %v3265_v33 }
0x282f   :  { %3267 = vmatprep.subr.bf16.mxu1 %v3678_v61 }
0x2834   :  { %v3526_v7 = vpop.eup %3525 }
0x2835   :  { %v2499_v22 = vmul.f32 %v3526_v7, %v2497_v42  ;;  %v2788_v42 = vld [vmem:[#allocation9] sm:$0xff] }
0x2837   :  { %v3528_v14 = vpop.eup %3527 }
0x2838   :  { %v2525_v36 = vmul.f32 %v3528_v14, %v2523_v25 }
0x2896   :  { %v2502_v9 = vpop.permute.xlu0 %2501 }
0x2897   :  { %v2504_v10 = vmul.f32 %v3526_v7, %v2502_v9  ;;  %v2704_v9 = vld [vmem:[#allocation8 + $0x28] sm:$0xff] }
0x2899   :  { %2506 = vrot.lane.b32.xlu0 %v2504_v10, %s3677_s17  ;;  %v2528_v19 = vpop.permute.xlu1 %2527 }
0x289a   :  { %v2530_v15 = vmul.f32 %v3528_v14, %v2528_v19  ;;  %v2706_v19 = vld [vmem:[#allocation8 + $0x38] sm:$0xff] }
0x289c   :  { %2532 = vrot.lane.b32.xlu1 %v2530_v15, %s3677_s17 }
0x290b   :  { %v2507_v4 = vpop.permute.xlu0 %2506 }
0x290c   :  { %v2509_v17 = vadd.f32 %v2507_v4, %v2499_v22  ;;  %v2789_v22 = vld [vmem:[#allocation9 + $0x8] sm:$0xff] }
0x290d   :  { %v3274_v4 = vpack.c.bf16 %v2789_v22, %v2788_v42 }
0x290e   :  { %3529 = vtanh.f32 %v2509_v17  ;;  %v2533_v20 = vpop.permute.xlu1 %2532 }
0x290f   :  { %v2535_v35 = vadd.f32 %v2533_v20, %v2525_v36 }
0x2911   :  { %3531 = vtanh.f32 %v2535_v35  ;;  %v2665_v54 = vrot.slane %v2535_v35, 4 }
0x2918   :  { %v3530_v2 = vpop.eup %3529 }
0x2919   :  { %2512 = vrot.lane.b32.xlu0 %v3530_v2, %s3676_s3 }
0x291b   :  { %v3532_v55 = vpop.eup %3531 }
0x291c   :  { %2538 = vrot.lane.b32.xlu1 %v3532_v55, %s3676_s3 }
0x298b   :  { %v2513_v57 = vpop.permute.xlu0 %2512 }
0x298c   :  { %v2515_v6 = vmul.f32 %v3526_v7, %v2513_v57  ;;  %v2703_v7 = vld [vmem:[#allocation8 + $0x20] sm:$0xff] }
0x298d   :  { %v3268_v10 = vpack.c.bf16 %v2704_v9, %v2703_v7 }
0x298e   :  { %2543 = vrot.lane.b32.xlu1 %v2515_v6, %s3677_s17  ;;  %v2539_v26 = vpop.permute.xlu1 %2538 }
0x298f   :  { %v2541_v16 = vmul.f32 %v3528_v14, %v2539_v26  ;;  %3269 = vmatpush3.bf16.msra.mxu1 %v3268_v10  ;;  %v2705_v14 = vld [vmem:[#allocation8 + $0x30] sm:$0xff] }
0x2990   :  { %3270 = vmatprep.subr.bf16.mxu1 %v3678_v61  ;;  %v3271_v15 = vpack.c.bf16 %v2706_v19, %v2705_v14 }
0x2991   :  { %v2547_v21 = vrot.slane %v2541_v16, 4  ;;  %v2790_v16 = vld [vmem:[#allocation9 + $0x10] sm:$0xff] }
0x2993   :  { %2548 = vrot.lane.b32.xlu0 %v2547_v21, %s3676_s3  ;;  %3272 = vmatpush3.bf16.msra.mxu1 %v3271_v15  ;;  %v2791_v21 = vld [vmem:[#allocation9 + $0x18] sm:$0xff] }
0x2a00   :  { %v2544_v30 = vpop.permute.xlu1 %2543 }
0x2a05   :  { %v2549_v32 = vpop.permute.xlu0 %2548 }
0x2a06   :  { %v2551_v38 = vsel %vm389_vm1, %v2544_v30, %v2549_v32  ;;  %v3277_v30 = vpack.c.bf16 %v2791_v21, %v2790_v16  ;;  %v2909_v32 = vld [vmem:[%s4547_s8] ss:$0 sm:$0xff] }
0x2a07   :  { %v4502_v39 = vadd.f32 %v2551_v38, %v2411_v37  ;;  %2908 = vmatmul.mubr.msk.f32.vlgmr.msra.gmra.mrb[28].mxu0 %vm247_vm2, %v2551_v38  ;;  %v2639_v37 = vrot.slane %v2509_v17, 4 }
0x2a08   :  { %2954 = vmatprep.mubr.msk.f32.mxu0 %vm3679_vm6, %v3675_v0  ;;  %3275 = vmatpush3.bf16.msra.mxu0 %v3274_v4 }
0x2a09   :  { %3276 = vmatprep.subr.bf16.mxu0 %v3678_v61 }
0x2a0c   :  { %3278 = vmatpush3.bf16.msra.mxu0 %v3277_v30 }
0x2ada   :  { %v2622_v24 = vpop.f32.mrb[28].mxu0 }
0x2adb   :  { %v2628_v41 = vrot.slane %v2622_v24, 4  ;;  %v2624_v12 = vpop.f32.mrb[29].mxu0 }
0x2adc   :  { %v2631_v46 = vadd.f32 %v2624_v12, %v4326_v8 }
0x2add   :  { %v2630_v47 = vadd.f32 %v2628_v41, %v4337_v23 }
0x2ade   :  { %3533 = vtanh.f32 %v2631_v46  ;;  %v2658_v49 = vsub.f32 0.0, %v2631_v46 }
0x2adf   :  { %3535 = vtanh.f32 %v2630_v47  ;;  %v2632_v52 = vsub.f32 0.0, %v2630_v47 }
0x2ae0   :  { %v2659_v56 = vmul.f32 1.442695, %v2658_v49 }
0x2ae1   :  { %v2633_v58 = vmul.f32 1.442695, %v2632_v52 }
0x2ae2   :  { %3537 = vpow2.f32 %v2659_v56 }
0x2ae3   :  { %3539 = vpow2.f32 %v2633_v58 }
0x2ae8   :  { %v3534_v43 = vpop.eup %3533 }
0x2ae9   :  { %v3536_v48 = vpop.eup %3535  ;;  %2669 = vrot.lane.b32.xlu1 %v3534_v43, %s3676_s3 }
0x2aea   :  { %2643 = vrot.lane.b32.xlu0 %v3536_v48, %s3676_s3 }
0x2aec   :  { %v3538_v59 = vpop.eup %3537 }
0x2aed   :  { %v3540_v11 = vpop.eup %3539  ;;  %v2661_v28 = vadd.f32 1.0, %v3538_v59 }
0x2aee   :  { %v2635_v8 = vadd.f32 1.0, %v3540_v11 }
0x2aef   :  { %3541 = vrcp.f32 %v2661_v28 }
0x2af0   :  { %3543 = vrcp.f32 %v2635_v8 }
0x2af9   :  { %v3542_v23 = vpop.eup %3541 }
0x2afa   :  { %v3544_v60 = vpop.eup %3543  ;;  %v2667_v45 = vmul.f32 %v3542_v23, %v2665_v54 }
0x2afb   :  { %v2641_v31 = vmul.f32 %v3544_v60, %v2639_v37 }
0x2b5b   :  { %v2670_v34 = vpop.permute.xlu1 %2669 }
0x2b5c   :  { %v2672_v40 = vmul.f32 %v3542_v23, %v2670_v34  ;;  %v2644_v44 = vpop.permute.xlu0 %2643 }
0x2b5d   :  { %v2646_v27 = vmul.f32 %v3544_v60, %v2644_v44 }
0x2b5e   :  { %2674 = vrot.lane.b32.xlu1 %v2672_v40, %s3677_s17 }
0x2b5f   :  { %2648 = vrot.lane.b32.xlu0 %v2646_v27, %s3677_s17 }
0x2bd0   :  { %v2675_v29 = vpop.permute.xlu1 %2674 }
0x2bd1   :  { %v2677_v50 = vadd.f32 %v2675_v29, %v2667_v45  ;;  %v2649_v5 = vpop.permute.xlu0 %2648 }
0x2bd2   :  { %v2651_v18 = vadd.f32 %v2649_v5, %v2641_v31 }
0x2bd3   :  { %3545 = vtanh.f32 %v2677_v50 }
0x2bd4   :  { %3547 = vtanh.f32 %v2651_v18 }
0x2bdd   :  { %v3546_v62 = vpop.eup %3545 }
0x2bde   :  { %v3548_v3 = vpop.eup %3547  ;;  %2680 = vrot.lane.b32.xlu1 %v3546_v62, %s3676_s3 }
0x2bdf   :  { %2654 = vrot.lane.b32.xlu0 %v3548_v3, %s3676_s3 }
0x2c50   :  { %v2681_v25 = vpop.permute.xlu1 %2680 }
0x2c51   :  { %v2683_v17 = vmul.f32 %v3542_v23, %v2681_v25  ;;  %v2655_v36 = vpop.permute.xlu0 %2654 }
0x2c52   :  { %v2657_v20 = vmul.f32 %v3544_v60, %v2655_v36 }
0x2c53   :  { %v2689_v35 = vrot.slane %v2683_v17, 4 }
0x2c54   :  { %2685 = vrot.lane.b32.xlu1 %v2657_v20, %s3677_s17 }
0x2c55   :  { %2690 = vrot.lane.b32.xlu0 %v2689_v35, %s3676_s3 }
0x2cc6   :  { %v2686_v2 = vpop.permute.xlu1 %2685 }
0x2cc7   :  { %v2691_v55 = vpop.permute.xlu0 %2690 }
0x2cc8   :  { %v2693_v57 = vsel %vm389_vm1, %v2686_v2, %v2691_v55 }
0x2cc9   :  { %v2695_v6 = vrot.slane %v2693_v57, 4 }
0x2ccb   :  { %v2697_v0 = vadd.f32 %v2695_v6, %v4502_v39  ;;  %v2911_v39 = vld [vmem:[%s4549_s10] ss:$0 sm:$0xff] }
0x2ccd   :  { %v2698_v26 = vmul.f32 0.125, %v2697_v0 }
0x2ccf   :  { %2944 = vmatmul.mubr.msk.f32.vlgmr.msra.gmra.mrb[18].mxu1 %vm247_vm2, %v2698_v26 }
0x2da2   :  { %v2783_v38 = vpop.f32.mrb[18].mxu1 }
0x2da3   :  { %v2784_v24 = vadd.f32 %v2909_v32, %v2783_v38  ;;  %v2945_v41 = vpop.f32.mrb[19].mxu1 }
0x2da5   :  { %v2787_v12 = vmax.f32 %v2784_v24, 0.0 }
0x2da7   :  { %2955 = vmatmul.mubr.msk.f32.vlgmr.msra.gmra.mrb[30].mxu0 %vm389_vm1, %v2787_v12 }
0x2e7a   :  { %v2868_v46 = vpop.f32.mrb[30].mxu0 }
0x2e7b   :  { %v2869_v47 = vadd.f32 %v2911_v39, %v2868_v46  ;;  %v2956_v43 = vpop.f32.mrb[31].mxu0 }
0x2e7d   :  { %2873 = vst.msk [vmem:[#allocation11] sm:$0xf] %vm2872_vm7, %v2869_v47 }
0x2e7e   :  { %3648 = shalt.err (!%p3645_p8)
}
0x2e7f   :  { %s3649_s27 = scalar_lea.hbm %s4550_s11, 64 }
0x2e80   :  { %p3650_p9 = scmp.ne.s32.totalorder %s4550_s11, %s3649_s27  ;;  %p3653_p10 = scmp.lt.u32.totalorder %s3649_s27, %s4550_s11 }
0x2e82   :  { %p3655_p11 = pnand %p3653_p10, %p3650_p9 }
0x2e84   :  { %3658 = shalt.err (!%p3655_p11)
}
0x2e85   :  { %2883 = dma.vmem_to_hbm [thread:$0]  %s2881_s18, 64, %s4550_s11, [#allocation5]  }
0x2e86   :  { %3665 = dma.done.wait [#allocation5], 64  }
0x2e87   :  { %3666 = vsyncadd [#allocation5], 4294967232 }
0x2e88   :  { %2887 = vsyncpa [#allocation4], 1 }
0x2e89   :  { %2888 = vsyncpa [#allocation7], 1 }
0x2e8a   :  { %2889 = vsyncpa [#allocation10], 1 }
0x2e8b   :  { %2890 = vsyncpa [#allocation5], 1 }

</bundles_post_ra>
